<compile_context>
chip_gen: v7x
topology: tpu7x:2x2x1
jax: 0.10.0
libtpu: 0.0.40
codegen_flags: <defaults>
</compile_context>

<pallas_src>
import jax
import jax.numpy as jnp
from jax.experimental import pallas as pl
from jax.experimental.pallas import tpu as pltpu

EPS = 1e-5


def _round_up(x, m):
    return (x + m - 1) // m * m


def _cdiv(a, b):
    return -(-a // b)


def _vmem_limit_bytes():
    # Per-generation scoped-VMEM budget (v5e/v6e: 128 MiB phys, v7x: 64 MiB).
    try:
        phys = pltpu.get_tpu_info().vmem_capacity_bytes
        return int(min(max(phys // 2, 32 * 1024 * 1024), 96 * 1024 * 1024))
    except Exception:
        return 32 * 1024 * 1024


# ----------------------------- grid geometry ---------------------------------

def _geometry(Ho, Wo):
    """Flattened 'extended conv grid' geometry for an Ho x Wo conv output.

    Core grid = (Ho+2) x (Wo+2) (output interior + zero halo = next conv's
    padded input).  The flat core is zero-extended by E = ext_rows * Wg rows on
    both sides so every tap slice (offset in [-Wg-1, Wg+1], length P8) stays in
    bounds.  P8 = core size rounded up to 8 keeps matmul M sublane-aligned.
    """
    Hg, Wg = Ho + 2, Wo + 2
    P = Hg * Wg
    P8 = _round_up(P, 8)
    ext_rows = _cdiv(Wg + 8, Wg)
    E = ext_rows * Wg
    rows = Hg + 2 * ext_rows
    Pe = rows * Wg
    return dict(Ho=Ho, Wo=Wo, Hg=Hg, Wg=Wg, P=P, P8=P8,
                ext_rows=ext_rows, E=E, rows=rows, Pe=Pe)


def _to_ext_grid(img, geom, row0, col0, c_to):
    """Zero-pad an (N, h, w, C) image onto the flattened extended grid.

    (row0, col0) is the image's offset inside the (Hg, Wg) core; channels are
    zero-padded to c_to.  One jnp.pad + reshape = one small XLA copy.
    """
    N, h, w, c = img.shape
    g = geom
    out = jnp.pad(
        img,
        ((0, 0),
         (g["ext_rows"] + row0, g["rows"] - g["ext_rows"] - row0 - h),
         (col0, g["Wg"] - col0 - w),
         (0, c_to - c)))
    return out.reshape(N, g["Pe"], c_to)


def _valid_mask(geom):
    """1.0 at valid (interior) output positions of the extended grid, else 0."""
    g = geom
    m = jnp.pad(jnp.ones((g["Ho"], g["Wo"]), jnp.float32),
                ((g["ext_rows"] + 1, g["ext_rows"] + 1), (1, 1)))
    return m.reshape(g["Pe"], 1)


# ----------------------------- Pallas kernels --------------------------------

def _make_conv_kernel(shifts, ext, p8, fuse_bn_relu):
    """Tap-sum convolution on the flattened extended grid + fused BN stats.

    Per grid step (one image): for every tap, load a statically-offset slice
    of the input block, (optionally apply the previous layer's BN scale/shift,
    ReLU and validity mask to it), and accumulate its matmul into an f32
    accumulator.  Epilogue: masked per-channel sum / sum-of-squares (bias-free,
    from the f32 accumulator), then store y = acc + bias in the storage dtype.
    """
    n_taps = len(shifts)

    def kernel(*refs):
        if fuse_bn_relu:
            (x_ref, w_ref, b_ref, mask_ref, scl_ref, sft_ref,
             y_ref, sum_ref, ssq_ref) = refs
        else:
            x_ref, w_ref, b_ref, mask_ref, y_ref, sum_ref, ssq_ref = refs
            scl_ref = sft_ref = None

        mxu_dt = x_ref.dtype
        cp = w_ref.shape[-1]

        acc = jnp.zeros((p8, cp), jnp.float32)
        for t in range(n_taps):                    # static unroll over taps
            start = ext + shifts[t]
            a = x_ref[0, pl.ds(start, p8), :]
            if fuse_bn_relu:
                # bn1 + relu fused on conv2's A operand; halo / extension rows
                # are forced to zero (= the conv's zero padding).
                mval = mask_ref[pl.ds(start, p8), :]
                a = a.astype(jnp.float32) * scl_ref[...] + sft_ref[...]
                a = jnp.where(mval > 0.5, jnp.maximum(a, 0.0), 0.0)
                a = a.astype(mxu_dt)
            acc = acc + jnp.dot(a, w_ref[t], preferred_element_type=jnp.float32)

        # BN partial statistics over valid positions only, bias-free and in f32
        # (cancellation-friendly: the bias is re-added analytically later).
        mvalid = mask_ref[pl.ds(ext, p8), :] > 0.5
        s = jnp.sum(jnp.where(mvalid, acc, 0.0), axis=0, keepdims=True)
        q = jnp.sum(jnp.where(mvalid, acc * acc, 0.0), axis=0, keepdims=True)
        sum_ref[...] = jnp.broadcast_to(s[None], sum_ref.shape)
        ssq_ref[...] = jnp.broadcast_to(q[None], ssq_ref.shape)

        # Store y = conv + bias on the extended grid (zero outside the core),
        # cast at store (bf16 by default -> half the HBM writeback).
        pe = y_ref.shape[1]
        tail = pe - ext - p8
        y = (acc + b_ref[...]).astype(y_ref.dtype)
        y_ref[0, pl.ds(0, ext), :] = jnp.zeros((ext, cp), y_ref.dtype)
        y_ref[0, pl.ds(ext, p8), :] = y
        y_ref[0, pl.ds(ext + p8, tail), :] = jnp.zeros((tail, cp), y_ref.dtype)

    return kernel


def _make_epilogue_kernel(ext, p8):
    """relu(bn2(y2) + skip) where skip = x_skip @ w3 + b3.

    The identity skip uses w3 = (padded) identity, the projection skip uses the
    1x1 conv weights - one kernel, no separate skip pallas_call, no HBM round
    trip of the skip tensor.
    """
    def kernel(y_ref, scl_ref, sft_ref, xs_ref, w3_ref, b3_ref, o_ref):
        y = y_ref[0, pl.ds(ext, p8), :].astype(jnp.float32)
        skip = jnp.dot(xs_ref[0, pl.ds(ext, p8), :], w3_ref[...],
                       preferred_element_type=jnp.float32) + b3_ref[...]
        o_ref[0] = jnp.maximum(y * scl_ref[...] + sft_ref[...] + skip, 0.0)

    return kernel


# ----------------------------- Pallas wrappers --------------------------------

def _conv_bn_pass(x_ext, w_taps, bias_p, mask, shifts, geom, *,
                  in_scale=None, in_shift=None, store_dtype, vmem_limit):
    N, Pe, ck = x_ext.shape
    T, _, cp = w_taps.shape
    P8, E = geom["P8"], geom["E"]
    fused = in_scale is not None
    kernel = _make_conv_kernel(tuple(shifts), E, P8, fused)

    cost = pl.CostEstimate(
        flops=2 * N * P8 * ck * cp * T,
        transcendentals=0,
        bytes_accessed=(x_ext.size * x_ext.dtype.itemsize
                        + w_taps.size * w_taps.dtype.itemsize
                        + N * Pe * cp * jnp.dtype(store_dtype).itemsize
                        + 2 * N * 8 * cp * 4))

    in_specs = [
        pl.BlockSpec((1, Pe, ck), lambda n: (n, 0, 0)),
        pl.BlockSpec((T, w_taps.shape[1], cp), lambda n: (0, 0, 0)),  # resident
        pl.BlockSpec((1, cp), lambda n: (0, 0)),
        pl.BlockSpec((Pe, 1), lambda n: (0, 0)),
    ]
    args = [x_ext, w_taps, bias_p, mask]
    if fused:
        in_specs += [pl.BlockSpec((1, ck), lambda n: (0, 0)),
                     pl.BlockSpec((1, ck), lambda n: (0, 0))]
        args += [in_scale, in_shift]

    y, s, q = pl.pallas_call(
        kernel,
        grid=(N,),
        in_specs=in_specs,
        out_specs=(pl.BlockSpec((1, Pe, cp), lambda n: (n, 0, 0)),
                   pl.BlockSpec((1, 8, cp), lambda n: (n, 0, 0)),
                   pl.BlockSpec((1, 8, cp), lambda n: (n, 0, 0))),
        out_shape=(jax.ShapeDtypeStruct((N, Pe, cp), store_dtype),
                   jax.ShapeDtypeStruct((N, 8, cp), jnp.float32),
                   jax.ShapeDtypeStruct((N, 8, cp), jnp.float32)),
        compiler_params=pltpu.CompilerParams(
            dimension_semantics=("parallel",), vmem_limit_bytes=vmem_limit),
        cost_estimate=cost,
    )(*args)
    return y, s, q


def _bn_skip_relu_pass(y2, scale, shift, xs_ext, w3, b3, geom, vmem_limit):
    N, Pe, cp = y2.shape
    ck = xs_ext.shape[-1]
    P8, E = geom["P8"], geom["E"]
    kernel = _make_epilogue_kernel(E, P8)
    return pl.pallas_call(
        kernel,
        grid=(N,),
        in_specs=[pl.BlockSpec((1, Pe, cp), lambda n: (n, 0, 0)),
                  pl.BlockSpec((1, cp), lambda n: (0, 0)),
                  pl.BlockSpec((1, cp), lambda n: (0, 0)),
                  pl.BlockSpec((1, Pe, ck), lambda n: (n, 0, 0)),
                  pl.BlockSpec((ck, cp), lambda n: (0, 0)),
                  pl.BlockSpec((1, cp), lambda n: (0, 0))],
        out_specs=pl.BlockSpec((1, P8, cp), lambda n: (n, 0, 0)),
        out_shape=jax.ShapeDtypeStruct((N, P8, cp), jnp.float32),
        compiler_params=pltpu.CompilerParams(
            dimension_semantics=("parallel",), vmem_limit_bytes=vmem_limit),
    )(y2, scale, shift, xs_ext, w3, b3)


# ----------------------------- XLA-side helpers -------------------------------

def _conv3x3_taps(w_oihw, stride, cin_p, cp, geom, mxu_dtype):
    """Stacked per-tap weight matrices + static flat tap shifts.

    stride 1: 9 taps over Cin channels.  stride 2: space-to-depth -> 4 taps
    over 4*Cin channels (the tap images are then unit-shifted phase windows).
    """
    Cout, Cin = w_oihw.shape[0], w_oihw.shape[1]
    Wg = geom["Wg"]
    if stride == 1:
        wt = jnp.transpose(w_oihw, (2, 3, 1, 0)).reshape(9, Cin, Cout)
        shifts = [(ki - 1) * Wg + (kj - 1) for ki in range(3) for kj in range(3)]
        ck = Cin
    else:  # stride == 2
        w4 = jnp.zeros((2, 2, 4, Cin, Cout), w_oihw.dtype)
        for a in range(2):
            for b in range(2):
                for pa in range(2):
                    for pb in range(2):
                        ki, kj = 2 * a + pa, 2 * b + pb
                        if ki < 3 and kj < 3:
                            w4 = w4.at[a, b, 2 * pa + pb].set(
                                jnp.transpose(w_oihw[:, :, ki, kj], (1, 0)))
        wt = w4.reshape(4, 4 * Cin, Cout)
        shifts = [(a - 1) * Wg + (b - 1) for a in range(2) for b in range(2)]
        ck = 4 * Cin
    wt = jnp.pad(wt, ((0, 0), (0, cin_p - ck), (0, cp - Cout))).astype(mxu_dtype)
    return wt, shifts


def _bn_scale_shift(sums, ssqs, bias_p, gamma, beta, count, cp):
    """Finalize BN (training-mode, biased variance) from per-image partials."""
    Cout = gamma.shape[0]
    s = jnp.sum(sums[:, 0, :], axis=0)
    q = jnp.sum(ssqs[:, 0, :], axis=0)
    mean0 = s / count                              # bias-free mean
    var = jnp.maximum(q / count - mean0 * mean0, 0.0)
    mean = mean0 + bias_p[0]
    gp = jnp.pad(gamma.astype(jnp.float32), (0, cp - Cout), constant_values=1.0)
    bp = jnp.pad(beta.astype(jnp.float32), (0, cp - Cout))
    scale = gp * jax.lax.rsqrt(var + EPS)
    shift = bp - mean * scale
    return scale.reshape(1, cp), shift.reshape(1, cp)


# ----------------------------- forward pass -----------------------------------

def init_residual_block_params(key, in_channels, out_channels, use_1x1conv):
    def conv_init(k, cout, cin, kh, kw):
        fan_in = cin * kh * kw
        bound = 1.0 / (fan_in ** 0.5)
        k_w, k_b = jax.random.split(k)
        w = jax.random.uniform(k_w, (cout, cin, kh, kw), jnp.float32, -bound, bound)
        b = jax.random.uniform(k_b, (cout,), jnp.float32, -bound, bound)
        return w, b

    ks = jax.random.split(key, 3)
    params = {}
    params["conv1_w"], params["conv1_b"] = conv_init(ks[0], out_channels, in_channels, 3, 3)
    params["conv2_w"], params["conv2_b"] = conv_init(ks[1], out_channels, out_channels, 3, 3)
    if use_1x1conv:
        params["conv3_w"], params["conv3_b"] = conv_init(ks[2], out_channels, in_channels, 1, 1)
    params["bn1_gamma"] = jnp.ones((out_channels,), jnp.float32)
    params["bn1_beta"] = jnp.zeros((out_channels,), jnp.float32)
    params["bn2_gamma"] = jnp.ones((out_channels,), jnp.float32)
    params["bn2_beta"] = jnp.zeros((out_channels,), jnp.float32)
    return params


def residual_block_forward(params, x_nchw, *, stride=1, use_1x1conv=False,
                           mxu_dtype=jnp.bfloat16):
    assert stride in (1, 2), "only stride 1 or 2 supported"
    x = jnp.transpose(x_nchw, (0, 2, 3, 1)).astype(jnp.float32)   # NCHW -> NHWC
    N, H, W, Cin = x.shape
    Cout = params["conv1_w"].shape[0]
    if not use_1x1conv:
        assert Cin == Cout and stride == 1, \
            "identity skip requires in_channels == out_channels and stride == 1"

    Ho = (H - 1) // stride + 1
    Wo = (W - 1) // stride + 1
    geom = _geometry(Ho, Wo)
    # Lane-dense channel padding; 256-aligned when wide (v6e/v7x 256-wide MXU).
    cp = _round_up(Cout, 256) if Cout > 128 else 128
    vmem_limit = _vmem_limit_bytes()
    count = N * Ho * Wo
    mask = _valid_mask(geom)

    # ---- conv1 input on the extended grid ----
    xin = x.astype(mxu_dtype)
    if stride == 1:
        ck1 = _round_up(Cin, 8)
        x1_ext = _to_ext_grid(xin, geom, 1, 1, ck1)
    else:
        xp = jnp.pad(xin, ((0, 0), (1, 1), (1, 1), (0, 0)))
        xp = jnp.pad(xp, ((0, 0), (0, xp.shape[1] % 2), (0, xp.shape[2] % 2), (0, 0)))
        h2, w2 = xp.shape[1] // 2, xp.shape[2] // 2
        xd = xp.reshape(N, h2, 2, w2, 2, Cin).transpose(0, 1, 3, 2, 4, 5)
        xd = xd.reshape(N, h2, w2, 4 * Cin)                  # space-to-depth
        ck1 = _round_up(4 * Cin, 8)
        x1_ext = _to_ext_grid(xd, geom, 0, 0, ck1)

    # ---- conv1 (+ fused bn1 partial stats) ----
    w1_taps, shifts1 = _conv3x3_taps(params["conv1_w"], stride, ck1, cp, geom, mxu_dtype)
    b1 = jnp.pad(params["conv1_b"].astype(jnp.float32), (0, cp - Cout)).reshape(1, cp)
    y1, s1, q1 = _conv_bn_pass(x1_ext, w1_taps, b1, mask, shifts1, geom,
                               store_dtype=mxu_dtype, vmem_limit=vmem_limit)
    scale1, shift1 = _bn_scale_shift(s1, q1, b1, params["bn1_gamma"],
                                     params["bn1_beta"], count, cp)

    # ---- conv2 reads y1 directly; bn1+relu fused onto its A operand ----
    w2_taps, shifts2 = _conv3x3_taps(params["conv2_w"], 1, cp, cp, geom, mxu_dtype)
    b2 = jnp.pad(params["conv2_b"].astype(jnp.float32), (0, cp - Cout)).reshape(1, cp)
    y2, s2, q2 = _conv_bn_pass(y1, w2_taps, b2, mask, shifts2, geom,
                               in_scale=scale1, in_shift=shift1,
                               store_dtype=mxu_dtype, vmem_limit=vmem_limit)
    scale2, shift2 = _bn_scale_shift(s2, q2, b2, params["bn2_gamma"],
                                     params["bn2_beta"], count, cp)

    # ---- skip source on the same grid + fused bn2/add/relu epilogue ----
    if stride == 1:
        xs_ext, ck_s = x1_ext, ck1                # reuse conv1's input array
    else:
        ck_s = _round_up(Cin, 8)
        xs_ext = _to_ext_grid(xin[:, ::2, ::2, :], geom, 1, 1, ck_s)

    if use_1x1conv:
        w3 = jnp.transpose(params["conv3_w"][:, :, 0, 0], (1, 0))     # (Cin, Cout)
        b3 = jnp.pad(params["conv3_b"].astype(jnp.float32), (0, cp - Cout)).reshape(1, cp)
    else:
        w3 = jnp.eye(Cin, dtype=jnp.float32)       # identity skip via the MXU
        b3 = jnp.zeros((1, cp), jnp.float32)
    w3 = jnp.pad(w3, ((0, ck_s - Cin), (0, cp - w3.shape[1]))).astype(mxu_dtype)

    out = _bn_skip_relu_pass(y2, scale2, shift2, xs_ext, w3, b3, geom, vmem_limit)

    # ---- strip grid / channel padding, NHWC -> NCHW (fused XLA slice+copy) ----
    g = geom
    out = out[:, :g["P"], :].reshape(N, g["Hg"], g["Wg"], cp)
    out = out[:, 1:Ho + 1, 1:Wo + 1, :Cout]
    return jnp.transpose(out, (0, 3, 1, 2))


# ----------------------------- reference (sanity check) -----------------------

def _reference_forward(params, x_nchw, stride, use_1x1conv):
    def conv(x, w, b, s, p):
        y = jax.lax.conv_general_dilated(
            x, w, window_strides=(s, s), padding=[(p, p), (p, p)],
            dimension_numbers=("NCHW", "OIHW", "NCHW"))
        return y + b[None, :, None, None]

    def bn(y, gamma, beta):
        m = jnp.mean(y, axis=(0, 2, 3), keepdims=True)
        v = jnp.mean((y - m) ** 2, axis=(0, 2, 3), keepdims=True)
        return (y - m) * jax.lax.rsqrt(v + EPS) * gamma[None, :, None, None] \
            + beta[None, :, None, None]

    x = x_nchw.astype(jnp.float32)
    y = jax.nn.relu(bn(conv(x, params["conv1_w"], params["conv1_b"], stride, 1),
                       params["bn1_gamma"], params["bn1_beta"]))
    y = bn(conv(y, params["conv2_w"], params["conv2_b"], 1, 1),
           params["bn2_gamma"], params["bn2_beta"])
    skip = conv(x, params["conv3_w"], params["conv3_b"], stride, 0) if use_1x1conv else x
    return jax.nn.relu(y + skip)


if __name__ == "__main__":
    key = jax.random.PRNGKey(0)
    k_par_a, k_par_b, k_xa, k_xb = jax.random.split(key, 4)

    fwd = jax.jit(residual_block_forward,
                  static_argnames=("stride", "use_1x1conv", "mxu_dtype"))

    # --- Config A: projection (1x1 conv) skip, stride 2 (downsampling block) ---
    in_c, out_c, stride = 4, 8, 2
    x_a = jax.random.normal(k_xa, (2, in_c, 16, 16), jnp.float32)      # NCHW
    params_a = init_residual_block_params(k_par_a, in_c, out_c, True)
    ref_a = jax.block_until_ready(_reference_forward(params_a, x_a, stride, True))

    # (1) structural exactness check: f32 MXU operands / f32 storage
    out_f32 = jax.block_until_ready(
        fwd(params_a, x_a, stride=stride, use_1x1conv=True, mxu_dtype=jnp.float32))
    assert out_f32.shape == (2, out_c, 8, 8), out_f32.shape
    assert jnp.allclose(out_f32, ref_a, atol=5e-3, rtol=5e-3), \
        float(jnp.max(jnp.abs(out_f32 - ref_a)))

    # (2) default performance path: bf16 MXU operands + bf16 activation storage,
    #     f32 accumulation and f32 BN statistics
    out_bf = jax.block_until_ready(fwd(params_a, x_a, stride=stride, use_1x1conv=True))
    assert out_bf.shape == ref_a.shape
    assert jnp.allclose(out_bf, ref_a, atol=1e-1, rtol=5e-2), \
        float(jnp.max(jnp.abs(out_bf - ref_a)))
    assert float(jnp.mean(jnp.abs(out_bf - ref_a))) < 2e-2

    # --- Config B: identity skip, stride 1, non-8-multiple spatial dims ---
    x_b = jax.random.normal(k_xb, (2, in_c, 12, 12), jnp.float32)
    params_b = init_residual_block_params(k_par_b, in_c, in_c, False)
    ref_b = jax.block_until_ready(_reference_forward(params_b, x_b, 1, False))
    out_b = jax.block_until_ready(fwd(params_b, x_b, stride=1, use_1x1conv=False))
    assert out_b.shape == ref_b.shape, out_b.shape
    assert jnp.allclose(out_b, ref_b, atol=1e-1, rtol=5e-2), \
        float(jnp.max(jnp.abs(out_b - ref_b)))

    print("KERNEL_OK")
</pallas_src>

<mosaic_0001>
module attributes {stable_mosaic.version = 11 : i64} {
  func.func @kernel(%arg0: i32, %arg1: memref<1x140x16xf32, #tpu.memory_space<vmem>>, %arg2: memref<4x16x128xf32, #tpu.memory_space<vmem>>, %arg3: memref<1x128xf32, #tpu.memory_space<vmem>>, %arg4: memref<140x1xf32, #tpu.memory_space<vmem>>, %arg5: memref<1x140x128xf32, #tpu.memory_space<vmem>>, %arg6: memref<1x8x128xf32, #tpu.memory_space<vmem>>, %arg7: memref<1x8x128xf32, #tpu.memory_space<vmem>>) attributes {dimension_semantics = [#tpu.dimension_semantics<parallel>], iteration_bounds = array<i64: 2>, scalar_prefetch = 0 : i64, scratch_operands = 0 : i64, tpu.core_type = #tpu.core_type<tc>, window_params = [{transform_indices = @transform_0, window_bounds = array<i64: 1, 140, 16>}, {pipeline_mode = #tpu.pipeline_mode<synchronous>, transform_indices = @transform_1, window_bounds = array<i64: 4, 16, 128>}, {pipeline_mode = #tpu.pipeline_mode<synchronous>, transform_indices = @transform_2, window_bounds = array<i64: 1, 128>}, {pipeline_mode = #tpu.pipeline_mode<synchronous>, transform_indices = @transform_3, window_bounds = array<i64: 140, 1>}, {transform_indices = @transform_4, window_bounds = array<i64: 1, 140, 128>}, {transform_indices = @transform_5, window_bounds = array<i64: 1, 8, 128>}, {transform_indices = @transform_6, window_bounds = array<i64: 1, 8, 128>}]} {
    %cst = arith.constant 0.000000e+00 : f32
    %0 = vector.broadcast %cst : f32 to vector<104x128xf32>
    %c0 = arith.constant 0 : index
    %c9 = arith.constant 9 : index
    %c0_0 = arith.constant 0 : index
    %1 = vector.load %arg1[%c0, %c9, %c0_0] : memref<1x140x16xf32, #tpu.memory_space<vmem>>, vector<1x104x16xf32>
    %2 = vector.shape_cast %1 : vector<1x104x16xf32> to vector<104x16xf32>
    %c0_1 = arith.constant 0 : index
    %c0_2 = arith.constant 0 : index
    %c0_3 = arith.constant 0 : index
    %3 = vector.load %arg2[%c0_1, %c0_2, %c0_3] : memref<4x16x128xf32, #tpu.memory_space<vmem>>, vector<1x16x128xf32>
    %4 = vector.shape_cast %3 : vector<1x16x128xf32> to vector<16x128xf32>
    %cst_4 = arith.constant dense<0.000000e+00> : vector<104x128xf32>
    %5 = tpu.matmul %2, %4, %cst_4 {dimension_numbers = #tpu.dot_dimension_numbers<[1], [0], [0], [1], [0, 0, 1, 1], [], []>} : vector<104x16xf32>, vector<16x128xf32>, vector<104x128xf32> -> vector<104x128xf32>
    %6 = arith.addf %0, %5 : vector<104x128xf32>
    %c0_5 = arith.constant 0 : index
    %c10 = arith.constant 10 : index
    %c0_6 = arith.constant 0 : index
    %7 = vector.load %arg1[%c0_5, %c10, %c0_6] : memref<1x140x16xf32, #tpu.memory_space<vmem>>, vector<1x104x16xf32>
    %8 = vector.shape_cast %7 : vector<1x104x16xf32> to vector<104x16xf32>
    %c1 = arith.constant 1 : index
    %c0_7 = arith.constant 0 : index
    %c0_8 = arith.constant 0 : index
    %9 = vector.load %arg2[%c1, %c0_7, %c0_8] : memref<4x16x128xf32, #tpu.memory_space<vmem>>, vector<1x16x128xf32>
    %10 = vector.shape_cast %9 : vector<1x16x128xf32> to vector<16x128xf32>
    %cst_9 = arith.constant dense<0.000000e+00> : vector<104x128xf32>
    %11 = tpu.matmul %8, %10, %cst_9 {dimension_numbers = #tpu.dot_dimension_numbers<[1], [0], [0], [1], [0, 0, 1, 1], [], []>} : vector<104x16xf32>, vector<16x128xf32>, vector<104x128xf32> -> vector<104x128xf32>
    %12 = arith.addf %6, %11 : vector<104x128xf32>
    %c0_10 = arith.constant 0 : index
    %c19 = arith.constant 19 : index
    %c0_11 = arith.constant 0 : index
    %13 = vector.load %arg1[%c0_10, %c19, %c0_11] : memref<1x140x16xf32, #tpu.memory_space<vmem>>, vector<1x104x16xf32>
    %14 = vector.shape_cast %13 : vector<1x104x16xf32> to vector<104x16xf32>
    %c2 = arith.constant 2 : index
    %c0_12 = arith.constant 0 : index
    %c0_13 = arith.constant 0 : index
    %15 = vector.load %arg2[%c2, %c0_12, %c0_13] : memref<4x16x128xf32, #tpu.memory_space<vmem>>, vector<1x16x128xf32>
    %16 = vector.shape_cast %15 : vector<1x16x128xf32> to vector<16x128xf32>
    %cst_14 = arith.constant dense<0.000000e+00> : vector<104x128xf32>
    %17 = tpu.matmul %14, %16, %cst_14 {dimension_numbers = #tpu.dot_dimension_numbers<[1], [0], [0], [1], [0, 0, 1, 1], [], []>} : vector<104x16xf32>, vector<16x128xf32>, vector<104x128xf32> -> vector<104x128xf32>
    %18 = arith.addf %12, %17 : vector<104x128xf32>
    %c0_15 = arith.constant 0 : index
    %c20 = arith.constant 20 : index
    %c0_16 = arith.constant 0 : index
    %19 = vector.load %arg1[%c0_15, %c20, %c0_16] : memref<1x140x16xf32, #tpu.memory_space<vmem>>, vector<1x104x16xf32>
    %20 = vector.shape_cast %19 : vector<1x104x16xf32> to vector<104x16xf32>
    %c3 = arith.constant 3 : index
    %c0_17 = arith.constant 0 : index
    %c0_18 = arith.constant 0 : index
    %21 = vector.load %arg2[%c3, %c0_17, %c0_18] : memref<4x16x128xf32, #tpu.memory_space<vmem>>, vector<1x16x128xf32>
    %22 = vector.shape_cast %21 : vector<1x16x128xf32> to vector<16x128xf32>
    %cst_19 = arith.constant dense<0.000000e+00> : vector<104x128xf32>
    %23 = tpu.matmul %20, %22, %cst_19 {dimension_numbers = #tpu.dot_dimension_numbers<[1], [0], [0], [1], [0, 0, 1, 1], [], []>} : vector<104x16xf32>, vector<16x128xf32>, vector<104x128xf32> -> vector<104x128xf32>
    %24 = arith.addf %18, %23 : vector<104x128xf32>
    %c20_20 = arith.constant 20 : index
    %c0_21 = arith.constant 0 : index
    %25 = vector.load %arg4[%c20_20, %c0_21] : memref<140x1xf32, #tpu.memory_space<vmem>>, vector<104x1xf32>
    %cst_22 = arith.constant 5.000000e-01 : f32
    %26 = vector.broadcast %cst_22 : f32 to vector<104x1xf32>
    %27 = arith.cmpf ogt, %25, %26 : vector<104x1xf32>
    %cst_23 = arith.constant 0.000000e+00 : f32
    %28 = vector.shape_cast %27 : vector<104x1xi1> to vector<104x1xi1>
    %29 = vector.broadcast %28 : vector<104x1xi1> to vector<104x128xi1>
    %30 = vector.broadcast %cst_23 : f32 to vector<104x128xf32>
    %31 = arith.select %29, %24, %30 : vector<104x128xi1>, vector<104x128xf32>
    %cst_24 = arith.constant dense<0.000000e+00> : vector<128xf32>
    %32 = vector.multi_reduction <add>, %31, %cst_24 [0] : vector<104x128xf32> to vector<128xf32>
    %33 = vector.shape_cast %32 : vector<128xf32> to vector<1x128xf32>
    %34 = arith.mulf %24, %24 : vector<104x128xf32>
    %cst_25 = arith.constant 0.000000e+00 : f32
    %35 = vector.shape_cast %27 : vector<104x1xi1> to vector<104x1xi1>
    %36 = vector.broadcast %35 : vector<104x1xi1> to vector<104x128xi1>
    %37 = vector.broadcast %cst_25 : f32 to vector<104x128xf32>
    %38 = arith.select %36, %34, %37 : vector<104x128xi1>, vector<104x128xf32>
    %cst_26 = arith.constant dense<0.000000e+00> : vector<128xf32>
    %39 = vector.multi_reduction <add>, %38, %cst_26 [0] : vector<104x128xf32> to vector<128xf32>
    %40 = vector.shape_cast %39 : vector<128xf32> to vector<1x128xf32>
    %41 = vector.shape_cast %33 : vector<1x128xf32> to vector<1x1x128xf32>
    %42 = vector.shape_cast %41 : vector<1x1x128xf32> to vector<1x1x128xf32>
    %43 = vector.broadcast %42 : vector<1x1x128xf32> to vector<1x8x128xf32>
    %c0_27 = arith.constant 0 : index
    %c0_28 = arith.constant 0 : index
    %c0_29 = arith.constant 0 : index
    %44 = vector.load %arg6[%c0_27, %c0_28, %c0_29] : memref<1x8x128xf32, #tpu.memory_space<vmem>>, vector<1x8x128xf32>
    tpu.vector_store %arg6[%c0_27, %c0_28, %c0_29], %43 {strides = array<i32>} : memref<1x8x128xf32, #tpu.memory_space<vmem>>, vector<1x8x128xf32>,
    %45 = vector.shape_cast %40 : vector<1x128xf32> to vector<1x1x128xf32>
    %46 = vector.shape_cast %45 : vector<1x1x128xf32> to vector<1x1x128xf32>
    %47 = vector.broadcast %46 : vector<1x1x128xf32> to vector<1x8x128xf32>
    %c0_30 = arith.constant 0 : index
    %c0_31 = arith.constant 0 : index
    %c0_32 = arith.constant 0 : index
    %48 = vector.load %arg7[%c0_30, %c0_31, %c0_32] : memref<1x8x128xf32, #tpu.memory_space<vmem>>, vector<1x8x128xf32>
    tpu.vector_store %arg7[%c0_30, %c0_31, %c0_32], %47 {strides = array<i32>} : memref<1x8x128xf32, #tpu.memory_space<vmem>>, vector<1x8x128xf32>,
    %c0_33 = arith.constant 0 : index
    %c0_34 = arith.constant 0 : index
    %49 = vector.load %arg3[%c0_33, %c0_34] : memref<1x128xf32, #tpu.memory_space<vmem>>, vector<1x128xf32>
    %50 = vector.broadcast %49 : vector<1x128xf32> to vector<104x128xf32>
    %51 = arith.addf %24, %50 : vector<104x128xf32>
    %cst_35 = arith.constant 0.000000e+00 : f32
    %52 = vector.broadcast %cst_35 : f32 to vector<20x128xf32>
    %c0_36 = arith.constant 0 : index
    %c0_37 = arith.constant 0 : index
    %c0_38 = arith.constant 0 : index
    %53 = vector.load %arg5[%c0_36, %c0_37, %c0_38] : memref<1x140x128xf32, #tpu.memory_space<vmem>>, vector<1x20x128xf32>
    %54 = vector.shape_cast %53 : vector<1x20x128xf32> to vector<20x128xf32>
    %55 = vector.shape_cast %52 : vector<20x128xf32> to vector<1x20x128xf32>
    tpu.vector_store %arg5[%c0_36, %c0_37, %c0_38], %55 {strides = array<i32>} : memref<1x140x128xf32, #tpu.memory_space<vmem>>, vector<1x20x128xf32>,
    %c0_39 = arith.constant 0 : index
    %c20_40 = arith.constant 20 : index
    %c0_41 = arith.constant 0 : index
    %56 = vector.load %arg5[%c0_39, %c20_40, %c0_41] : memref<1x140x128xf32, #tpu.memory_space<vmem>>, vector<1x104x128xf32>
    %57 = vector.shape_cast %56 : vector<1x104x128xf32> to vector<104x128xf32>
    %58 = vector.shape_cast %51 : vector<104x128xf32> to vector<1x104x128xf32>
    tpu.vector_store %arg5[%c0_39, %c20_40, %c0_41], %58 {strides = array<i32>} : memref<1x140x128xf32, #tpu.memory_space<vmem>>, vector<1x104x128xf32>,
    %cst_42 = arith.constant 0.000000e+00 : f32
    %59 = vector.broadcast %cst_42 : f32 to vector<16x128xf32>
    %c0_43 = arith.constant 0 : index
    %c124 = arith.constant 124 : index
    %c0_44 = arith.constant 0 : index
    %60 = vector.load %arg5[%c0_43, %c124, %c0_44] : memref<1x140x128xf32, #tpu.memory_space<vmem>>, vector<1x16x128xf32>
    %61 = vector.shape_cast %60 : vector<1x16x128xf32> to vector<16x128xf32>
    %62 = vector.shape_cast %59 : vector<16x128xf32> to vector<1x16x128xf32>
    tpu.vector_store %arg5[%c0_43, %c124, %c0_44], %62 {strides = array<i32>} : memref<1x140x128xf32, #tpu.memory_space<vmem>>, vector<1x16x128xf32>,
    return
  }
  func.func @transform_0(%arg0: i32) -> (i32, i32, i32) {
    %c0_i32 = arith.constant 0 : i32
    %c0_i32_0 = arith.constant 0 : i32
    %c0_i32_1 = arith.constant 0 : i32
    return %arg0, %c0_i32, %c0_i32_0 : i32, i32, i32
  }
  func.func @transform_1(%arg0: i32) -> (i32, i32, i32) {
    %c0_i32 = arith.constant 0 : i32
    %c0_i32_0 = arith.constant 0 : i32
    %c0_i32_1 = arith.constant 0 : i32
    %c0_i32_2 = arith.constant 0 : i32
    return %c0_i32, %c0_i32_0, %c0_i32_1 : i32, i32, i32
  }
  func.func @transform_2(%arg0: i32) -> (i32, i32) {
    %c0_i32 = arith.constant 0 : i32
    %c0_i32_0 = arith.constant 0 : i32
    %c0_i32_1 = arith.constant 0 : i32
    return %c0_i32, %c0_i32_0 : i32, i32
  }
  func.func @transform_3(%arg0: i32) -> (i32, i32) {
    %c0_i32 = arith.constant 0 : i32
    %c0_i32_0 = arith.constant 0 : i32
    %c0_i32_1 = arith.constant 0 : i32
    return %c0_i32, %c0_i32_0 : i32, i32
  }
  func.func @transform_4(%arg0: i32) -> (i32, i32, i32) {
    %c0_i32 = arith.constant 0 : i32
    %c0_i32_0 = arith.constant 0 : i32
    %c0_i32_1 = arith.constant 0 : i32
    return %arg0, %c0_i32, %c0_i32_0 : i32, i32, i32
  }
  func.func @transform_5(%arg0: i32) -> (i32, i32, i32) {
    %c0_i32 = arith.constant 0 : i32
    %c0_i32_0 = arith.constant 0 : i32
    %c0_i32_1 = arith.constant 0 : i32
    return %arg0, %c0_i32, %c0_i32_0 : i32, i32, i32
  }
  func.func @transform_6(%arg0: i32) -> (i32, i32, i32) {
    %c0_i32 = arith.constant 0 : i32
    %c0_i32_0 = arith.constant 0 : i32
    %c0_i32_1 = arith.constant 0 : i32
    return %arg0, %c0_i32, %c0_i32_0 : i32, i32, i32
  }
}

module attributes {stable_mosaic.version = 11 : i64} {
  func.func @kernel(%arg0: i32, %arg1: memref<1x140x128xf32, #tpu.memory_space<vmem>>, %arg2: memref<9x128x128xf32, #tpu.memory_space<vmem>>, %arg3: memref<1x128xf32, #tpu.memory_space<vmem>>, %arg4: memref<140x1xf32, #tpu.memory_space<vmem>>, %arg5: memref<1x128xf32, #tpu.memory_space<vmem>>, %arg6: memref<1x128xf32, #tpu.memory_space<vmem>>, %arg7: memref<1x140x128xf32, #tpu.memory_space<vmem>>, %arg8: memref<1x8x128xf32, #tpu.memory_space<vmem>>, %arg9: memref<1x8x128xf32, #tpu.memory_space<vmem>>) attributes {dimension_semantics = [#tpu.dimension_semantics<parallel>], iteration_bounds = array<i64: 2>, scalar_prefetch = 0 : i64, scratch_operands = 0 : i64, tpu.core_type = #tpu.core_type<tc>, window_params = [{transform_indices = @transform_0, window_bounds = array<i64: 1, 140, 128>}, {pipeline_mode = #tpu.pipeline_mode<synchronous>, transform_indices = @transform_1, window_bounds = array<i64: 9, 128, 128>}, {pipeline_mode = #tpu.pipeline_mode<synchronous>, transform_indices = @transform_2, window_bounds = array<i64: 1, 128>}, {pipeline_mode = #tpu.pipeline_mode<synchronous>, transform_indices = @transform_3, window_bounds = array<i64: 140, 1>}, {pipeline_mode = #tpu.pipeline_mode<synchronous>, transform_indices = @transform_4, window_bounds = array<i64: 1, 128>}, {pipeline_mode = #tpu.pipeline_mode<synchronous>, transform_indices = @transform_5, window_bounds = array<i64: 1, 128>}, {transform_indices = @transform_6, window_bounds = array<i64: 1, 140, 128>}, {transform_indices = @transform_7, window_bounds = array<i64: 1, 8, 128>}, {transform_indices = @transform_8, window_bounds = array<i64: 1, 8, 128>}]} {
    %cst = arith.constant 0.000000e+00 : f32
    %0 = vector.broadcast %cst : f32 to vector<104x128xf32>
    %c0 = arith.constant 0 : index
    %c9 = arith.constant 9 : index
    %c0_0 = arith.constant 0 : index
    %1 = vector.load %arg1[%c0, %c9, %c0_0] : memref<1x140x128xf32, #tpu.memory_space<vmem>>, vector<1x104x128xf32>
    %2 = vector.shape_cast %1 : vector<1x104x128xf32> to vector<104x128xf32>
    %c9_1 = arith.constant 9 : index
    %c0_2 = arith.constant 0 : index
    %3 = vector.load %arg4[%c9_1, %c0_2] : memref<140x1xf32, #tpu.memory_space<vmem>>, vector<104x1xf32>
    %c0_3 = arith.constant 0 : index
    %c0_4 = arith.constant 0 : index
    %4 = vector.load %arg5[%c0_3, %c0_4] : memref<1x128xf32, #tpu.memory_space<vmem>>, vector<1x128xf32>
    %5 = vector.broadcast %4 : vector<1x128xf32> to vector<104x128xf32>
    %6 = arith.mulf %2, %5 : vector<104x128xf32>
    %c0_5 = arith.constant 0 : index
    %c0_6 = arith.constant 0 : index
    %7 = vector.load %arg6[%c0_5, %c0_6] : memref<1x128xf32, #tpu.memory_space<vmem>>, vector<1x128xf32>
    %8 = vector.broadcast %7 : vector<1x128xf32> to vector<104x128xf32>
    %9 = arith.addf %6, %8 : vector<104x128xf32>
    %cst_7 = arith.constant 5.000000e-01 : f32
    %10 = vector.broadcast %cst_7 : f32 to vector<104x1xf32>
    %11 = arith.cmpf ogt, %3, %10 : vector<104x1xf32>
    %cst_8 = arith.constant 0.000000e+00 : f32
    %12 = vector.broadcast %cst_8 : f32 to vector<104x128xf32>
    %13 = arith.maximumf %9, %12 : vector<104x128xf32>
    %cst_9 = arith.constant 0.000000e+00 : f32
    %14 = vector.shape_cast %11 : vector<104x1xi1> to vector<104x1xi1>
    %15 = vector.broadcast %14 : vector<104x1xi1> to vector<104x128xi1>
    %16 = vector.broadcast %cst_9 : f32 to vector<104x128xf32>
    %17 = arith.select %15, %13, %16 : vector<104x128xi1>, vector<104x128xf32>
    %c0_10 = arith.constant 0 : index
    %c0_11 = arith.constant 0 : index
    %c0_12 = arith.constant 0 : index
    %18 = vector.load %arg2[%c0_10, %c0_11, %c0_12] : memref<9x128x128xf32, #tpu.memory_space<vmem>>, vector<1x128x128xf32>
    %19 = vector.shape_cast %18 : vector<1x128x128xf32> to vector<128x128xf32>
    %cst_13 = arith.constant dense<0.000000e+00> : vector<104x128xf32>
    %20 = tpu.matmul %17, %19, %cst_13 {dimension_numbers = #tpu.dot_dimension_numbers<[1], [0], [0], [1], [0, 0, 1, 1], [], []>} : vector<104x128xf32>, vector<128x128xf32>, vector<104x128xf32> -> vector<104x128xf32>
    %21 = arith.addf %0, %20 : vector<104x128xf32>
    %c0_14 = arith.constant 0 : index
    %c10 = arith.constant 10 : index
    %c0_15 = arith.constant 0 : index
    %22 = vector.load %arg1[%c0_14, %c10, %c0_15] : memref<1x140x128xf32, #tpu.memory_space<vmem>>, vector<1x104x128xf32>
    %23 = vector.shape_cast %22 : vector<1x104x128xf32> to vector<104x128xf32>
    %c10_16 = arith.constant 10 : index
    %c0_17 = arith.constant 0 : index
    %24 = vector.load %arg4[%c10_16, %c0_17] : memref<140x1xf32, #tpu.memory_space<vmem>>, vector<104x1xf32>
    %c0_18 = arith.constant 0 : index
    %c0_19 = arith.constant 0 : index
    %25 = vector.load %arg5[%c0_18, %c0_19] : memref<1x128xf32, #tpu.memory_space<vmem>>, vector<1x128xf32>
    %26 = vector.broadcast %25 : vector<1x128xf32> to vector<104x128xf32>
    %27 = arith.mulf %23, %26 : vector<104x128xf32>
    %c0_20 = arith.constant 0 : index
    %c0_21 = arith.constant 0 : index
    %28 = vector.load %arg6[%c0_20, %c0_21] : memref<1x128xf32, #tpu.memory_space<vmem>>, vector<1x128xf32>
    %29 = vector.broadcast %28 : vector<1x128xf32> to vector<104x128xf32>
    %30 = arith.addf %27, %29 : vector<104x128xf32>
    %cst_22 = arith.constant 5.000000e-01 : f32
    %31 = vector.broadcast %cst_22 : f32 to vector<104x1xf32>
    %32 = arith.cmpf ogt, %24, %31 : vector<104x1xf32>
    %cst_23 = arith.constant 0.000000e+00 : f32
    %33 = vector.broadcast %cst_23 : f32 to vector<104x128xf32>
    %34 = arith.maximumf %30, %33 : vector<104x128xf32>
    %cst_24 = arith.constant 0.000000e+00 : f32
    %35 = vector.shape_cast %32 : vector<104x1xi1> to vector<104x1xi1>
    %36 = vector.broadcast %35 : vector<104x1xi1> to vector<104x128xi1>
    %37 = vector.broadcast %cst_24 : f32 to vector<104x128xf32>
    %38 = arith.select %36, %34, %37 : vector<104x128xi1>, vector<104x128xf32>
    %c1 = arith.constant 1 : index
    %c0_25 = arith.constant 0 : index
    %c0_26 = arith.constant 0 : index
    %39 = vector.load %arg2[%c1, %c0_25, %c0_26] : memref<9x128x128xf32, #tpu.memory_space<vmem>>, vector<1x128x128xf32>
    %40 = vector.shape_cast %39 : vector<1x128x128xf32> to vector<128x128xf32>
    %cst_27 = arith.constant dense<0.000000e+00> : vector<104x128xf32>
    %41 = tpu.matmul %38, %40, %cst_27 {dimension_numbers = #tpu.dot_dimension_numbers<[1], [0], [0], [1], [0, 0, 1, 1], [], []>} : vector<104x128xf32>, vector<128x128xf32>, vector<104x128xf32> -> vector<104x128xf32>
    %42 = arith.addf %21, %41 : vector<104x128xf32>
    %c0_28 = arith.constant 0 : index
    %c11 = arith.constant 11 : index
    %c0_29 = arith.constant 0 : index
    %43 = vector.load %arg1[%c0_28, %c11, %c0_29] : memref<1x140x128xf32, #tpu.memory_space<vmem>>, vector<1x104x128xf32>
    %44 = vector.shape_cast %43 : vector<1x104x128xf32> to vector<104x128xf32>
    %c11_30 = arith.constant 11 : index
    %c0_31 = arith.constant 0 : index
    %45 = vector.load %arg4[%c11_30, %c0_31] : memref<140x1xf32, #tpu.memory_space<vmem>>, vector<104x1xf32>
    %c0_32 = arith.constant 0 : index
    %c0_33 = arith.constant 0 : index
    %46 = vector.load %arg5[%c0_32, %c0_33] : memref<1x128xf32, #tpu.memory_space<vmem>>, vector<1x128xf32>
    %47 = vector.broadcast %46 : vector<1x128xf32> to vector<104x128xf32>
    %48 = arith.mulf %44, %47 : vector<104x128xf32>
    %c0_34 = arith.constant 0 : index
    %c0_35 = arith.constant 0 : index
    %49 = vector.load %arg6[%c0_34, %c0_35] : memref<1x128xf32, #tpu.memory_space<vmem>>, vector<1x128xf32>
    %50 = vector.broadcast %49 : vector<1x128xf32> to vector<104x128xf32>
    %51 = arith.addf %48, %50 : vector<104x128xf32>
    %cst_36 = arith.constant 5.000000e-01 : f32
    %52 = vector.broadcast %cst_36 : f32 to vector<104x1xf32>
    %53 = arith.cmpf ogt, %45, %52 : vector<104x1xf32>
    %cst_37 = arith.constant 0.000000e+00 : f32
    %54 = vector.broadcast %cst_37 : f32 to vector<104x128xf32>
    %55 = arith.maximumf %51, %54 : vector<104x128xf32>
    %cst_38 = arith.constant 0.000000e+00 : f32
    %56 = vector.shape_cast %53 : vector<104x1xi1> to vector<104x1xi1>
    %57 = vector.broadcast %56 : vector<104x1xi1> to vector<104x128xi1>
    %58 = vector.broadcast %cst_38 : f32 to vector<104x128xf32>
    %59 = arith.select %57, %55, %58 : vector<104x128xi1>, vector<104x128xf32>
    %c2 = arith.constant 2 : index
    %c0_39 = arith.constant 0 : index
    %c0_40 = arith.constant 0 : index
    %60 = vector.load %arg2[%c2, %c0_39, %c0_40] : memref<9x128x128xf32, #tpu.memory_space<vmem>>, vector<1x128x128xf32>
    %61 = vector.shape_cast %60 : vector<1x128x128xf32> to vector<128x128xf32>
    %cst_41 = arith.constant dense<0.000000e+00> : vector<104x128xf32>
    %62 = tpu.matmul %59, %61, %cst_41 {dimension_numbers = #tpu.dot_dimension_numbers<[1], [0], [0], [1], [0, 0, 1, 1], [], []>} : vector<104x128xf32>, vector<128x128xf32>, vector<104x128xf32> -> vector<104x128xf32>
    %63 = arith.addf %42, %62 : vector<104x128xf32>
    %c0_42 = arith.constant 0 : index
    %c19 = arith.constant 19 : index
    %c0_43 = arith.constant 0 : index
    %64 = vector.load %arg1[%c0_42, %c19, %c0_43] : memref<1x140x128xf32, #tpu.memory_space<vmem>>, vector<1x104x128xf32>
    %65 = vector.shape_cast %64 : vector<1x104x128xf32> to vector<104x128xf32>
    %c19_44 = arith.constant 19 : index
    %c0_45 = arith.constant 0 : index
    %66 = vector.load %arg4[%c19_44, %c0_45] : memref<140x1xf32, #tpu.memory_space<vmem>>, vector<104x1xf32>
    %c0_46 = arith.constant 0 : index
    %c0_47 = arith.constant 0 : index
    %67 = vector.load %arg5[%c0_46, %c0_47] : memref<1x128xf32, #tpu.memory_space<vmem>>, vector<1x128xf32>
    %68 = vector.broadcast %67 : vector<1x128xf32> to vector<104x128xf32>
    %69 = arith.mulf %65, %68 : vector<104x128xf32>
    %c0_48 = arith.constant 0 : index
    %c0_49 = arith.constant 0 : index
    %70 = vector.load %arg6[%c0_48, %c0_49] : memref<1x128xf32, #tpu.memory_space<vmem>>, vector<1x128xf32>
    %71 = vector.broadcast %70 : vector<1x128xf32> to vector<104x128xf32>
    %72 = arith.addf %69, %71 : vector<104x128xf32>
    %cst_50 = arith.constant 5.000000e-01 : f32
    %73 = vector.broadcast %cst_50 : f32 to vector<104x1xf32>
    %74 = arith.cmpf ogt, %66, %73 : vector<104x1xf32>
    %cst_51 = arith.constant 0.000000e+00 : f32
    %75 = vector.broadcast %cst_51 : f32 to vector<104x128xf32>
    %76 = arith.maximumf %72, %75 : vector<104x128xf32>
    %cst_52 = arith.constant 0.000000e+00 : f32
    %77 = vector.shape_cast %74 : vector<104x1xi1> to vector<104x1xi1>
    %78 = vector.broadcast %77 : vector<104x1xi1> to vector<104x128xi1>
    %79 = vector.broadcast %cst_52 : f32 to vector<104x128xf32>
    %80 = arith.select %78, %76, %79 : vector<104x128xi1>, vector<104x128xf32>
    %c3 = arith.constant 3 : index
    %c0_53 = arith.constant 0 : index
    %c0_54 = arith.constant 0 : index
    %81 = vector.load %arg2[%c3, %c0_53, %c0_54] : memref<9x128x128xf32, #tpu.memory_space<vmem>>, vector<1x128x128xf32>
    %82 = vector.shape_cast %81 : vector<1x128x128xf32> to vector<128x128xf32>
    %cst_55 = arith.constant dense<0.000000e+00> : vector<104x128xf32>
    %83 = tpu.matmul %80, %82, %cst_55 {dimension_numbers = #tpu.dot_dimension_numbers<[1], [0], [0], [1], [0, 0, 1, 1], [], []>} : vector<104x128xf32>, vector<128x128xf32>, vector<104x128xf32> -> vector<104x128xf32>
    %84 = arith.addf %63, %83 : vector<104x128xf32>
    %c0_56 = arith.constant 0 : index
    %c20 = arith.constant 20 : index
    %c0_57 = arith.constant 0 : index
    %85 = vector.load %arg1[%c0_56, %c20, %c0_57] : memref<1x140x128xf32, #tpu.memory_space<vmem>>, vector<1x104x128xf32>
    %86 = vector.shape_cast %85 : vector<1x104x128xf32> to vector<104x128xf32>
    %c20_58 = arith.constant 20 : index
    %c0_59 = arith.constant 0 : index
    %87 = vector.load %arg4[%c20_58, %c0_59] : memref<140x1xf32, #tpu.memory_space<vmem>>, vector<104x1xf32>
    %c0_60 = arith.constant 0 : index
    %c0_61 = arith.constant 0 : index
    %88 = vector.load %arg5[%c0_60, %c0_61] : memref<1x128xf32, #tpu.memory_space<vmem>>, vector<1x128xf32>
    %89 = vector.broadcast %88 : vector<1x128xf32> to vector<104x128xf32>
    %90 = arith.mulf %86, %89 : vector<104x128xf32>
    %c0_62 = arith.constant 0 : index
    %c0_63 = arith.constant 0 : index
    %91 = vector.load %arg6[%c0_62, %c0_63] : memref<1x128xf32, #tpu.memory_space<vmem>>, vector<1x128xf32>
    %92 = vector.broadcast %91 : vector<1x128xf32> to vector<104x128xf32>
    %93 = arith.addf %90, %92 : vector<104x128xf32>
    %cst_64 = arith.constant 5.000000e-01 : f32
    %94 = vector.broadcast %cst_64 : f32 to vector<104x1xf32>
    %95 = arith.cmpf ogt, %87, %94 : vector<104x1xf32>
    %cst_65 = arith.constant 0.000000e+00 : f32
    %96 = vector.broadcast %cst_65 : f32 to vector<104x128xf32>
    %97 = arith.maximumf %93, %96 : vector<104x128xf32>
    %cst_66 = arith.constant 0.000000e+00 : f32
    %98 = vector.shape_cast %95 : vector<104x1xi1> to vector<104x1xi1>
    %99 = vector.broadcast %98 : vector<104x1xi1> to vector<104x128xi1>
    %100 = vector.broadcast %cst_66 : f32 to vector<104x128xf32>
    %101 = arith.select %99, %97, %100 : vector<104x128xi1>, vector<104x128xf32>
    %c4 = arith.constant 4 : index
    %c0_67 = arith.constant 0 : index
    %c0_68 = arith.constant 0 : index
    %102 = vector.load %arg2[%c4, %c0_67, %c0_68] : memref<9x128x128xf32, #tpu.memory_space<vmem>>, vector<1x128x128xf32>
    %103 = vector.shape_cast %102 : vector<1x128x128xf32> to vector<128x128xf32>
    %cst_69 = arith.constant dense<0.000000e+00> : vector<104x128xf32>
    %104 = tpu.matmul %101, %103, %cst_69 {dimension_numbers = #tpu.dot_dimension_numbers<[1], [0], [0], [1], [0, 0, 1, 1], [], []>} : vector<104x128xf32>, vector<128x128xf32>, vector<104x128xf32> -> vector<104x128xf32>
    %105 = arith.addf %84, %104 : vector<104x128xf32>
    %c0_70 = arith.constant 0 : index
    %c21 = arith.constant 21 : index
    %c0_71 = arith.constant 0 : index
    %106 = vector.load %arg1[%c0_70, %c21, %c0_71] : memref<1x140x128xf32, #tpu.memory_space<vmem>>, vector<1x104x128xf32>
    %107 = vector.shape_cast %106 : vector<1x104x128xf32> to vector<104x128xf32>
    %c21_72 = arith.constant 21 : index
    %c0_73 = arith.constant 0 : index
    %108 = vector.load %arg4[%c21_72, %c0_73] : memref<140x1xf32, #tpu.memory_space<vmem>>, vector<104x1xf32>
    %c0_74 = arith.constant 0 : index
    %c0_75 = arith.constant 0 : index
    %109 = vector.load %arg5[%c0_74, %c0_75] : memref<1x128xf32, #tpu.memory_space<vmem>>, vector<1x128xf32>
    %110 = vector.broadcast %109 : vector<1x128xf32> to vector<104x128xf32>
    %111 = arith.mulf %107, %110 : vector<104x128xf32>
    %c0_76 = arith.constant 0 : index
    %c0_77 = arith.constant 0 : index
    %112 = vector.load %arg6[%c0_76, %c0_77] : memref<1x128xf32, #tpu.memory_space<vmem>>, vector<1x128xf32>
    %113 = vector.broadcast %112 : vector<1x128xf32> to vector<104x128xf32>
    %114 = arith.addf %111, %113 : vector<104x128xf32>
    %cst_78 = arith.constant 5.000000e-01 : f32
    %115 = vector.broadcast %cst_78 : f32 to vector<104x1xf32>
    %116 = arith.cmpf ogt, %108, %115 : vector<104x1xf32>
    %cst_79 = arith.constant 0.000000e+00 : f32
    %117 = vector.broadcast %cst_79 : f32 to vector<104x128xf32>
    %118 = arith.maximumf %114, %117 : vector<104x128xf32>
    %cst_80 = arith.constant 0.000000e+00 : f32
    %119 = vector.shape_cast %116 : vector<104x1xi1> to vector<104x1xi1>
    %120 = vector.broadcast %119 : vector<104x1xi1> to vector<104x128xi1>
    %121 = vector.broadcast %cst_80 : f32 to vector<104x128xf32>
    %122 = arith.select %120, %118, %121 : vector<104x128xi1>, vector<104x128xf32>
    %c5 = arith.constant 5 : index
    %c0_81 = arith.constant 0 : index
    %c0_82 = arith.constant 0 : index
    %123 = vector.load %arg2[%c5, %c0_81, %c0_82] : memref<9x128x128xf32, #tpu.memory_space<vmem>>, vector<1x128x128xf32>
    %124 = vector.shape_cast %123 : vector<1x128x128xf32> to vector<128x128xf32>
    %cst_83 = arith.constant dense<0.000000e+00> : vector<104x128xf32>
    %125 = tpu.matmul %122, %124, %cst_83 {dimension_numbers = #tpu.dot_dimension_numbers<[1], [0], [0], [1], [0, 0, 1, 1], [], []>} : vector<104x128xf32>, vector<128x128xf32>, vector<104x128xf32> -> vector<104x128xf32>
    %126 = arith.addf %105, %125 : vector<104x128xf32>
    %c0_84 = arith.constant 0 : index
    %c29 = arith.constant 29 : index
    %c0_85 = arith.constant 0 : index
    %127 = vector.load %arg1[%c0_84, %c29, %c0_85] : memref<1x140x128xf32, #tpu.memory_space<vmem>>, vector<1x104x128xf32>
    %128 = vector.shape_cast %127 : vector<1x104x128xf32> to vector<104x128xf32>
    %c29_86 = arith.constant 29 : index
    %c0_87 = arith.constant 0 : index
    %129 = vector.load %arg4[%c29_86, %c0_87] : memref<140x1xf32, #tpu.memory_space<vmem>>, vector<104x1xf32>
    %c0_88 = arith.constant 0 : index
    %c0_89 = arith.constant 0 : index
    %130 = vector.load %arg5[%c0_88, %c0_89] : memref<1x128xf32, #tpu.memory_space<vmem>>, vector<1x128xf32>
    %131 = vector.broadcast %130 : vector<1x128xf32> to vector<104x128xf32>
    %132 = arith.mulf %128, %131 : vector<104x128xf32>
    %c0_90 = arith.constant 0 : index
    %c0_91 = arith.constant 0 : index
    %133 = vector.load %arg6[%c0_90, %c0_91] : memref<1x128xf32, #tpu.memory_space<vmem>>, vector<1x128xf32>
    %134 = vector.broadcast %133 : vector<1x128xf32> to vector<104x128xf32>
    %135 = arith.addf %132, %134 : vector<104x128xf32>
    %cst_92 = arith.constant 5.000000e-01 : f32
    %136 = vector.broadcast %cst_92 : f32 to vector<104x1xf32>
    %137 = arith.cmpf ogt, %129, %136 : vector<104x1xf32>
    %cst_93 = arith.constant 0.000000e+00 : f32
    %138 = vector.broadcast %cst_93 : f32 to vector<104x128xf32>
    %139 = arith.maximumf %135, %138 : vector<104x128xf32>
    %cst_94 = arith.constant 0.000000e+00 : f32
    %140 = vector.shape_cast %137 : vector<104x1xi1> to vector<104x1xi1>
    %141 = vector.broadcast %140 : vector<104x1xi1> to vector<104x128xi1>
    %142 = vector.broadcast %cst_94 : f32 to vector<104x128xf32>
    %143 = arith.select %141, %139, %142 : vector<104x128xi1>, vector<104x128xf32>
    %c6 = arith.constant 6 : index
    %c0_95 = arith.constant 0 : index
    %c0_96 = arith.constant 0 : index
    %144 = vector.load %arg2[%c6, %c0_95, %c0_96] : memref<9x128x128xf32, #tpu.memory_space<vmem>>, vector<1x128x128xf32>
    %145 = vector.shape_cast %144 : vector<1x128x128xf32> to vector<128x128xf32>
    %cst_97 = arith.constant dense<0.000000e+00> : vector<104x128xf32>
    %146 = tpu.matmul %143, %145, %cst_97 {dimension_numbers = #tpu.dot_dimension_numbers<[1], [0], [0], [1], [0, 0, 1, 1], [], []>} : vector<104x128xf32>, vector<128x128xf32>, vector<104x128xf32> -> vector<104x128xf32>
    %147 = arith.addf %126, %146 : vector<104x128xf32>
    %c0_98 = arith.constant 0 : index
    %c30 = arith.constant 30 : index
    %c0_99 = arith.constant 0 : index
    %148 = vector.load %arg1[%c0_98, %c30, %c0_99] : memref<1x140x128xf32, #tpu.memory_space<vmem>>, vector<1x104x128xf32>
    %149 = vector.shape_cast %148 : vector<1x104x128xf32> to vector<104x128xf32>
    %c30_100 = arith.constant 30 : index
    %c0_101 = arith.constant 0 : index
    %150 = vector.load %arg4[%c30_100, %c0_101] : memref<140x1xf32, #tpu.memory_space<vmem>>, vector<104x1xf32>
    %c0_102 = arith.constant 0 : index
    %c0_103 = arith.constant 0 : index
    %151 = vector.load %arg5[%c0_102, %c0_103] : memref<1x128xf32, #tpu.memory_space<vmem>>, vector<1x128xf32>
    %152 = vector.broadcast %151 : vector<1x128xf32> to vector<104x128xf32>
    %153 = arith.mulf %149, %152 : vector<104x128xf32>
    %c0_104 = arith.constant 0 : index
    %c0_105 = arith.constant 0 : index
    %154 = vector.load %arg6[%c0_104, %c0_105] : memref<1x128xf32, #tpu.memory_space<vmem>>, vector<1x128xf32>
    %155 = vector.broadcast %154 : vector<1x128xf32> to vector<104x128xf32>
    %156 = arith.addf %153, %155 : vector<104x128xf32>
    %cst_106 = arith.constant 5.000000e-01 : f32
    %157 = vector.broadcast %cst_106 : f32 to vector<104x1xf32>
    %158 = arith.cmpf ogt, %150, %157 : vector<104x1xf32>
    %cst_107 = arith.constant 0.000000e+00 : f32
    %159 = vector.broadcast %cst_107 : f32 to vector<104x128xf32>
    %160 = arith.maximumf %156, %159 : vector<104x128xf32>
    %cst_108 = arith.constant 0.000000e+00 : f32
    %161 = vector.shape_cast %158 : vector<104x1xi1> to vector<104x1xi1>
    %162 = vector.broadcast %161 : vector<104x1xi1> to vector<104x128xi1>
    %163 = vector.broadcast %cst_108 : f32 to vector<104x128xf32>
    %164 = arith.select %162, %160, %163 : vector<104x128xi1>, vector<104x128xf32>
    %c7 = arith.constant 7 : index
    %c0_109 = arith.constant 0 : index
    %c0_110 = arith.constant 0 : index
    %165 = vector.load %arg2[%c7, %c0_109, %c0_110] : memref<9x128x128xf32, #tpu.memory_space<vmem>>, vector<1x128x128xf32>
    %166 = vector.shape_cast %165 : vector<1x128x128xf32> to vector<128x128xf32>
    %cst_111 = arith.constant dense<0.000000e+00> : vector<104x128xf32>
    %167 = tpu.matmul %164, %166, %cst_111 {dimension_numbers = #tpu.dot_dimension_numbers<[1], [0], [0], [1], [0, 0, 1, 1], [], []>} : vector<104x128xf32>, vector<128x128xf32>, vector<104x128xf32> -> vector<104x128xf32>
    %168 = arith.addf %147, %167 : vector<104x128xf32>
    %c0_112 = arith.constant 0 : index
    %c31 = arith.constant 31 : index
    %c0_113 = arith.constant 0 : index
    %169 = vector.load %arg1[%c0_112, %c31, %c0_113] : memref<1x140x128xf32, #tpu.memory_space<vmem>>, vector<1x104x128xf32>
    %170 = vector.shape_cast %169 : vector<1x104x128xf32> to vector<104x128xf32>
    %c31_114 = arith.constant 31 : index
    %c0_115 = arith.constant 0 : index
    %171 = vector.load %arg4[%c31_114, %c0_115] : memref<140x1xf32, #tpu.memory_space<vmem>>, vector<104x1xf32>
    %c0_116 = arith.constant 0 : index
    %c0_117 = arith.constant 0 : index
    %172 = vector.load %arg5[%c0_116, %c0_117] : memref<1x128xf32, #tpu.memory_space<vmem>>, vector<1x128xf32>
    %173 = vector.broadcast %172 : vector<1x128xf32> to vector<104x128xf32>
    %174 = arith.mulf %170, %173 : vector<104x128xf32>
    %c0_118 = arith.constant 0 : index
    %c0_119 = arith.constant 0 : index
    %175 = vector.load %arg6[%c0_118, %c0_119] : memref<1x128xf32, #tpu.memory_space<vmem>>, vector<1x128xf32>
    %176 = vector.broadcast %175 : vector<1x128xf32> to vector<104x128xf32>
    %177 = arith.addf %174, %176 : vector<104x128xf32>
    %cst_120 = arith.constant 5.000000e-01 : f32
    %178 = vector.broadcast %cst_120 : f32 to vector<104x1xf32>
    %179 = arith.cmpf ogt, %171, %178 : vector<104x1xf32>
    %cst_121 = arith.constant 0.000000e+00 : f32
    %180 = vector.broadcast %cst_121 : f32 to vector<104x128xf32>
    %181 = arith.maximumf %177, %180 : vector<104x128xf32>
    %cst_122 = arith.constant 0.000000e+00 : f32
    %182 = vector.shape_cast %179 : vector<104x1xi1> to vector<104x1xi1>
    %183 = vector.broadcast %182 : vector<104x1xi1> to vector<104x128xi1>
    %184 = vector.broadcast %cst_122 : f32 to vector<104x128xf32>
    %185 = arith.select %183, %181, %184 : vector<104x128xi1>, vector<104x128xf32>
    %c8 = arith.constant 8 : index
    %c0_123 = arith.constant 0 : index
    %c0_124 = arith.constant 0 : index
    %186 = vector.load %arg2[%c8, %c0_123, %c0_124] : memref<9x128x128xf32, #tpu.memory_space<vmem>>, vector<1x128x128xf32>
    %187 = vector.shape_cast %186 : vector<1x128x128xf32> to vector<128x128xf32>
    %cst_125 = arith.constant dense<0.000000e+00> : vector<104x128xf32>
    %188 = tpu.matmul %185, %187, %cst_125 {dimension_numbers = #tpu.dot_dimension_numbers<[1], [0], [0], [1], [0, 0, 1, 1], [], []>} : vector<104x128xf32>, vector<128x128xf32>, vector<104x128xf32> -> vector<104x128xf32>
    %189 = arith.addf %168, %188 : vector<104x128xf32>
    %c20_126 = arith.constant 20 : index
    %c0_127 = arith.constant 0 : index
    %190 = vector.load %arg4[%c20_126, %c0_127] : memref<140x1xf32, #tpu.memory_space<vmem>>, vector<104x1xf32>
    %cst_128 = arith.constant 5.000000e-01 : f32
    %191 = vector.broadcast %cst_128 : f32 to vector<104x1xf32>
    %192 = arith.cmpf ogt, %190, %191 : vector<104x1xf32>
    %cst_129 = arith.constant 0.000000e+00 : f32
    %193 = vector.shape_cast %192 : vector<104x1xi1> to vector<104x1xi1>
    %194 = vector.broadcast %193 : vector<104x1xi1> to vector<104x128xi1>
    %195 = vector.broadcast %cst_129 : f32 to vector<104x128xf32>
    %196 = arith.select %194, %189, %195 : vector<104x128xi1>, vector<104x128xf32>
    %cst_130 = arith.constant dense<0.000000e+00> : vector<128xf32>
    %197 = vector.multi_reduction <add>, %196, %cst_130 [0] : vector<104x128xf32> to vector<128xf32>
    %198 = vector.shape_cast %197 : vector<128xf32> to vector<1x128xf32>
    %199 = arith.mulf %189, %189 : vector<104x128xf32>
    %cst_131 = arith.constant 0.000000e+00 : f32
    %200 = vector.shape_cast %192 : vector<104x1xi1> to vector<104x1xi1>
    %201 = vector.broadcast %200 : vector<104x1xi1> to vector<104x128xi1>
    %202 = vector.broadcast %cst_131 : f32 to vector<104x128xf32>
    %203 = arith.select %201, %199, %202 : vector<104x128xi1>, vector<104x128xf32>
    %cst_132 = arith.constant dense<0.000000e+00> : vector<128xf32>
    %204 = vector.multi_reduction <add>, %203, %cst_132 [0] : vector<104x128xf32> to vector<128xf32>
    %205 = vector.shape_cast %204 : vector<128xf32> to vector<1x128xf32>
    %206 = vector.shape_cast %198 : vector<1x128xf32> to vector<1x1x128xf32>
    %207 = vector.shape_cast %206 : vector<1x1x128xf32> to vector<1x1x128xf32>
    %208 = vector.broadcast %207 : vector<1x1x128xf32> to vector<1x8x128xf32>
    %c0_133 = arith.constant 0 : index
    %c0_134 = arith.constant 0 : index
    %c0_135 = arith.constant 0 : index
    %209 = vector.load %arg8[%c0_133, %c0_134, %c0_135] : memref<1x8x128xf32, #tpu.memory_space<vmem>>, vector<1x8x128xf32>
    tpu.vector_store %arg8[%c0_133, %c0_134, %c0_135], %208 {strides = array<i32>} : memref<1x8x128xf32, #tpu.memory_space<vmem>>, vector<1x8x128xf32>,
    %210 = vector.shape_cast %205 : vector<1x128xf32> to vector<1x1x128xf32>
    %211 = vector.shape_cast %210 : vector<1x1x128xf32> to vector<1x1x128xf32>
    %212 = vector.broadcast %211 : vector<1x1x128xf32> to vector<1x8x128xf32>
    %c0_136 = arith.constant 0 : index
    %c0_137 = arith.constant 0 : index
    %c0_138 = arith.constant 0 : index
    %213 = vector.load %arg9[%c0_136, %c0_137, %c0_138] : memref<1x8x128xf32, #tpu.memory_space<vmem>>, vector<1x8x128xf32>
    tpu.vector_store %arg9[%c0_136, %c0_137, %c0_138], %212 {strides = array<i32>} : memref<1x8x128xf32, #tpu.memory_space<vmem>>, vector<1x8x128xf32>,
    %c0_139 = arith.constant 0 : index
    %c0_140 = arith.constant 0 : index
    %214 = vector.load %arg3[%c0_139, %c0_140] : memref<1x128xf32, #tpu.memory_space<vmem>>, vector<1x128xf32>
    %215 = vector.broadcast %214 : vector<1x128xf32> to vector<104x128xf32>
    %216 = arith.addf %189, %215 : vector<104x128xf32>
    %cst_141 = arith.constant 0.000000e+00 : f32
    %217 = vector.broadcast %cst_141 : f32 to vector<20x128xf32>
    %c0_142 = arith.constant 0 : index
    %c0_143 = arith.constant 0 : index
    %c0_144 = arith.constant 0 : index
    %218 = vector.load %arg7[%c0_142, %c0_143, %c0_144] : memref<1x140x128xf32, #tpu.memory_space<vmem>>, vector<1x20x128xf32>
    %219 = vector.shape_cast %218 : vector<1x20x128xf32> to vector<20x128xf32>
    %220 = vector.shape_cast %217 : vector<20x128xf32> to vector<1x20x128xf32>
    tpu.vector_store %arg7[%c0_142, %c0_143, %c0_144], %220 {strides = array<i32>} : memref<1x140x128xf32, #tpu.memory_space<vmem>>, vector<1x20x128xf32>,
    %c0_145 = arith.constant 0 : index
    %c20_146 = arith.constant 20 : index
    %c0_147 = arith.constant 0 : index
    %221 = vector.load %arg7[%c0_145, %c20_146, %c0_147] : memref<1x140x128xf32, #tpu.memory_space<vmem>>, vector<1x104x128xf32>
    %222 = vector.shape_cast %221 : vector<1x104x128xf32> to vector<104x128xf32>
    %223 = vector.shape_cast %216 : vector<104x128xf32> to vector<1x104x128xf32>
    tpu.vector_store %arg7[%c0_145, %c20_146, %c0_147], %223 {strides = array<i32>} : memref<1x140x128xf32, #tpu.memory_space<vmem>>, vector<1x104x128xf32>,
    %cst_148 = arith.constant 0.000000e+00 : f32
    %224 = vector.broadcast %cst_148 : f32 to vector<16x128xf32>
    %c0_149 = arith.constant 0 : index
    %c124 = arith.constant 124 : index
    %c0_150 = arith.constant 0 : index
    %225 = vector.load %arg7[%c0_149, %c124, %c0_150] : memref<1x140x128xf32, #tpu.memory_space<vmem>>, vector<1x16x128xf32>
    %226 = vector.shape_cast %225 : vector<1x16x128xf32> to vector<16x128xf32>
    %227 = vector.shape_cast %224 : vector<16x128xf32> to vector<1x16x128xf32>
    tpu.vector_store %arg7[%c0_149, %c124, %c0_150], %227 {strides = array<i32>} : memref<1x140x128xf32, #tpu.memory_space<vmem>>, vector<1x16x128xf32>,
    return
  }
  func.func @transform_0(%arg0: i32) -> (i32, i32, i32) {
    %c0_i32 = arith.constant 0 : i32
    %c0_i32_0 = arith.constant 0 : i32
    %c0_i32_1 = arith.constant 0 : i32
    return %arg0, %c0_i32, %c0_i32_0 : i32, i32, i32
  }
  func.func @transform_1(%arg0: i32) -> (i32, i32, i32) {
    %c0_i32 = arith.constant 0 : i32
    %c0_i32_0 = arith.constant 0 : i32
    %c0_i32_1 = arith.constant 0 : i32
    %c0_i32_2 = arith.constant 0 : i32
    return %c0_i32, %c0_i32_0, %c0_i32_1 : i32, i32, i32
  }
  func.func @transform_2(%arg0: i32) -> (i32, i32) {
    %c0_i32 = arith.constant 0 : i32
    %c0_i32_0 = arith.constant 0 : i32
    %c0_i32_1 = arith.constant 0 : i32
    return %c0_i32, %c0_i32_0 : i32, i32
  }
  func.func @transform_3(%arg0: i32) -> (i32, i32) {
    %c0_i32 = arith.constant 0 : i32
    %c0_i32_0 = arith.constant 0 : i32
    %c0_i32_1 = arith.constant 0 : i32
    return %c0_i32, %c0_i32_0 : i32, i32
  }
  func.func @transform_4(%arg0: i32) -> (i32, i32) {
    %c0_i32 = arith.constant 0 : i32
    %c0_i32_0 = arith.constant 0 : i32
    %c0_i32_1 = arith.constant 0 : i32
    return %c0_i32, %c0_i32_0 : i32, i32
  }
  func.func @transform_5(%arg0: i32) -> (i32, i32) {
    %c0_i32 = arith.constant 0 : i32
    %c0_i32_0 = arith.constant 0 : i32
    %c0_i32_1 = arith.constant 0 : i32
    return %c0_i32, %c0_i32_0 : i32, i32
  }
  func.func @transform_6(%arg0: i32) -> (i32, i32, i32) {
    %c0_i32 = arith.constant 0 : i32
    %c0_i32_0 = arith.constant 0 : i32
    %c0_i32_1 = arith.constant 0 : i32
    return %arg0, %c0_i32, %c0_i32_0 : i32, i32, i32
  }
  func.func @transform_7(%arg0: i32) -> (i32, i32, i32) {
    %c0_i32 = arith.constant 0 : i32
    %c0_i32_0 = arith.constant 0 : i32
    %c0_i32_1 = arith.constant 0 : i32
    return %arg0, %c0_i32, %c0_i32_0 : i32, i32, i32
  }
  func.func @transform_8(%arg0: i32) -> (i32, i32, i32) {
    %c0_i32 = arith.constant 0 : i32
    %c0_i32_0 = arith.constant 0 : i32
    %c0_i32_1 = arith.constant 0 : i32
    return %arg0, %c0_i32, %c0_i32_0 : i32, i32, i32
  }
}

module attributes {stable_mosaic.version = 11 : i64} {
  func.func @kernel(%arg0: i32, %arg1: memref<1x140x128xf32, #tpu.memory_space<vmem>>, %arg2: memref<1x128xf32, #tpu.memory_space<vmem>>, %arg3: memref<1x128xf32, #tpu.memory_space<vmem>>, %arg4: memref<1x140x8xf32, #tpu.memory_space<vmem>>, %arg5: memref<8x128xf32, #tpu.memory_space<vmem>>, %arg6: memref<1x128xf32, #tpu.memory_space<vmem>>, %arg7: memref<1x104x128xf32, #tpu.memory_space<vmem>>) attributes {dimension_semantics = [#tpu.dimension_semantics<parallel>], iteration_bounds = array<i64: 2>, scalar_prefetch = 0 : i64, scratch_operands = 0 : i64, tpu.core_type = #tpu.core_type<tc>, window_params = [{transform_indices = @transform_0, window_bounds = array<i64: 1, 140, 128>}, {pipeline_mode = #tpu.pipeline_mode<synchronous>, transform_indices = @transform_1, window_bounds = array<i64: 1, 128>}, {pipeline_mode = #tpu.pipeline_mode<synchronous>, transform_indices = @transform_2, window_bounds = array<i64: 1, 128>}, {transform_indices = @transform_3, window_bounds = array<i64: 1, 140, 8>}, {pipeline_mode = #tpu.pipeline_mode<synchronous>, transform_indices = @transform_4, window_bounds = array<i64: 8, 128>}, {pipeline_mode = #tpu.pipeline_mode<synchronous>, transform_indices = @transform_5, window_bounds = array<i64: 1, 128>}, {transform_indices = @transform_6, window_bounds = array<i64: 1, 104, 128>}]} {
    %c0 = arith.constant 0 : index
    %c20 = arith.constant 20 : index
    %c0_0 = arith.constant 0 : index
    %0 = vector.load %arg1[%c0, %c20, %c0_0] : memref<1x140x128xf32, #tpu.memory_space<vmem>>, vector<1x104x128xf32>
    %1 = vector.shape_cast %0 : vector<1x104x128xf32> to vector<104x128xf32>
    %c0_1 = arith.constant 0 : index
    %c20_2 = arith.constant 20 : index
    %c0_3 = arith.constant 0 : index
    %2 = vector.load %arg4[%c0_1, %c20_2, %c0_3] : memref<1x140x8xf32, #tpu.memory_space<vmem>>, vector<1x104x8xf32>
    %3 = vector.shape_cast %2 : vector<1x104x8xf32> to vector<104x8xf32>
    %c0_4 = arith.constant 0 : index
    %c0_5 = arith.constant 0 : index
    %4 = vector.load %arg5[%c0_4, %c0_5] : memref<8x128xf32, #tpu.memory_space<vmem>>, vector<8x128xf32>
    %cst = arith.constant dense<0.000000e+00> : vector<104x128xf32>
    %5 = tpu.matmul %3, %4, %cst {dimension_numbers = #tpu.dot_dimension_numbers<[1], [0], [0], [1], [0, 0, 1, 1], [], []>} : vector<104x8xf32>, vector<8x128xf32>, vector<104x128xf32> -> vector<104x128xf32>
    %c0_6 = arith.constant 0 : index
    %c0_7 = arith.constant 0 : index
    %6 = vector.load %arg6[%c0_6, %c0_7] : memref<1x128xf32, #tpu.memory_space<vmem>>, vector<1x128xf32>
    %7 = vector.broadcast %6 : vector<1x128xf32> to vector<104x128xf32>
    %8 = arith.addf %5, %7 : vector<104x128xf32>
    %c0_8 = arith.constant 0 : index
    %c0_9 = arith.constant 0 : index
    %9 = vector.load %arg2[%c0_8, %c0_9] : memref<1x128xf32, #tpu.memory_space<vmem>>, vector<1x128xf32>
    %10 = vector.broadcast %9 : vector<1x128xf32> to vector<104x128xf32>
    %11 = arith.mulf %1, %10 : vector<104x128xf32>
    %c0_10 = arith.constant 0 : index
    %c0_11 = arith.constant 0 : index
    %12 = vector.load %arg3[%c0_10, %c0_11] : memref<1x128xf32, #tpu.memory_space<vmem>>, vector<1x128xf32>
    %13 = vector.broadcast %12 : vector<1x128xf32> to vector<104x128xf32>
    %14 = arith.addf %11, %13 : vector<104x128xf32>
    %15 = arith.addf %14, %8 : vector<104x128xf32>
    %cst_12 = arith.constant 0.000000e+00 : f32
    %16 = vector.broadcast %cst_12 : f32 to vector<104x128xf32>
    %17 = arith.maximumf %15, %16 : vector<104x128xf32>
    %c0_13 = arith.constant 0 : index
    %c0_14 = arith.constant 0 : index
    %c0_15 = arith.constant 0 : index
    %18 = vector.load %arg7[%c0_13, %c0_14, %c0_15] : memref<1x104x128xf32, #tpu.memory_space<vmem>>, vector<1x104x128xf32>
    %19 = vector.shape_cast %18 : vector<1x104x128xf32> to vector<104x128xf32>
    %20 = vector.shape_cast %17 : vector<104x128xf32> to vector<1x104x128xf32>
    tpu.vector_store %arg7[%c0_13, %c0_14, %c0_15], %20 {strides = array<i32>} : memref<1x104x128xf32, #tpu.memory_space<vmem>>, vector<1x104x128xf32>,
    return
  }
  func.func @transform_0(%arg0: i32) -> (i32, i32, i32) {
    %c0_i32 = arith.constant 0 : i32
    %c0_i32_0 = arith.constant 0 : i32
    %c0_i32_1 = arith.constant 0 : i32
    return %arg0, %c0_i32, %c0_i32_0 : i32, i32, i32
  }
  func.func @transform_1(%arg0: i32) -> (i32, i32) {
    %c0_i32 = arith.constant 0 : i32
    %c0_i32_0 = arith.constant 0 : i32
    %c0_i32_1 = arith.constant 0 : i32
    return %c0_i32, %c0_i32_0 : i32, i32
  }
  func.func @transform_2(%arg0: i32) -> (i32, i32) {
    %c0_i32 = arith.constant 0 : i32
    %c0_i32_0 = arith.constant 0 : i32
    %c0_i32_1 = arith.constant 0 : i32
    return %c0_i32, %c0_i32_0 : i32, i32
  }
  func.func @transform_3(%arg0: i32) -> (i32, i32, i32) {
    %c0_i32 = arith.constant 0 : i32
    %c0_i32_0 = arith.constant 0 : i32
    %c0_i32_1 = arith.constant 0 : i32
    return %arg0, %c0_i32, %c0_i32_0 : i32, i32, i32
  }
  func.func @transform_4(%arg0: i32) -> (i32, i32) {
    %c0_i32 = arith.constant 0 : i32
    %c0_i32_0 = arith.constant 0 : i32
    %c0_i32_1 = arith.constant 0 : i32
    return %c0_i32, %c0_i32_0 : i32, i32
  }
  func.func @transform_5(%arg0: i32) -> (i32, i32) {
    %c0_i32 = arith.constant 0 : i32
    %c0_i32_0 = arith.constant 0 : i32
    %c0_i32_1 = arith.constant 0 : i32
    return %c0_i32, %c0_i32_0 : i32, i32
  }
  func.func @transform_6(%arg0: i32) -> (i32, i32, i32) {
    %c0_i32 = arith.constant 0 : i32
    %c0_i32_0 = arith.constant 0 : i32
    %c0_i32_1 = arith.constant 0 : i32
    return %arg0, %c0_i32, %c0_i32_0 : i32, i32, i32
  }
}

</mosaic_0001>

<bundles_post_ra>
// kernel: residual_block_forward.3
= control target key start
LH: loop header
LB: loop body
LE: loop exit
PB: predicated region body
PF: predicated region fallthrough
CT: control target
= control target key end

     0   :  { %s1803_s21 = smov 0   ;;  %s2181_s0 = inlined_call_operand.vmem [shape: f32[2,140,16], index: 0, kind: input, shape index: {}]   ;;  %s2182_s1 = inlined_call_operand.vmem [shape: f32[4,16,128], index: 1, kind: input, shape index: {}]   ;;  %s2183_s2 = inlined_call_operand.vmem [shape: f32[1,128], index: 2, kind: input, shape index: {}]   ;;  %s2184_s3 = inlined_call_operand.vmem [shape: f32[140,1], index: 3, kind: input, shape index: {}]   ;;  %s2185_s4 = inlined_call_operand.vmem [shape: f32[2,140,128], index: 4, kind: output, shape index: {0}]   ;;  %s2186_s5 = inlined_call_operand.vmem [shape: f32[2,8,128], index: 5, kind: output, shape index: {1}]   ;;  %s2187_s6 = inlined_call_operand.vmem [shape: f32[2,8,128], index: 6, kind: output, shape index: {2}]  }
   0x1 LB: > { %s1362_s22 = sadd.s32 4294967295, %s1762_s21   ;;  %p1366_p0 = scmp.ge.s32.totalorder %s1762_s21, 1  ;;  %s1762_s21 = sphi %s1803_s21, %s17_s21  }
   0x2   : > { %p217_p1 = scmp.lt.s32.totalorder %s1762_s21, 3 }
   0x4   : > { %p218_p2 = pnand %p1366_p0, %p217_p1 }
   0x5   : > { %v1371_v0 = vld [vmem:[%s2182_s1 + $0x10] sm:$0xff] (!%p218_p2)  ;;  %v1372_v1 = vld [vmem:[%s2182_s1 + $0x18] sm:$0xff] (!%p218_p2)  ;;  %v1399_v2 = vld [vmem:[%s2182_s1 + $0x20] sm:$0xff] (!%p218_p2)  ;;  %v1764_v3 = vmov (!%p218_p2), 0.0|0.0   ;;  %p255_p3 = scmp.lt.s32.totalorder (!%p218_p2), %s1362_s22, 1  ;;  %vm1765_vm0 = vmmov (!%p218_p2), 0  }
   0x6   : > { %221 = sbr.rel (%p218_p2) target bundleno = 350 (0x15e), region = 36  ;;  %1664 = vmatprep.subr.bf16.mxu1 (!%p218_p2), %v1764_v3  ;;  %1670 = vmatprep.subr.bf16.mxu0 (!%p218_p2), %v1764_v3  ;;  %v1665_v4 = vpack.c.bf16 (!%p218_p2), %v1372_v1, %v1371_v0  ;;  %v1400_v5 = vld [vmem:[%s2182_s1 + $0x28] sm:$0xff] (!%p218_p2)  ;;  %v286_v6 = vld [vmem:[%s2182_s1] sm:$0xff] (!%p218_p2)  ;;  %v1766_v8 = vmov (!%p218_p2), 0.0   ;;  %v1414_v10 = vld [vmem:[%s2182_s1 + $0x30] sm:$0xff] (!%p218_p2)  ;;  %v1767_v13 = vmov (!%p218_p2), 0  }
   0x7   : > { %v1671_v7 = vpack.c.bf16 (!%p218_p2), %v1400_v5, %v1399_v2  ;;  %1496 = vmatprep.mubr.msk.f32.mxu1 (!%p218_p2), %vm1765_vm0, %v1766_v8  ;;  %1582 = vmatprep.mubr.msk.f32.mxu0 (!%p218_p2), %vm1765_vm0, %v1766_v8  ;;  %v287_v9 = vld [vmem:[%s2182_s1 + $0x8] sm:$0xff] (!%p218_p2)  ;;  %v1039_v11 = vld [vmem:[%s2184_s3 + $0x14] sm:$0xff] (!%p218_p2)  ;;  %v1040_v14 = vld [vmem:[%s2184_s3 + $0x1c] sm:$0xff] (!%p218_p2)  ;;  %vm304_vm3 = vcmask (!%p218_p2), 130048  }
   0x8   : > { %1666 = vmatpush3.bf16.msra.mxu1 (!%p218_p2), %v1665_v4  ;;  %v1415_v12 = vld [vmem:[%s2182_s1 + $0x38] sm:$0xff] (!%p218_p2)  ;;  %1754 = vset.pattern.permute.xlu0 (!%p218_p2), %v1767_v13  ;;  %vm1052_vm1 = vcmp.gt.f32.partialorder (!%p218_p2), %v1039_v11, 0.5  ;;  %v1041_v15 = vld [vmem:[%s2184_s3 + $0x24] sm:$0xff] (!%p218_p2)  ;;  %v1042_v17 = vld [vmem:[%s2184_s3 + $0x2c] sm:$0xff] (!%p218_p2)  ;;  %v1668_v19 = vpack.c.bf16 (!%p218_p2), %v287_v9, %v286_v6  ;;  %vm1053_vm4 = vcmp.gt.f32.partialorder (!%p218_p2), %v1040_v14, 0.5 }
   0x9   : > { %1672 = vmatpush3.bf16.msra.mxu0 (!%p218_p2), %v1671_v7  ;;  %1667 = vmatprep.subr.bf16.mxu1 (!%p218_p2), %v1764_v3  ;;  %v1065_v16 = vsel (!%p218_p2), %vm1052_vm1, 1, %v1767_v13  ;;  %vm1054_vm2 = vcmp.gt.f32.partialorder (!%p218_p2), %v1041_v15, 0.5  ;;  %v1674_v20 = vpack.c.bf16 (!%p218_p2), %v1415_v12, %v1414_v10  ;;  %vm1055_vm5 = vcmp.gt.f32.partialorder (!%p218_p2), %v1042_v17, 0.5  ;;  %v1043_v21 = vld [vmem:[%s2184_s3 + $0x34] sm:$0xff] (!%p218_p2)  ;;  %v1044_v22 = vld [vmem:[%s2184_s3 + $0x3c] sm:$0xff] (!%p218_p2)  ;;  %v1045_v29 = vld [vmem:[%s2184_s3 + $0x44] sm:$0xff] (!%p218_p2) }
   0xa   : > { %1673 = vmatprep.subr.bf16.mxu0 (!%p218_p2), %v1764_v3  ;;  %1079 = vperm.xlu0 (!%p218_p2), %1754, %v1065_v16   ;;  %v1067_v18 = vsel (!%p218_p2), %vm1054_vm2, 1, %v1767_v13  ;;  %v1066_v25 = vsel (!%p218_p2), %vm1053_vm4, 1, %v1767_v13  ;;  %v1068_v26 = vsel (!%p218_p2), %vm1055_vm5, 1, %v1767_v13  ;;  %vm1056_vm6 = vcmp.gt.f32.partialorder (!%p218_p2), %v1043_v21, 0.5  ;;  %v1046_v30 = vld [vmem:[%s2184_s3 + $0x4c] sm:$0xff] (!%p218_p2)  ;;  %v1047_v35 = vld [vmem:[%s2184_s3 + $0x54] sm:$0xff] (!%p218_p2) }
   0xb   : > { %1755 = vset.pattern.permute.xlu1 (!%p218_p2), %v1767_v13  ;;  %vm1057_vm7 = vcmp.gt.f32.partialorder (!%p218_p2), %v1044_v22, 0.5  ;;  %v1069_v31 = vsel (!%p218_p2), %vm1056_vm6, 1, %v1767_v13  ;;  %vm1058_vm8 = vcmp.gt.f32.partialorder (!%p218_p2), %v1045_v29, 0.5  ;;  %vm1059_vm9 = vcmp.gt.f32.partialorder (!%p218_p2), %v1046_v30, 0.5  ;;  %v1048_v36 = vld [vmem:[%s2184_s3 + $0x5c] sm:$0xff] (!%p218_p2)  ;;  %v1049_v41 = vld [vmem:[%s2184_s3 + $0x64] sm:$0xff] (!%p218_p2) }
   0xc   : > { %1085 = vperm.xlu1 (!%p218_p2), %1755, %v1067_v18   ;;  %v1070_v32 = vsel (!%p218_p2), %vm1057_vm7, 1, %v1767_v13  ;;  %v1071_v37 = vsel (!%p218_p2), %vm1058_vm8, 1, %v1767_v13  ;;  %v1072_v38 = vsel (!%p218_p2), %vm1059_vm9, 1, %v1767_v13  ;;  %vm1060_vm10 = vcmp.gt.f32.partialorder (!%p218_p2), %v1047_v35, 0.5  ;;  %v1051_v46 = vld [vmem:[%s2184_s3 + $0x74] sm:$0xff] (!%p218_p2)  ;;  %v1050_v48 = vld [vmem:[%s2184_s3 + $0x6c] sm:$0xff] (!%p218_p2) }
   0xd   : > { %s2189_s22 = smov (!%p255_p3, %s1362_s22), 1  ;;  %vm1061_vm11 = vcmp.gt.f32.partialorder %v1048_v36, 0.5  ;;  %v1073_v42 = vsel %vm1060_vm10, 1, %v1767_v13  ;;  %vm1062_vm12 = vcmp.gt.f32.partialorder %v1049_v41, 0.5  ;;  %vm1064_vm13 = vcmp.gt.f32.partialorder %v1051_v46, 0.5 }
   0xe   : > { %s1741_s25 = smul.u32 144, %s2189_s22  ;;  %1082 = vperm.xlu0 %1754, %v1066_v25   ;;  %v1074_v43 = vsel %vm1061_vm11, 1, %v1767_v13  ;;  %v1075_v47 = vsel %vm1062_vm12, 1, %v1767_v13  ;;  %vm1063_vm14 = vcmp.gt.f32.partialorder %v1050_v48, 0.5  ;;  %v1077_v52 = vsel %vm1064_vm13, 1, %v1767_v13  ;;  %s1369_s30 = sshll.u32 %s2189_s22, 3 }
   0xf   : > { %v1076_v51 = vsel %vm1063_vm14, 1, %v1767_v13  ;;  %v2127_v35 = vld [vmem:[%s2183_s2] ss:$0 sm:$0xff]  ;;  %s268_s9 = scalar_lea.vmem %s2186_s5, %s1369_s30  ;;  %s272_s12 = scalar_lea.vmem %s2187_s6, %s1369_s30 }
  0x10   : > { %s1863_s28 = scalar_lea.vmem %s2181_s0, %s1741_s25  ;;  %1088 = vperm.xlu1 %1755, %v1068_v26   ;;  %s2112_s29 = scalar_lea.vmem %s2185_s4, %s1741_s25 }
  0x11   : > { %v288_v23 = vld [vmem:[%s1863_s28 + $0xa] sm:$0xff]  ;;  %v643_v24 = vld [vmem:[%s1863_s28 + $0x13] sm:$0xff]  ;;  %v644_v28 = vld [vmem:[%s1863_s28 + $0x1b] sm:$0xff]  ;;  %1227 = vst [vmem:[%s2112_s29] sm:$0xff] %v1766_v8 }
  0x12   : > { %1497 = vmatmul.mubr.msk.f32.vlgmr.msra.gmra.mrb[0].mxu1 %vm304_vm3, %v288_v23  ;;  %1583 = vmatmul.mubr.msk.f32.vlgmr.msra.gmra.mrb[0].mxu0 %vm304_vm3, %v643_v24  ;;  %v289_v27 = vld [vmem:[%s1863_s28 + $0x12] sm:$0xff]  ;;  %v290_v33 = vld [vmem:[%s1863_s28 + $0x1a] sm:$0xff]  ;;  %v645_v34 = vld [vmem:[%s1863_s28 + $0x23] sm:$0xff]  ;;  %1228 = vst [vmem:[%s2112_s29 + $0x8] sm:$0xff] %v1766_v8 }
  0x13   : > { %1669 = vmatpush3.bf16.msra.mxu1 %v1668_v19  ;;  %1675 = vmatpush3.bf16.msra.mxu0 %v1674_v20  ;;  %v291_v39 = vld [vmem:[%s1863_s28 + $0x22] sm:$0xff]  ;;  %v646_v40 = vld [vmem:[%s1863_s28 + $0x2b] sm:$0xff]  ;;  %v647_v45 = vld [vmem:[%s1863_s28 + $0x33] sm:$0xff]  ;;  %1229 = vst [vmem:[%s2112_s29 + $0x10] sm:$0xf] %v1766_v8 }
  0x14   : > { %1499 = vmatprep.mubr.msk.f32.mxu1 %vm1765_vm0, %v1766_v8  ;;  %1585 = vmatprep.mubr.msk.f32.mxu0 %vm1765_vm0, %v1766_v8  ;;  %v292_v44 = vld [vmem:[%s1863_s28 + $0x2a] sm:$0xff]  ;;  %v293_v49 = vld [vmem:[%s1863_s28 + $0x32] sm:$0xff]  ;;  %v648_v50 = vld [vmem:[%s1863_s28 + $0x3b] sm:$0xff]  ;;  %1243 = vst [vmem:[%s2112_s29 + $0x7c] sm:$0xff] %v1766_v8 }
  0x15   : > { %1091 = vperm.xlu0 %1754, %v1069_v31   ;;  %1094 = vperm.xlu1 %1755, %v1070_v32   ;;  %v294_v53 = vld [vmem:[%s1863_s28 + $0x3a] sm:$0xff]  ;;  %v649_v54 = vld [vmem:[%s1863_s28 + $0x43] sm:$0xff]  ;;  %v650_v56 = vld [vmem:[%s1863_s28 + $0x4b] sm:$0xff]  ;;  %1244 = vst [vmem:[%s2112_s29 + $0x84] sm:$0xff] %v1766_v8 }
  0x16   : > { %1500 = vmatmul.mubr.msk.f32.gmra.mrb[2].mxu1 %vm304_vm3, %v289_v27  ;;  %1586 = vmatmul.mubr.msk.f32.gmra.mrb[2].mxu0 %vm304_vm3, %v644_v28  ;;  %v295_v55 = vld [vmem:[%s1863_s28 + $0x42] sm:$0xff]  ;;  %v296_v57 = vld [vmem:[%s1863_s28 + $0x4a] sm:$0xff]  ;;  %v651_v58 = vld [vmem:[%s1863_s28 + $0x53] sm:$0xff] }
  0x17   : > { %1502 = vmatprep.mubr.msk.f32.mxu1 %vm1765_vm0, %v1766_v8  ;;  %1588 = vmatprep.mubr.msk.f32.mxu0 %vm1765_vm0, %v1766_v8  ;;  %v297_v59 = vld [vmem:[%s1863_s28 + $0x52] sm:$0xff]  ;;  %v652_v60 = vld [vmem:[%s1863_s28 + $0x5b] sm:$0xff]  ;;  %v653_v62 = vld [vmem:[%s1863_s28 + $0x63] sm:$0xff] }
  0x18   : > { %v298_v61 = vld [vmem:[%s1863_s28 + $0x5a] sm:$0xff]  ;;  %v299_v63 = vld [vmem:[%s1863_s28 + $0x62] sm:$0xff]  ;;  %v654_v0 = vld [vmem:[%s1863_s28 + $0x6b] sm:$0xff] }
  0x19   : > { %1097 = vperm.xlu0 %1754, %v1071_v37   ;;  %1100 = vperm.xlu1 %1755, %v1072_v38   ;;  %v300_v1 = vld [vmem:[%s1863_s28 + $0x6a] sm:$0xff]  ;;  %v655_v2 = vld [vmem:[%s1863_s28 + $0x73] sm:$0xff]  ;;  %v842_v6 = vld [vmem:[%s1863_s28 + $0x1c] sm:$0xff] }
  0x1a   : > { %1503 = vmatmul.mubr.msk.f32.gmra.mrb[4].mxu1 %vm304_vm3, %v290_v33  ;;  %1589 = vmatmul.mubr.msk.f32.gmra.mrb[4].mxu0 %vm304_vm3, %v645_v34  ;;  %v273_v3 = vld [vmem:[%s1863_s28 + $0x9] sm:$0xff]  ;;  %v841_v4 = vld [vmem:[%s1863_s28 + $0x14] sm:$0xff]  ;;  %v276_v10 = vld [vmem:[%s1863_s28 + $0x21] sm:$0xff] }
  0x1b   : > { %1505 = vmatprep.mubr.msk.f32.mxu1 %vm1765_vm0, %v1766_v8  ;;  %1591 = vmatprep.mubr.msk.f32.mxu0 %vm1765_vm0, %v1766_v8  ;;  %v274_v5 = vld [vmem:[%s1863_s28 + $0x11] sm:$0xff]  ;;  %v275_v7 = vld [vmem:[%s1863_s28 + $0x19] sm:$0xff]  ;;  %v843_v9 = vld [vmem:[%s1863_s28 + $0x24] sm:$0xff] }
  0x1c   : > { %v844_v11 = vld [vmem:[%s1863_s28 + $0x2c] sm:$0xff]  ;;  %v845_v13 = vld [vmem:[%s1863_s28 + $0x34] sm:$0xff]  ;;  %v846_v15 = vld [vmem:[%s1863_s28 + $0x3c] sm:$0xff] }
  0x1d   : > { %1103 = vperm.xlu0 %1754, %v1073_v42   ;;  %1106 = vperm.xlu1 %1755, %v1074_v43   ;;  %v277_v12 = vld [vmem:[%s1863_s28 + $0x29] sm:$0xff]  ;;  %v278_v14 = vld [vmem:[%s1863_s28 + $0x31] sm:$0xff]  ;;  %v279_v16 = vld [vmem:[%s1863_s28 + $0x39] sm:$0xff] }
  0x1e   : > { %1506 = vmatmul.mubr.msk.f32.gmra.mrb[6].mxu1 %vm304_vm3, %v291_v39  ;;  %1592 = vmatmul.mubr.msk.f32.gmra.mrb[6].mxu0 %vm304_vm3, %v646_v40  ;;  %v847_v17 = vld [vmem:[%s1863_s28 + $0x44] sm:$0xff]  ;;  %v848_v19 = vld [vmem:[%s1863_s28 + $0x4c] sm:$0xff]  ;;  %v849_v21 = vld [vmem:[%s1863_s28 + $0x54] sm:$0xff] }
  0x1f   : > { %1508 = vmatprep.mubr.msk.f32.mxu1 %vm1765_vm0, %v1766_v8  ;;  %1594 = vmatprep.mubr.msk.f32.mxu0 %vm1765_vm0, %v1766_v8  ;;  %v280_v18 = vld [vmem:[%s1863_s28 + $0x41] sm:$0xff]  ;;  %v281_v20 = vld [vmem:[%s1863_s28 + $0x49] sm:$0xff]  ;;  %v282_v22 = vld [vmem:[%s1863_s28 + $0x51] sm:$0xff] }
  0x20   : > { %v850_v23 = vld [vmem:[%s1863_s28 + $0x5c] sm:$0xff]  ;;  %v851_v25 = vld [vmem:[%s1863_s28 + $0x64] sm:$0xff]  ;;  %v852_v27 = vld [vmem:[%s1863_s28 + $0x6c] sm:$0xff] }
  0x21   : > { %1109 = vperm.xlu0 %1754, %v1075_v47   ;;  %1112 = vperm.xlu1 %1755, %v1076_v51   ;;  %v283_v24 = vld [vmem:[%s1863_s28 + $0x59] sm:$0xff]  ;;  %v284_v26 = vld [vmem:[%s1863_s28 + $0x61] sm:$0xff]  ;;  %v285_v28 = vld [vmem:[%s1863_s28 + $0x69] sm:$0xff] }
  0x22   : > { %1509 = vmatmul.mubr.msk.f32.gmra.mrb[8].mxu1 %vm304_vm3, %v292_v44  ;;  %1595 = vmatmul.mubr.msk.f32.gmra.mrb[8].mxu0 %vm304_vm3, %v647_v45  ;;  %v853_v29 = vld [vmem:[%s1863_s28 + $0x74] sm:$0xff] }
  0x23   : > { %1511 = vmatprep.mubr.msk.f32.mxu1 %vm1765_vm0, %v1766_v8  ;;  %1597 = vmatprep.mubr.msk.f32.mxu0 %vm1765_vm0, %v1766_v8 }
  0x25   : > { %1115 = vperm.xlu0 %1754, %v1077_v52  }
  0x26   : > { %1512 = vmatmul.mubr.msk.f32.gmra.mrb[10].mxu1 %vm304_vm3, %v293_v49  ;;  %1598 = vmatmul.mubr.msk.f32.gmra.mrb[10].mxu0 %vm304_vm3, %v648_v50 }
  0x27   : > { %1514 = vmatprep.mubr.msk.f32.mxu1 %vm1765_vm0, %v1766_v8  ;;  %1600 = vmatprep.mubr.msk.f32.mxu0 %vm1765_vm0, %v1766_v8 }
  0x2a   : > { %1515 = vmatmul.mubr.msk.f32.gmra.mrb[12].mxu1 %vm304_vm3, %v294_v53  ;;  %1601 = vmatmul.mubr.msk.f32.gmra.mrb[12].mxu0 %vm304_vm3, %v649_v54 }
  0x2b   : > { %1517 = vmatprep.mubr.msk.f32.mxu1 %vm1765_vm0, %v1766_v8  ;;  %1603 = vmatprep.mubr.msk.f32.mxu0 %vm1765_vm0, %v1766_v8 }
  0x2e   : > { %1518 = vmatmul.mubr.msk.f32.gmra.mrb[14].mxu1 %vm304_vm3, %v295_v55  ;;  %1604 = vmatmul.mubr.msk.f32.gmra.mrb[14].mxu0 %vm304_vm3, %v650_v56 }
  0x2f   : > { %1520 = vmatprep.mubr.msk.f32.mxu1 %vm1765_vm0, %v1766_v8  ;;  %1606 = vmatprep.mubr.msk.f32.mxu0 %vm1765_vm0, %v1766_v8 }
  0x32   : > { %1521 = vmatmul.mubr.msk.f32.gmra.mrb[16].mxu1 %vm304_vm3, %v296_v57  ;;  %1607 = vmatmul.mubr.msk.f32.gmra.mrb[16].mxu0 %vm304_vm3, %v651_v58 }
  0x33   : > { %1523 = vmatprep.mubr.msk.f32.mxu1 %vm1765_vm0, %v1766_v8  ;;  %1609 = vmatprep.mubr.msk.f32.mxu0 %vm1765_vm0, %v1766_v8 }
  0x36   : > { %1524 = vmatmul.mubr.msk.f32.gmra.mrb[18].mxu1 %vm304_vm3, %v297_v59  ;;  %1610 = vmatmul.mubr.msk.f32.gmra.mrb[18].mxu0 %vm304_vm3, %v652_v60 }
  0x37   : > { %1526 = vmatprep.mubr.msk.f32.mxu1 %vm1765_vm0, %v1766_v8  ;;  %1612 = vmatprep.mubr.msk.f32.mxu0 %vm1765_vm0, %v1766_v8 }
  0x3a   : > { %1527 = vmatmul.mubr.msk.f32.gmra.mrb[20].mxu1 %vm304_vm3, %v298_v61  ;;  %1613 = vmatmul.mubr.msk.f32.gmra.mrb[20].mxu0 %vm304_vm3, %v653_v62 }
  0x3b   : > { %1529 = vmatprep.mubr.msk.f32.mxu1 %vm1765_vm0, %v1766_v8  ;;  %1615 = vmatprep.mubr.msk.f32.mxu0 %vm1765_vm0, %v1766_v8 }
  0x3e   : > { %1530 = vmatmul.mubr.msk.f32.gmra.mrb[22].mxu1 %vm304_vm3, %v299_v63  ;;  %1616 = vmatmul.mubr.msk.f32.gmra.mrb[22].mxu0 %vm304_vm3, %v654_v0 }
  0x3f   : > { %1532 = vmatprep.mubr.msk.f32.mxu1 %vm1765_vm0, %v1766_v8  ;;  %1618 = vmatprep.mubr.msk.f32.mxu0 %vm1765_vm0, %v1766_v8 }
  0x42   : > { %1533 = vmatmul.mubr.msk.f32.gmra.mrb[24].mxu1 %vm304_vm3, %v300_v1  ;;  %1619 = vmatmul.mubr.msk.f32.gmra.mrb[24].mxu0 %vm304_vm3, %v655_v2 }
  0x43   : > { %1539 = vmatprep.mubr.msk.f32.mxu1 %vm1765_vm0, %v1766_v8  ;;  %1625 = vmatprep.mubr.msk.f32.mxu0 %vm1765_vm0, %v1766_v8 }
  0x46   : > { %1540 = vmatmul.mubr.msk.f32.vlgmr.msra.gmra.mrb[0].mxu1 %vm304_vm3, %v273_v3  ;;  %1626 = vmatmul.mubr.msk.f32.vlgmr.msra.gmra.mrb[0].mxu0 %vm304_vm3, %v841_v4 }
  0x47   : > { %1542 = vmatprep.mubr.msk.f32.mxu1 %vm1765_vm0, %v1766_v8  ;;  %1628 = vmatprep.mubr.msk.f32.mxu0 %vm1765_vm0, %v1766_v8 }
  0x4a   : > { %1543 = vmatmul.mubr.msk.f32.gmra.mrb[2].mxu1 %vm304_vm3, %v274_v5  ;;  %1629 = vmatmul.mubr.msk.f32.gmra.mrb[2].mxu0 %vm304_vm3, %v842_v6 }
  0x4b   : > { %1545 = vmatprep.mubr.msk.f32.mxu1 %vm1765_vm0, %v1766_v8  ;;  %1631 = vmatprep.mubr.msk.f32.mxu0 %vm1765_vm0, %v1766_v8 }
  0x4e   : > { %1546 = vmatmul.mubr.msk.f32.gmra.mrb[4].mxu1 %vm304_vm3, %v275_v7  ;;  %1632 = vmatmul.mubr.msk.f32.gmra.mrb[4].mxu0 %vm304_vm3, %v843_v9 }
  0x4f   : > { %1548 = vmatprep.mubr.msk.f32.mxu1 %vm1765_vm0, %v1766_v8  ;;  %1634 = vmatprep.mubr.msk.f32.mxu0 %vm1765_vm0, %v1766_v8 }
  0x52   : > { %1549 = vmatmul.mubr.msk.f32.gmra.mrb[6].mxu1 %vm304_vm3, %v276_v10  ;;  %1635 = vmatmul.mubr.msk.f32.gmra.mrb[6].mxu0 %vm304_vm3, %v844_v11 }
  0x53   : > { %1551 = vmatprep.mubr.msk.f32.mxu1 %vm1765_vm0, %v1766_v8  ;;  %1637 = vmatprep.mubr.msk.f32.mxu0 %vm1765_vm0, %v1766_v8 }
  0x56   : > { %1552 = vmatmul.mubr.msk.f32.gmra.mrb[8].mxu1 %vm304_vm3, %v277_v12  ;;  %1638 = vmatmul.mubr.msk.f32.gmra.mrb[8].mxu0 %vm304_vm3, %v845_v13 }
  0x57   : > { %1554 = vmatprep.mubr.msk.f32.mxu1 %vm1765_vm0, %v1766_v8  ;;  %1640 = vmatprep.mubr.msk.f32.mxu0 %vm1765_vm0, %v1766_v8 }
  0x5a   : > { %1555 = vmatmul.mubr.msk.f32.gmra.mrb[10].mxu1 %vm304_vm3, %v278_v14  ;;  %1641 = vmatmul.mubr.msk.f32.gmra.mrb[10].mxu0 %vm304_vm3, %v846_v15 }
  0x5b   : > { %1557 = vmatprep.mubr.msk.f32.mxu1 %vm1765_vm0, %v1766_v8  ;;  %1643 = vmatprep.mubr.msk.f32.mxu0 %vm1765_vm0, %v1766_v8 }
  0x5e   : > { %1558 = vmatmul.mubr.msk.f32.gmra.mrb[12].mxu1 %vm304_vm3, %v279_v16  ;;  %1644 = vmatmul.mubr.msk.f32.gmra.mrb[12].mxu0 %vm304_vm3, %v847_v17 }
  0x5f   : > { %1560 = vmatprep.mubr.msk.f32.mxu1 %vm1765_vm0, %v1766_v8  ;;  %1646 = vmatprep.mubr.msk.f32.mxu0 %vm1765_vm0, %v1766_v8 }
  0x62   : > { %1561 = vmatmul.mubr.msk.f32.gmra.mrb[14].mxu1 %vm304_vm3, %v280_v18  ;;  %1647 = vmatmul.mubr.msk.f32.gmra.mrb[14].mxu0 %vm304_vm3, %v848_v19 }
  0x63   : > { %1563 = vmatprep.mubr.msk.f32.mxu1 %vm1765_vm0, %v1766_v8  ;;  %1649 = vmatprep.mubr.msk.f32.mxu0 %vm1765_vm0, %v1766_v8 }
  0x66   : > { %1564 = vmatmul.mubr.msk.f32.gmra.mrb[16].mxu1 %vm304_vm3, %v281_v20  ;;  %1650 = vmatmul.mubr.msk.f32.gmra.mrb[16].mxu0 %vm304_vm3, %v849_v21 }
  0x67   : > { %1566 = vmatprep.mubr.msk.f32.mxu1 %vm1765_vm0, %v1766_v8  ;;  %1652 = vmatprep.mubr.msk.f32.mxu0 %vm1765_vm0, %v1766_v8 }
  0x6a   : > { %1567 = vmatmul.mubr.msk.f32.gmra.mrb[18].mxu1 %vm304_vm3, %v282_v22  ;;  %1653 = vmatmul.mubr.msk.f32.gmra.mrb[18].mxu0 %vm304_vm3, %v850_v23 }
  0x6b   : > { %1569 = vmatprep.mubr.msk.f32.mxu1 %vm1765_vm0, %v1766_v8  ;;  %1655 = vmatprep.mubr.msk.f32.mxu0 %vm1765_vm0, %v1766_v8 }
  0x6e   : > { %1570 = vmatmul.mubr.msk.f32.gmra.mrb[20].mxu1 %vm304_vm3, %v283_v24  ;;  %1656 = vmatmul.mubr.msk.f32.gmra.mrb[20].mxu0 %vm304_vm3, %v851_v25 }
  0x6f   : > { %1572 = vmatprep.mubr.msk.f32.mxu1 %vm1765_vm0, %v1766_v8  ;;  %1658 = vmatprep.mubr.msk.f32.mxu0 %vm1765_vm0, %v1766_v8 }
  0x72   : > { %1573 = vmatmul.mubr.msk.f32.gmra.mrb[22].mxu1 %vm304_vm3, %v284_v26  ;;  %1659 = vmatmul.mubr.msk.f32.gmra.mrb[22].mxu0 %vm304_vm3, %v852_v27 }
  0x73   : > { %1575 = vmatprep.mubr.msk.f32.mxu1 %vm1765_vm0, %v1766_v8  ;;  %1661 = vmatprep.mubr.msk.f32.mxu0 %vm1765_vm0, %v1766_v8 }
  0x76   : > { %1576 = vmatmul.mubr.msk.f32.gmra.mrb[24].mxu1 %vm304_vm3, %v285_v28  ;;  %1662 = vmatmul.mubr.msk.f32.gmra.mrb[24].mxu0 %vm304_vm3, %v853_v29 }
  0x89   : > { %v1080_v30 = vpop.permute.xlu0 %1079 }
  0x8a   : > { %vm1117_vm15 = vcmp.eq.s32.totalorder %v1080_v30, 1 }
  0x8b   : > { %v1086_v32 = vpop.permute.xlu1 %1085 }
  0x8c   : > { %vm1119_vm1 = vcmp.eq.s32.totalorder %v1086_v32, 1 }
  0x8d   : > { %v1083_v31 = vpop.permute.xlu0 %1082 }
  0x8e   : > { %vm1118_vm0 = vcmp.eq.s32.totalorder %v1083_v31, 1 }
  0x8f   : > { %v1089_v49 = vpop.permute.xlu1 %1088 }
  0x90   : > { %vm1120_vm2 = vcmp.eq.s32.totalorder %v1089_v49, 1 }
  0x94   : > { %v1092_v6 = vpop.permute.xlu0 %1091  ;;  %v1095_v22 = vpop.permute.xlu1 %1094 }
  0x95   : > { %vm1121_vm3 = vcmp.eq.s32.totalorder %v1092_v6, 1  ;;  %vm1122_vm4 = vcmp.eq.s32.totalorder %v1095_v22, 1 }
  0x98   : > { %v1098_v31 = vpop.permute.xlu0 %1097 }
  0x99   : > { %vm1123_vm5 = vcmp.eq.s32.totalorder %v1098_v31, 1 }
 0x119   : > { %v579_v33 = vpop.f32.mrb[0].mxu1  ;;  %v962_v34 = vpop.f32.mrb[0].mxu0 }
 0x11a   : > { %v1676_v36 = vadd.f32 %v962_v34, %v579_v33  ;;  %v1541_v37 = vpop.f32.mrb[1].mxu1  ;;  %v1627_v38 = vpop.f32.mrb[1].mxu0 }
 0x11c   : > { %v1214_v39 = vadd.f32 %v1676_v36, %v2127_v35  ;;  %v1161_v8 = vmul.f32 %v1676_v36, %v1676_v36  ;;  %v1130_v45 = vsel %vm1117_vm15, %v1676_v36, 0.0 }
 0x11d   : > { %v584_v40 = vpop.f32.mrb[2].mxu1  ;;  %v967_v41 = vpop.f32.mrb[2].mxu0 }
 0x11e   : > { %1230 = vst [vmem:[%s2112_s29 + $0x14] sm:$0xff] %v1214_v39  ;;  %v1677_v42 = vadd.f32 %v967_v41, %v584_v40  ;;  %v1544_v43 = vpop.f32.mrb[3].mxu1  ;;  %v1630_v44 = vpop.f32.mrb[3].mxu0  ;;  %v1174_v53 = vsel %vm1117_vm15, %v1161_v8, 0.0 }
 0x11f   : > { %v1101_v43 = vpop.permute.xlu1 %1100 }
 0x120   : > { %v1215_v46 = vadd.f32 %v1677_v42, %v2127_v35  ;;  %v1131_v47 = vsel %vm1118_vm0, %v1677_v42, 0.0  ;;  %v1162_v48 = vmul.f32 %v1677_v42, %v1677_v42  ;;  %vm1124_vm6 = vcmp.eq.s32.totalorder %v1101_v43, 1 }
 0x121   : > { %v1143_v50 = vadd.f32 %v1131_v47, %v1130_v45  ;;  %v589_v51 = vpop.f32.mrb[4].mxu1  ;;  %v972_v52 = vpop.f32.mrb[4].mxu0 }
 0x122   : > { %1231 = vst [vmem:[%s2112_s29 + $0x1c] sm:$0xff] %v1215_v46  ;;  %v1175_v54 = vsel %vm1118_vm0, %v1162_v48, 0.0  ;;  %v1678_v55 = vadd.f32 %v972_v52, %v589_v51  ;;  %v1547_v56 = vpop.f32.mrb[5].mxu1  ;;  %v1633_v57 = vpop.f32.mrb[5].mxu0 }
 0x123   : > { %v1187_v58 = vadd.f32 %v1175_v54, %v1174_v53 }
 0x124   : > { %v1216_v59 = vadd.f32 %v1678_v55, %v2127_v35  ;;  %v1132_v60 = vsel %vm1119_vm1, %v1678_v55, 0.0  ;;  %v1163_v61 = vmul.f32 %v1678_v55, %v1678_v55  ;;  %v1104_v55 = vpop.permute.xlu0 %1103 }
 0x125   : > { %v1144_v62 = vadd.f32 %v1143_v50, %v1132_v60  ;;  %v594_v63 = vpop.f32.mrb[6].mxu1  ;;  %v977_v0 = vpop.f32.mrb[6].mxu0  ;;  %vm1125_vm7 = vcmp.eq.s32.totalorder %v1104_v55, 1 }
 0x126   : > { %1232 = vst [vmem:[%s2112_s29 + $0x24] sm:$0xff] %v1216_v59  ;;  %v1176_v1 = vsel %vm1119_vm1, %v1163_v61, 0.0  ;;  %v1679_v2 = vadd.f32 %v977_v0, %v594_v63  ;;  %v1550_v3 = vpop.f32.mrb[7].mxu1  ;;  %v1636_v4 = vpop.f32.mrb[7].mxu0 }
 0x127   : > { %v1188_v5 = vadd.f32 %v1187_v58, %v1176_v1  ;;  %v1107_v3 = vpop.permute.xlu1 %1106 }
 0x128   : > { %v1217_v7 = vadd.f32 %v1679_v2, %v2127_v35  ;;  %v1133_v9 = vsel %vm1120_vm2, %v1679_v2, 0.0  ;;  %v1164_v10 = vmul.f32 %v1679_v2, %v1679_v2  ;;  %vm1126_vm8 = vcmp.eq.s32.totalorder %v1107_v3, 1 }
 0x129   : > { %v1145_v11 = vadd.f32 %v1144_v62, %v1133_v9  ;;  %v599_v12 = vpop.f32.mrb[8].mxu1  ;;  %v982_v13 = vpop.f32.mrb[8].mxu0 }
 0x12a   : > { %1233 = vst [vmem:[%s2112_s29 + $0x2c] sm:$0xff] %v1217_v7  ;;  %v1177_v14 = vsel %vm1120_vm2, %v1164_v10, 0.0  ;;  %v1680_v15 = vadd.f32 %v982_v13, %v599_v12  ;;  %v1553_v16 = vpop.f32.mrb[9].mxu1  ;;  %v1639_v17 = vpop.f32.mrb[9].mxu0 }
 0x12b   : > { %v1189_v18 = vadd.f32 %v1188_v5, %v1177_v14  ;;  %v1110_v16 = vpop.permute.xlu0 %1109 }
 0x12c   : > { %v1134_v19 = vsel %vm1121_vm3, %v1680_v15, 0.0  ;;  %v1165_v20 = vmul.f32 %v1680_v15, %v1680_v15  ;;  %v1218_v21 = vadd.f32 %v1680_v15, %v2127_v35  ;;  %vm1127_vm9 = vcmp.eq.s32.totalorder %v1110_v16, 1 }
 0x12d   : > { %v1146_v23 = vadd.f32 %v1145_v11, %v1134_v19  ;;  %v604_v24 = vpop.f32.mrb[10].mxu1  ;;  %v987_v25 = vpop.f32.mrb[10].mxu0 }
 0x12e   : > { %v1178_v26 = vsel %vm1121_vm3, %v1165_v20, 0.0  ;;  %1234 = vst [vmem:[%s2112_s29 + $0x34] sm:$0xff] %v1218_v21  ;;  %v1681_v27 = vadd.f32 %v987_v25, %v604_v24  ;;  %v1556_v28 = vpop.f32.mrb[11].mxu1  ;;  %v1642_v29 = vpop.f32.mrb[11].mxu0 }
 0x12f   : > { %v1190_v30 = vadd.f32 %v1189_v18, %v1178_v26  ;;  %v1113_v28 = vpop.permute.xlu1 %1112 }
 0x130   : > { %v1135_v32 = vsel %vm1122_vm4, %v1681_v27, 0.0  ;;  %v1166_v33 = vmul.f32 %v1681_v27, %v1681_v27  ;;  %v1219_v34 = vadd.f32 %v1681_v27, %v2127_v35  ;;  %vm1128_vm10 = vcmp.eq.s32.totalorder %v1113_v28, 1 }
 0x131   : > { %v1147_v36 = vadd.f32 %v1146_v23, %v1135_v32  ;;  %v609_v37 = vpop.f32.mrb[12].mxu1  ;;  %v992_v38 = vpop.f32.mrb[12].mxu0 }
 0x132   : > { %v1179_v39 = vsel %vm1122_vm4, %v1166_v33, 0.0  ;;  %1235 = vst [vmem:[%s2112_s29 + $0x3c] sm:$0xff] %v1219_v34  ;;  %v1682_v40 = vadd.f32 %v992_v38, %v609_v37  ;;  %v1559_v41 = vpop.f32.mrb[13].mxu1  ;;  %v1645_v8 = vpop.f32.mrb[13].mxu0 }
 0x133   : > { %v1191_v42 = vadd.f32 %v1190_v30, %v1179_v39  ;;  %v1116_v41 = vpop.permute.xlu0 %1115 }
 0x134   : > { %v1136_v44 = vsel %vm1123_vm5, %v1682_v40, 0.0  ;;  %v1167_v45 = vmul.f32 %v1682_v40, %v1682_v40  ;;  %v1220_v46 = vadd.f32 %v1682_v40, %v2127_v35  ;;  %vm1129_vm11 = vcmp.eq.s32.totalorder %v1116_v41, 1 }
 0x135   : > { %v1148_v47 = vadd.f32 %v1147_v36, %v1136_v44  ;;  %v614_v48 = vpop.f32.mrb[14].mxu1  ;;  %v997_v49 = vpop.f32.mrb[14].mxu0 }
 0x136   : > { %v1180_v50 = vsel %vm1123_vm5, %v1167_v45, 0.0  ;;  %1236 = vst [vmem:[%s2112_s29 + $0x44] sm:$0xff] %v1220_v46  ;;  %v1683_v51 = vadd.f32 %v997_v49, %v614_v48  ;;  %v1562_v52 = vpop.f32.mrb[15].mxu1  ;;  %v1648_v53 = vpop.f32.mrb[15].mxu0 }
 0x137   : > { %v1192_v54 = vadd.f32 %v1191_v42, %v1180_v50 }
 0x138   : > { %v1137_v56 = vsel %vm1124_vm6, %v1683_v51, 0.0  ;;  %v1168_v57 = vmul.f32 %v1683_v51, %v1683_v51  ;;  %v1221_v58 = vadd.f32 %v1683_v51, %v2127_v35 }
 0x139   : > { %v1149_v59 = vadd.f32 %v1148_v47, %v1137_v56  ;;  %v619_v60 = vpop.f32.mrb[16].mxu1  ;;  %v1002_v61 = vpop.f32.mrb[16].mxu0 }
 0x13a   : > { %v1181_v62 = vsel %vm1124_vm6, %v1168_v57, 0.0  ;;  %1237 = vst [vmem:[%s2112_s29 + $0x4c] sm:$0xff] %v1221_v58  ;;  %v1684_v63 = vadd.f32 %v1002_v61, %v619_v60  ;;  %v1565_v0 = vpop.f32.mrb[17].mxu1  ;;  %v1651_v1 = vpop.f32.mrb[17].mxu0 }
 0x13b   : > { %v1193_v2 = vadd.f32 %v1192_v54, %v1181_v62 }
 0x13c   : > { %v1138_v4 = vsel %vm1125_vm7, %v1684_v63, 0.0  ;;  %v1169_v5 = vmul.f32 %v1684_v63, %v1684_v63  ;;  %v1222_v6 = vadd.f32 %v1684_v63, %v2127_v35 }
 0x13d   : > { %v1150_v7 = vadd.f32 %v1149_v59, %v1138_v4  ;;  %v624_v9 = vpop.f32.mrb[18].mxu1  ;;  %v1007_v10 = vpop.f32.mrb[18].mxu0 }
 0x13e   : > { %v1182_v11 = vsel %vm1125_vm7, %v1169_v5, 0.0  ;;  %1238 = vst [vmem:[%s2112_s29 + $0x54] sm:$0xff] %v1222_v6  ;;  %v1685_v12 = vadd.f32 %v1007_v10, %v624_v9  ;;  %v1568_v13 = vpop.f32.mrb[19].mxu1  ;;  %v1654_v14 = vpop.f32.mrb[19].mxu0 }
 0x13f   : > { %v1194_v15 = vadd.f32 %v1193_v2, %v1182_v11 }
 0x140   : > { %v1139_v17 = vsel %vm1126_vm8, %v1685_v12, 0.0  ;;  %v1170_v18 = vmul.f32 %v1685_v12, %v1685_v12  ;;  %v1223_v19 = vadd.f32 %v1685_v12, %v2127_v35 }
 0x141   : > { %v1151_v20 = vadd.f32 %v1150_v7, %v1139_v17  ;;  %v629_v21 = vpop.f32.mrb[20].mxu1  ;;  %v1012_v22 = vpop.f32.mrb[20].mxu0 }
 0x142   : > { %v1183_v23 = vsel %vm1126_vm8, %v1170_v18, 0.0  ;;  %1239 = vst [vmem:[%s2112_s29 + $0x5c] sm:$0xff] %v1223_v19  ;;  %v1686_v24 = vadd.f32 %v1012_v22, %v629_v21  ;;  %v1571_v25 = vpop.f32.mrb[21].mxu1  ;;  %v1657_v26 = vpop.f32.mrb[21].mxu0 }
 0x143   : > { %v1195_v27 = vadd.f32 %v1194_v15, %v1183_v23 }
 0x144   : > { %v1140_v29 = vsel %vm1127_vm9, %v1686_v24, 0.0  ;;  %v1171_v30 = vmul.f32 %v1686_v24, %v1686_v24  ;;  %v1224_v31 = vadd.f32 %v1686_v24, %v2127_v35 }
 0x145   : > { %v1152_v32 = vadd.f32 %v1151_v20, %v1140_v29  ;;  %v634_v33 = vpop.f32.mrb[22].mxu1  ;;  %v1017_v34 = vpop.f32.mrb[22].mxu0 }
 0x146   : > { %v1184_v36 = vsel %vm1127_vm9, %v1171_v30, 0.0  ;;  %1240 = vst [vmem:[%s2112_s29 + $0x64] sm:$0xff] %v1224_v31  ;;  %v1687_v37 = vadd.f32 %v1017_v34, %v634_v33  ;;  %v1574_v38 = vpop.f32.mrb[23].mxu1  ;;  %v1660_v39 = vpop.f32.mrb[23].mxu0 }
 0x147   : > { %v1196_v40 = vadd.f32 %v1195_v27, %v1184_v36 }
 0x148   : > { %v1141_v8 = vsel %vm1128_vm10, %v1687_v37, 0.0  ;;  %v1172_v42 = vmul.f32 %v1687_v37, %v1687_v37  ;;  %v1225_v43 = vadd.f32 %v1687_v37, %v2127_v35 }
 0x149   : > { %v1153_v44 = vadd.f32 %v1152_v32, %v1141_v8  ;;  %v639_v45 = vpop.f32.mrb[24].mxu1  ;;  %v1022_v46 = vpop.f32.mrb[24].mxu0 }
 0x14a   : > { %v1185_v47 = vsel %vm1128_vm10, %v1172_v42, 0.0  ;;  %1241 = vst [vmem:[%s2112_s29 + $0x6c] sm:$0xff] %v1225_v43  ;;  %v1688_v48 = vadd.f32 %v1022_v46, %v639_v45  ;;  %v1577_v49 = vpop.f32.mrb[25].mxu1  ;;  %v1663_v50 = vpop.f32.mrb[25].mxu0 }
 0x14b   : > { %v1197_v51 = vadd.f32 %v1196_v40, %v1185_v47 }
 0x14c   : > { %v1142_v52 = vsel %vm1129_vm11, %v1688_v48, 0.0  ;;  %v1173_v53 = vmul.f32 %v1688_v48, %v1688_v48  ;;  %v1226_v54 = vadd.f32 %v1688_v48, %v2127_v35 }
 0x14d   : > { %v1154_v55 = vadd.f32 %v1153_v44, %v1142_v52 }
 0x14e   : > { %v1186_v56 = vsel %vm1129_vm11, %v1173_v53, 0.0  ;;  %1242 = vst [vmem:[%s2112_s29 + $0x74] sm:$0xff] %v1226_v54 }
 0x14f   : > { %v1155_v57 = vrot.slane %v1154_v55, 4  ;;  %v1198_v58 = vadd.f32 %v1197_v51, %v1186_v56 }
 0x151   : > { %v1156_v59 = vadd.f32 %v1155_v57, %v1154_v55  ;;  %v1199_v60 = vrot.slane %v1198_v58, 4 }
 0x153   : > { %v1157_v61 = vrot.slane %v1156_v59, 2  ;;  %v1200_v62 = vadd.f32 %v1199_v60, %v1198_v58 }
 0x155   : > { %v1158_v63 = vadd.f32 %v1157_v61, %v1156_v59  ;;  %v1201_v0 = vrot.slane %v1200_v62, 2 }
 0x157   : > { %v1159_v1 = vrot.slane %v1158_v63, 1  ;;  %v1202_v2 = vadd.f32 %v1201_v0, %v1200_v62 }
 0x159   : > { %v1160_v3 = vadd.f32 %v1159_v1, %v1158_v63  ;;  %v1203_v35 = vrot.slane %v1202_v2, 1 }
 0x15b   : > { %v1204_v4 = vadd.f32 %v1203_v35, %v1202_v2  ;;  %1205 = vst [vmem:[%s268_s9] sm:$0xff] %v1160_v3 }
 0x15d   : > { %1206 = vst [vmem:[%s272_s12] sm:$0xff] %v1204_v4 }
 0x15e PF: > { %s17_s21 = sadd.s32 1, %s1762_s21  }
 0x15f   : > { %p14_p4 = scmp.ge.s32.totalorder %s17_s21, 4  }
 0x161   :  { %16 = sbr.rel (!%p14_p4) target bundleno = 1 (0x1), region = 93 }

// kernel: residual_block_forward.5
= control target key start
LH: loop header
LB: loop body
LE: loop exit
PB: predicated region body
PF: predicated region fallthrough
CT: control target
= control target key end

     0   :  { %s762_s21 = smov 0   ;;  %s918_s0 = inlined_call_operand.vmem [shape: f32[2,140,128], index: 0, kind: input, shape index: {}]   ;;  %s919_s1 = inlined_call_operand.vmem [shape: f32[1,128], index: 1, kind: input, shape index: {}]   ;;  %s920_s2 = inlined_call_operand.vmem [shape: f32[1,128], index: 2, kind: input, shape index: {}]   ;;  %s921_s3 = inlined_call_operand.vmem [shape: f32[2,140,8], index: 3, kind: input, shape index: {}]   ;;  %s922_s4 = inlined_call_operand.vmem [shape: f32[8,128], index: 4, kind: input, shape index: {}]   ;;  %s923_s5 = inlined_call_operand.vmem [shape: f32[1,128], index: 5, kind: input, shape index: {}]   ;;  %s924_s6 = inlined_call_operand.vmem [shape: f32[2,104,128], index: 6, kind: output, shape index: {}]  }
   0x1 LB: > { %s622_s22 = sadd.s32 4294967295, %s723_s21   ;;  %p626_p0 = scmp.ge.s32.totalorder %s723_s21, 1  ;;  %s723_s21 = sphi %s762_s21, %s16_s21  }
   0x2   : > { %p222_p1 = scmp.lt.s32.totalorder %s723_s21, 3 }
   0x4   : > { %p223_p2 = pnand %p626_p0, %p222_p1 }
   0x5   : > { %v298_v0 = vld [vmem:[%s922_s4] sm:$0xff] (!%p223_p2)  ;;  %p257_p3 = scmp.lt.s32.totalorder (!%p223_p2), %s622_s22, 1  ;;  %v725_v1 = vmov (!%p223_p2), 0.0   ;;  %vm726_vm0 = vmmov (!%p223_p2), 0   ;;  %vm306_vm1 = vcmask (!%p223_p2), 64512  }
   0x6   : > { %226 = sbr.rel (%p223_p2) target bundleno = 261 (0x105), region = 44  ;;  %662 = vmatprep.subr.mxu0 (!%p223_p2), %v725_v1  ;;  %664 = vmatprep.mubr.msk.f32.mxu0 (!%p223_p2), %vm726_vm0, %v725_v1  ;;  %v833_v16 = vld [vmem:[%s919_s1] ss:$0 sm:$0xff] (!%p223_p2) }
   0x7   : > { %663 = vmatpush3.msra.mxu0 (!%p223_p2), %v298_v0  ;;  %703 = vmatprep.subr.mxu1 (!%p223_p2), %v725_v1  ;;  %v842_v21 = vld [vmem:[%s920_s2] ss:$0 sm:$0xff] (!%p223_p2) }
   0x8   : > { %704 = vmatpush3.msra.mxu1 (!%p223_p2), %v298_v0  ;;  %685 = vmatprep.mubr.msk.f32.mxu1 (!%p223_p2), %vm726_vm0, %v725_v1  ;;  %v848_v23 = vld [vmem:[%s923_s5] ss:$0 sm:$0xff] (!%p223_p2) }
   0xd   : > { %s926_s22 = smov (!%p257_p3, %s622_s22), 1 }
   0xe   : > { %s705_s25 = smul.u32 144, %s926_s22 }
   0xf   : > { %s706_s14 = smul.u32 104, %s926_s22 }
  0x10   : > { %s783_s28 = scalar_lea.vmem %s921_s3, %s705_s25  ;;  %s827_s7 = scalar_lea.vmem %s918_s0, %s705_s25 }
  0x11   : > { %v285_v2 = vld [vmem:[%s783_s28 + $0x14] sm:$0xff]  ;;  %v292_v3 = vld [vmem:[%s783_s28 + $0x4c] sm:$0xff]  ;;  %v286_v4 = vld [vmem:[%s783_s28 + $0x1c] sm:$0xff]  ;;  %s867_s17 = scalar_lea.vmem %s924_s6, %s706_s14 }
  0x12   : > { %665 = vmatmul.mubr.msk.f32.vlgmr.msra.gmra.mrb[0].mxu0 %vm306_vm1, %v285_v2  ;;  %686 = vmatmul.mubr.msk.f32.vlgmr.msra.gmra.mrb[0].mxu1 %vm306_vm1, %v292_v3  ;;  %v293_v5 = vld [vmem:[%s783_s28 + $0x54] sm:$0xff]  ;;  %v287_v6 = vld [vmem:[%s783_s28 + $0x24] sm:$0xff]  ;;  %v294_v7 = vld [vmem:[%s783_s28 + $0x5c] sm:$0xff] }
  0x13   : > { %667 = vmatprep.mubr.msk.f32.mxu0 %vm726_vm0, %v725_v1  ;;  %688 = vmatprep.mubr.msk.f32.mxu1 %vm726_vm0, %v725_v1  ;;  %v288_v8 = vld [vmem:[%s783_s28 + $0x2c] sm:$0xff]  ;;  %v295_v9 = vld [vmem:[%s783_s28 + $0x64] sm:$0xff]  ;;  %v289_v10 = vld [vmem:[%s783_s28 + $0x34] sm:$0xff] }
  0x14   : > { %v296_v11 = vld [vmem:[%s783_s28 + $0x6c] sm:$0xff]  ;;  %v290_v12 = vld [vmem:[%s783_s28 + $0x3c] sm:$0xff]  ;;  %v297_v13 = vld [vmem:[%s783_s28 + $0x74] sm:$0xff] }
  0x15   : > { %v291_v14 = vld [vmem:[%s783_s28 + $0x44] sm:$0xff]  ;;  %v272_v15 = vld [vmem:[%s827_s7 + $0x14] sm:$0xff]  ;;  %v279_v17 = vld [vmem:[%s827_s7 + $0x4c] sm:$0xff] }
  0x16   : > { %668 = vmatmul.mubr.msk.f32.gmra.mrb[2].mxu0 %vm306_vm1, %v286_v4  ;;  %689 = vmatmul.mubr.msk.f32.gmra.mrb[2].mxu1 %vm306_vm1, %v293_v5  ;;  %v483_v18 = vmul.f32 %v833_v16, %v272_v15  ;;  %v490_v19 = vmul.f32 %v833_v16, %v279_v17  ;;  %v273_v20 = vld [vmem:[%s827_s7 + $0x1c] sm:$0xff]  ;;  %v280_v22 = vld [vmem:[%s827_s7 + $0x54] sm:$0xff]  ;;  %v274_v28 = vld [vmem:[%s827_s7 + $0x24] sm:$0xff] }
  0x17   : > { %670 = vmatprep.mubr.msk.f32.mxu0 %vm726_vm0, %v725_v1  ;;  %691 = vmatprep.mubr.msk.f32.mxu1 %vm726_vm0, %v725_v1  ;;  %v484_v24 = vmul.f32 %v833_v16, %v273_v20  ;;  %v491_v27 = vmul.f32 %v833_v16, %v280_v22  ;;  %v281_v31 = vld [vmem:[%s827_s7 + $0x5c] sm:$0xff]  ;;  %v485_v37 = vmul.f32 %v833_v16, %v274_v28  ;;  %v275_v42 = vld [vmem:[%s827_s7 + $0x2c] sm:$0xff]  ;;  %v282_v45 = vld [vmem:[%s827_s7 + $0x64] sm:$0xff] }
  0x18   : > { %v503_v25 = vadd.f32 %v842_v21, %v483_v18  ;;  %v510_v26 = vadd.f32 %v842_v21, %v490_v19  ;;  %v492_v41 = vmul.f32 %v833_v16, %v281_v31  ;;  %v486_v53 = vmul.f32 %v833_v16, %v275_v42  ;;  %v276_v58 = vld [vmem:[%s827_s7 + $0x34] sm:$0xff]  ;;  %v283_v61 = vld [vmem:[%s827_s7 + $0x6c] sm:$0xff]  ;;  %v278_v31 = vld [vmem:[%s827_s7 + $0x44] sm:$0xff] }
  0x19   : > { %v504_v36 = vadd.f32 %v842_v21, %v484_v24  ;;  %v511_v40 = vadd.f32 %v842_v21, %v491_v27  ;;  %v505_v52 = vadd.f32 %v842_v21, %v485_v37  ;;  %v493_v57 = vmul.f32 %v833_v16, %v282_v45 }
  0x1a   : > { %671 = vmatmul.mubr.msk.f32.gmra.mrb[4].mxu0 %vm306_vm1, %v287_v6  ;;  %692 = vmatmul.mubr.msk.f32.gmra.mrb[4].mxu1 %vm306_vm1, %v294_v7  ;;  %v512_v56 = vadd.f32 %v842_v21, %v492_v41  ;;  %v506_v4 = vadd.f32 %v842_v21, %v486_v53  ;;  %v487_v5 = vmul.f32 %v833_v16, %v276_v58 }
  0x1b   : > { %673 = vmatprep.mubr.msk.f32.mxu0 %vm726_vm0, %v725_v1  ;;  %694 = vmatprep.mubr.msk.f32.mxu1 %vm726_vm0, %v725_v1  ;;  %v489_v42 = vmul.f32 %v833_v16, %v278_v31 }
  0x1c   : > { %v507_v22 = vadd.f32 %v842_v21, %v487_v5 }
  0x1d   : > { %v509_v53 = vadd.f32 %v842_v21, %v489_v42 }
  0x1e   : > { %674 = vmatmul.mubr.msk.f32.gmra.mrb[6].mxu0 %vm306_vm1, %v288_v8  ;;  %695 = vmatmul.mubr.msk.f32.gmra.mrb[6].mxu1 %vm306_vm1, %v295_v9  ;;  %v513_v8 = vadd.f32 %v842_v21, %v493_v57  ;;  %v494_v9 = vmul.f32 %v833_v16, %v283_v61 }
  0x1f   : > { %676 = vmatprep.mubr.msk.f32.mxu0 %vm726_vm0, %v725_v1  ;;  %697 = vmatprep.mubr.msk.f32.mxu1 %vm726_vm0, %v725_v1 }
  0x20   : > { %v514_v27 = vadd.f32 %v842_v21, %v494_v9 }
  0x22   : > { %677 = vmatmul.mubr.msk.f32.gmra.mrb[8].mxu0 %vm306_vm1, %v289_v10  ;;  %698 = vmatmul.mubr.msk.f32.gmra.mrb[8].mxu1 %vm306_vm1, %v296_v11  ;;  %v277_v10 = vld [vmem:[%s827_s7 + $0x3c] sm:$0xff] }
  0x23   : > { %679 = vmatprep.mubr.msk.f32.mxu0 %vm726_vm0, %v725_v1  ;;  %700 = vmatprep.mubr.msk.f32.mxu1 %vm726_vm0, %v725_v1  ;;  %v488_v24 = vmul.f32 %v833_v16, %v277_v10 }
  0x26   : > { %680 = vmatmul.mubr.msk.f32.gmra.mrb[10].mxu0 %vm306_vm1, %v290_v12  ;;  %701 = vmatmul.mubr.msk.f32.gmra.mrb[10].mxu1 %vm306_vm1, %v297_v13  ;;  %v284_v13 = vld [vmem:[%s827_s7 + $0x74] sm:$0xff] }
  0x27   : > { %682 = vmatprep.mubr.msk.f32.mxu0 %vm726_vm0, %v725_v1  ;;  %v495_v28 = vmul.f32 %v833_v16, %v284_v13 }
  0x29   : > { %v515_v41 = vadd.f32 %v842_v21, %v495_v28 }
  0x2a   : > { %683 = vmatmul.mubr.msk.f32.gmra.mrb[12].mxu0 %vm306_vm1, %v291_v14 }
  0xe5   : > { %v412_v29 = vpop.f32.mrb[0].mxu0  ;;  %v447_v30 = vpop.f32.mrb[0].mxu1 }
  0xe6   : > { %v413_v32 = vadd.f32 %v848_v23, %v412_v29  ;;  %v666_v33 = vpop.f32.mrb[1].mxu0  ;;  %v448_v34 = vadd.f32 %v848_v23, %v447_v30  ;;  %v687_v35 = vpop.f32.mrb[1].mxu1 }
  0xe8   : > { %v516_v38 = vadd.f32 %v503_v25, %v413_v32  ;;  %v523_v39 = vadd.f32 %v510_v26, %v448_v34 }
  0xe9   : > { %v417_v43 = vpop.f32.mrb[2].mxu0  ;;  %v452_v44 = vpop.f32.mrb[2].mxu1 }
  0xea   : > { %v529_v46 = vmax.f32 %v516_v38, 0.0  ;;  %v536_v47 = vmax.f32 %v523_v39, 0.0  ;;  %v418_v48 = vadd.f32 %v848_v23, %v417_v43  ;;  %v669_v49 = vpop.f32.mrb[3].mxu0  ;;  %v453_v50 = vadd.f32 %v848_v23, %v452_v44  ;;  %v690_v51 = vpop.f32.mrb[3].mxu1 }
  0xeb   : > { %v508_v38 = vadd.f32 %v842_v21, %v488_v24 }
  0xec   : > { %542 = vst [vmem:[%s867_s17] sm:$0xff] %v529_v46  ;;  %549 = vst [vmem:[%s867_s17 + $0x38] sm:$0xff] %v536_v47  ;;  %v517_v54 = vadd.f32 %v504_v36, %v418_v48  ;;  %v524_v55 = vadd.f32 %v511_v40, %v453_v50 }
  0xed   : > { %v422_v59 = vpop.f32.mrb[4].mxu0  ;;  %v457_v60 = vpop.f32.mrb[4].mxu1 }
  0xee   : > { %v530_v62 = vmax.f32 %v517_v54, 0.0  ;;  %v537_v63 = vmax.f32 %v524_v55, 0.0  ;;  %v423_v0 = vadd.f32 %v848_v23, %v422_v59  ;;  %v672_v1 = vpop.f32.mrb[5].mxu0  ;;  %v458_v2 = vadd.f32 %v848_v23, %v457_v60  ;;  %v693_v3 = vpop.f32.mrb[5].mxu1 }
  0xf0   : > { %543 = vst [vmem:[%s867_s17 + $0x8] sm:$0xff] %v530_v62  ;;  %550 = vst [vmem:[%s867_s17 + $0x40] sm:$0xff] %v537_v63  ;;  %v518_v6 = vadd.f32 %v505_v52, %v423_v0  ;;  %v525_v7 = vadd.f32 %v512_v56, %v458_v2 }
  0xf1   : > { %v427_v11 = vpop.f32.mrb[6].mxu0  ;;  %v462_v12 = vpop.f32.mrb[6].mxu1 }
  0xf2   : > { %v531_v14 = vmax.f32 %v518_v6, 0.0  ;;  %v538_v15 = vmax.f32 %v525_v7, 0.0  ;;  %v428_v17 = vadd.f32 %v848_v23, %v427_v11  ;;  %v675_v18 = vpop.f32.mrb[7].mxu0  ;;  %v463_v19 = vadd.f32 %v848_v23, %v462_v12  ;;  %v696_v20 = vpop.f32.mrb[7].mxu1 }
  0xf4   : > { %544 = vst [vmem:[%s867_s17 + $0x10] sm:$0xff] %v531_v14  ;;  %551 = vst [vmem:[%s867_s17 + $0x48] sm:$0xff] %v538_v15  ;;  %v519_v25 = vadd.f32 %v506_v4, %v428_v17  ;;  %v526_v26 = vadd.f32 %v513_v8, %v463_v19 }
  0xf5   : > { %v432_v29 = vpop.f32.mrb[8].mxu0  ;;  %v467_v30 = vpop.f32.mrb[8].mxu1 }
  0xf6   : > { %v532_v32 = vmax.f32 %v519_v25, 0.0  ;;  %v539_v33 = vmax.f32 %v526_v26, 0.0  ;;  %v433_v34 = vadd.f32 %v848_v23, %v432_v29  ;;  %v678_v35 = vpop.f32.mrb[9].mxu0  ;;  %v468_v36 = vadd.f32 %v848_v23, %v467_v30  ;;  %v699_v37 = vpop.f32.mrb[9].mxu1 }
  0xf8   : > { %545 = vst [vmem:[%s867_s17 + $0x18] sm:$0xff] %v532_v32  ;;  %552 = vst [vmem:[%s867_s17 + $0x50] sm:$0xff] %v539_v33  ;;  %v520_v39 = vadd.f32 %v507_v22, %v433_v34  ;;  %v527_v40 = vadd.f32 %v514_v27, %v468_v36 }
  0xf9   : > { %v437_v43 = vpop.f32.mrb[10].mxu0  ;;  %v472_v44 = vpop.f32.mrb[10].mxu1 }
  0xfa   : > { %v533_v45 = vmax.f32 %v520_v39, 0.0  ;;  %v540_v46 = vmax.f32 %v527_v40, 0.0  ;;  %v438_v47 = vadd.f32 %v848_v23, %v437_v43  ;;  %v681_v48 = vpop.f32.mrb[11].mxu0  ;;  %v473_v49 = vadd.f32 %v848_v23, %v472_v44  ;;  %v702_v50 = vpop.f32.mrb[11].mxu1 }
  0xfc   : > { %546 = vst [vmem:[%s867_s17 + $0x20] sm:$0xff] %v533_v45  ;;  %553 = vst [vmem:[%s867_s17 + $0x58] sm:$0xff] %v540_v46  ;;  %v521_v51 = vadd.f32 %v508_v38, %v438_v47  ;;  %v528_v52 = vadd.f32 %v515_v41, %v473_v49 }
  0xfd   : > { %v442_v16 = vpop.f32.mrb[12].mxu0 }
  0xfe   : > { %v534_v54 = vmax.f32 %v521_v51, 0.0  ;;  %v541_v55 = vmax.f32 %v528_v52, 0.0  ;;  %v443_v56 = vadd.f32 %v848_v23, %v442_v16  ;;  %v684_v57 = vpop.f32.mrb[13].mxu0 }
 0x100   : > { %547 = vst [vmem:[%s867_s17 + $0x28] sm:$0xff] %v534_v54  ;;  %554 = vst [vmem:[%s867_s17 + $0x60] sm:$0xff] %v541_v55  ;;  %v522_v58 = vadd.f32 %v509_v53, %v443_v56 }
 0x102   : > { %v535_v59 = vmax.f32 %v522_v58, 0.0 }
 0x104   : > { %548 = vst [vmem:[%s867_s17 + $0x30] sm:$0xff] %v535_v59 }
 0x105 PF: > { %s16_s21 = sadd.s32 1, %s723_s21  }
 0x106   : > { %p13_p4 = scmp.ge.s32.totalorder %s16_s21, 4  }
 0x108   :  { %15 = sbr.rel (!%p13_p4) target bundleno = 1 (0x1), region = 77 }

// kernel: residual_block_forward.4
= control target key start
LH: loop header
LB: loop body
LE: loop exit
PB: predicated region body
PF: predicated region fallthrough
CT: control target
= control target key end

     0   :  { %s5046_s27 = smov 0   ;;  %s7110_s0 = inlined_call_operand.vmem [shape: f32[2,140,128], index: 0, kind: input, shape index: {}]   ;;  %s7111_s1 = inlined_call_operand.vmem [shape: f32[9,128,128], index: 1, kind: input, shape index: {}]   ;;  %s7112_s2 = inlined_call_operand.vmem [shape: f32[1,128], index: 2, kind: input, shape index: {}]   ;;  %s7113_s3 = inlined_call_operand.vmem [shape: f32[140,1], index: 3, kind: input, shape index: {}]   ;;  %s7114_s4 = inlined_call_operand.vmem [shape: f32[1,128], index: 4, kind: input, shape index: {}]   ;;  %s7115_s5 = inlined_call_operand.vmem [shape: f32[1,128], index: 5, kind: input, shape index: {}]   ;;  %s7116_s6 = inlined_call_operand.vmem [shape: f32[2,140,128], index: 6, kind: output, shape index: {0}]   ;;  %s7117_s7 = inlined_call_operand.vmem [shape: f32[2,8,128], index: 7, kind: output, shape index: {1}]   ;;  %s7118_s8 = inlined_call_operand.vmem [shape: f32[2,8,128], index: 8, kind: output, shape index: {2}]  }
   0x1 LB: > { %s3390_s28 = sadd.s32 4294967295, %s4995_s27   ;;  %p3394_p0 = scmp.ge.s32.totalorder %s4995_s27, 1  ;;  %s4995_s27 = sphi %s5046_s27, %s19_s27  }
   0x2   : > { %p267_p1 = scmp.lt.s32.totalorder %s4995_s27, 3 }
   0x4   : > { %p268_p2 = pnand %p3394_p0, %p267_p1 }
   0x5   : > { %v1593_v0 = vld [vmem:[%s7113_s3 + $0x24] sm:$0xff] (!%p268_p2)  ;;  %v1591_v1 = vld [vmem:[%s7113_s3 + $0x14] sm:$0xff] (!%p268_p2)  ;;  %v1594_v2 = vld [vmem:[%s7113_s3 + $0x2c] sm:$0xff] (!%p268_p2)  ;;  %v4997_v3 = vmov (!%p268_p2), 0   ;;  %v4998_v9 = vmov (!%p268_p2), 0.0|0.0   ;;  %v5000_v47 = vmov (!%p268_p2), 0.0  }
   0x6   : > { %271 = sbr.rel (%p268_p2) target bundleno = 617 (0x269), region = 44  ;;  %4984 = vset.pattern.permute.xlu1 (!%p268_p2), %v4997_v3  ;;  %4983 = vset.pattern.permute.xlu0 (!%p268_p2), %v4997_v3  ;;  %vm1632_vm0 = vcmp.gt.f32.partialorder (!%p268_p2), %v1593_v0, 0.5  ;;  %vm1630_vm1 = vcmp.gt.f32.partialorder (!%p268_p2), %v1591_v1, 0.5  ;;  %vm1633_vm2 = vcmp.gt.f32.partialorder (!%p268_p2), %v1594_v2, 0.5  ;;  %v1592_v4 = vld [vmem:[%s7113_s3 + $0x1c] sm:$0xff] (!%p268_p2)  ;;  %v1595_v7 = vld [vmem:[%s7113_s3 + $0x34] sm:$0xff] (!%p268_p2) }
   0x7   : > { %v1658_v5 = vsel (!%p268_p2), %vm1632_vm0, 1, %v4997_v3  ;;  %v1656_v6 = vsel (!%p268_p2), %vm1630_vm1, 1, %v4997_v3  ;;  %vm1631_vm3 = vcmp.gt.f32.partialorder (!%p268_p2), %v1592_v4, 0.5  ;;  %v526_v8 = vld [vmem:[%s7113_s3 + $0xa] sm:$0xff] (!%p268_p2)  ;;  %4645 = vmatprep.subr.bf16.mxu0 (!%p268_p2), %v4998_v9  ;;  %4549 = vmatprep.subr.bf16.mxu1 (!%p268_p2), %v4998_v9  ;;  %v1659_v10 = vsel (!%p268_p2), %vm1633_vm2, 1, %v4997_v3  ;;  %v1596_v12 = vld [vmem:[%s7113_s3 + $0x3c] sm:$0xff] (!%p268_p2) }
   0x8   : > { %1676 = vperm.xlu1 (!%p268_p2), %4984, %v1658_v5   ;;  %1670 = vperm.xlu0 (!%p268_p2), %4983, %v1656_v6   ;;  %v1657_v11 = vsel (!%p268_p2), %vm1631_vm3, 1, %v4997_v3  ;;  %vm1634_vm4 = vcmp.gt.f32.partialorder (!%p268_p2), %v1595_v7, 0.5  ;;  %vm565_vm5 = vcmp.gt.f32.partialorder (!%p268_p2), %v526_v8, 0.5  ;;  %v527_v13 = vld [vmem:[%s7113_s3 + $0x12] sm:$0xff] (!%p268_p2)  ;;  %vm1635_vm6 = vcmp.gt.f32.partialorder (!%p268_p2), %v1596_v12, 0.5  ;;  %v1597_v16 = vld [vmem:[%s7113_s3 + $0x44] sm:$0xff] (!%p268_p2) }
   0x9   : > { %v1660_v14 = vsel (!%p268_p2), %vm1634_vm4, 1, %v4997_v3  ;;  %v591_v15 = vsel (!%p268_p2), %vm565_vm5, 1, %v4997_v3  ;;  %vm566_vm7 = vcmp.gt.f32.partialorder (!%p268_p2), %v527_v13, 0.5  ;;  %v528_v17 = vld [vmem:[%s7113_s3 + $0x1a] sm:$0xff] (!%p268_p2)  ;;  %v1661_v18 = vsel (!%p268_p2), %vm1635_vm6, 1, %v4997_v3  ;;  %v1598_v20 = vld [vmem:[%s7113_s3 + $0x4c] sm:$0xff] (!%p268_p2) }
   0xa   : > { %v592_v19 = vsel (!%p268_p2), %vm566_vm7, 1, %v4997_v3  ;;  %vm1636_vm8 = vcmp.gt.f32.partialorder (!%p268_p2), %v1597_v16, 0.5  ;;  %vm567_vm9 = vcmp.gt.f32.partialorder (!%p268_p2), %v528_v17, 0.5  ;;  %v529_v21 = vld [vmem:[%s7113_s3 + $0x22] sm:$0xff] (!%p268_p2)  ;;  %vm1637_vm10 = vcmp.gt.f32.partialorder (!%p268_p2), %v1598_v20, 0.5  ;;  %v1599_v24 = vld [vmem:[%s7113_s3 + $0x54] sm:$0xff] (!%p268_p2) }
   0xb   : > { %v1662_v22 = vsel (!%p268_p2), %vm1636_vm8, 1, %v4997_v3  ;;  %v593_v23 = vsel (!%p268_p2), %vm567_vm9, 1, %v4997_v3  ;;  %vm568_vm11 = vcmp.gt.f32.partialorder (!%p268_p2), %v529_v21, 0.5  ;;  %v530_v25 = vld [vmem:[%s7113_s3 + $0x2a] sm:$0xff] (!%p268_p2)  ;;  %v1663_v26 = vsel (!%p268_p2), %vm1637_vm10, 1, %v4997_v3  ;;  %v1600_v28 = vld [vmem:[%s7113_s3 + $0x5c] sm:$0xff] (!%p268_p2) }
   0xc   : > { %1679 = vperm.xlu1 (!%p268_p2), %4984, %v1659_v10   ;;  %1673 = vperm.xlu0 (!%p268_p2), %4983, %v1657_v11   ;;  %v594_v27 = vsel (!%p268_p2), %vm568_vm11, 1, %v4997_v3  ;;  %vm1638_vm12 = vcmp.gt.f32.partialorder (!%p268_p2), %v1599_v24, 0.5  ;;  %vm569_vm13 = vcmp.gt.f32.partialorder (!%p268_p2), %v530_v25, 0.5  ;;  %v531_v29 = vld [vmem:[%s7113_s3 + $0x32] sm:$0xff] (!%p268_p2)  ;;  %v3501_v30 = vld [vmem:[%s7111_s1 + $0x200] sm:$0xff] (!%p268_p2)  ;;  %v3502_v33 = vld [vmem:[%s7111_s1 + $0x208] sm:$0xff] (!%p268_p2) }
   0xd   : > { %v1664_v31 = vsel %vm1638_vm12, 1, %v4997_v3  ;;  %v595_v32 = vsel %vm569_vm13, 1, %v4997_v3  ;;  %vm1639_vm14 = vcmp.gt.f32.partialorder %v1600_v28, 0.5  ;;  %vm570_vm15 = vcmp.gt.f32.partialorder %v531_v29, 0.5  ;;  %v3503_v35 = vld [vmem:[%s7111_s1 + $0x210] sm:$0xff]  ;;  %v3504_v36 = vld [vmem:[%s7111_s1 + $0x218] sm:$0xff] }
   0xe   : > { %v4646_v34 = vpack.c.bf16 %v3502_v33, %v3501_v30  ;;  %v1601_v37 = vld [vmem:[%s7113_s3 + $0x64] sm:$0xff]  ;;  %v532_v38 = vld [vmem:[%s7113_s3 + $0x3a] sm:$0xff]  ;;  %v1665_v41 = vsel %vm1639_vm14, 1, %v4997_v3  ;;  %v596_v42 = vsel %vm570_vm15, 1, %v4997_v3  ;;  %v4649_v43 = vpack.c.bf16 %v3504_v36, %v3503_v35  ;;  %v3403_v45 = vld [vmem:[%s7111_s1 + $0x90] sm:$0xff]  ;;  %p309_p3 = scmp.lt.s32.totalorder %s3390_s28, 1 }
   0xf   : > { %v3401_v39 = vld [vmem:[%s7111_s1 + $0x80] sm:$0xff]  ;;  %v3402_v40 = vld [vmem:[%s7111_s1 + $0x88] sm:$0xff]  ;;  %v3404_v46 = vld [vmem:[%s7111_s1 + $0x98] sm:$0xff]  ;;  %vm4999_vm0 = vmmov 0   ;;  %vm1640_vm1 = vcmp.gt.f32.partialorder %v1601_v37, 0.5  ;;  %vm571_vm2 = vcmp.gt.f32.partialorder %v532_v38, 0.5 }
  0x10   : > { %1682 = vperm.xlu1 %4984, %v1660_v14   ;;  %605 = vperm.xlu0 %4983, %v591_v15   ;;  %v4550_v44 = vpack.c.bf16 %v3402_v40, %v3401_v39  ;;  %v3505_v48 = vld [vmem:[%s7111_s1 + $0x220] sm:$0xff]  ;;  %v3506_v49 = vld [vmem:[%s7111_s1 + $0x228] sm:$0xff]  ;;  %v4553_v52 = vpack.c.bf16 %v3404_v46, %v3403_v45  ;;  %v1666_v55 = vsel %vm1640_vm1, 1, %v4997_v3  ;;  %v597_v56 = vsel %vm571_vm2, 1, %v4997_v3  ;;  %v3507_v58 = vld [vmem:[%s7111_s1 + $0x230] sm:$0xff]  ;;  %s7129_s28 = smov (!%p309_p3, %s3390_s28), 1 }
  0x11   : > { %4647 = vmatpush3.bf16.msra.mxu0 %v4646_v34  ;;  %4226 = vmatprep.mubr.msk.f32.mxu0 %vm4999_vm0, %v5000_v47  ;;  %v1602_v50 = vld [vmem:[%s7113_s3 + $0x6c] sm:$0xff]  ;;  %v533_v51 = vld [vmem:[%s7113_s3 + $0x42] sm:$0xff]  ;;  %v4652_v57 = vpack.c.bf16 %v3506_v49, %v3505_v48  ;;  %v3508_v59 = vld [vmem:[%s7111_s1 + $0x238] sm:$0xff]  ;;  %s4970_s19 = smul.u32 144, %s7129_s28  ;;  %s3397_s14 = sshll.u32 %s7129_s28, 3 }
  0x12   : > { %4648 = vmatprep.subr.bf16.mxu0 %v4998_v9  ;;  %3942 = vmatprep.mubr.msk.f32.mxu1 %vm4999_vm0, %v5000_v47  ;;  %v3405_v53 = vld [vmem:[%s7111_s1 + $0xa0] sm:$0xff]  ;;  %v3406_v54 = vld [vmem:[%s7111_s1 + $0xa8] sm:$0xff]  ;;  %vm1641_vm3 = vcmp.gt.f32.partialorder %v1602_v50, 0.5  ;;  %vm572_vm4 = vcmp.gt.f32.partialorder %v533_v51, 0.5  ;;  %v1603_v60 = vld [vmem:[%s7113_s3 + $0x74] sm:$0xff]  ;;  %v4655_v4 = vpack.c.bf16 %v3508_v59, %v3507_v58  ;;  %s322_s17 = scalar_lea.vmem %s7117_s7, %s3397_s14  ;;  %s326_s21 = scalar_lea.vmem %s7118_s8, %s3397_s14 }
  0x13   : > { %4551 = vmatpush3.bf16.msra.mxu1 %v4550_v44  ;;  %v534_v61 = vld [vmem:[%s7113_s3 + $0x4a] sm:$0xff]  ;;  %v4556_v62 = vpack.c.bf16 %v3406_v54, %v3405_v53  ;;  %v3408_v0 = vld [vmem:[%s7111_s1 + $0xb8] sm:$0xff]  ;;  %v1667_v1 = vsel %vm1641_vm3, 1, %v4997_v3  ;;  %v598_v2 = vsel %vm572_vm4, 1, %v4997_v3  ;;  %vm1642_vm5 = vcmp.gt.f32.partialorder %v1603_v60, 0.5  ;;  %v3509_v5 = vld [vmem:[%s7111_s1 + $0x240] sm:$0xff]  ;;  %s5444_s24 = scalar_lea.vmem %s7110_s0, %s4970_s19  ;;  %s6969_s12 = scalar_lea.vmem %s7116_s6, %s4970_s19 }
  0x14   : > { %1685 = vperm.xlu1 %4984, %v1661_v18   ;;  %608 = vperm.xlu0 %4983, %v592_v19   ;;  %v3407_v63 = vld [vmem:[%s7111_s1 + $0xb0] sm:$0xff]  ;;  %vm573_vm6 = vcmp.gt.f32.partialorder %v534_v61, 0.5  ;;  %v3510_v6 = vld [vmem:[%s7111_s1 + $0x248] sm:$0xff]  ;;  %v3409_v11 = vld [vmem:[%s7111_s1 + $0xc0] sm:$0xff]  ;;  %v1668_v13 = vsel %vm1642_vm5, 1, %v4997_v3  ;;  %3255 = vst [vmem:[%s6969_s12] sm:$0xff] %v5000_v47 }
  0x15   : > { %4650 = vmatpush3.bf16.msra.mxu0 %v4649_v43  ;;  %4552 = vmatprep.subr.bf16.mxu1 %v4998_v9  ;;  %v1907_v7 = vld [vmem:[%s7113_s3 + $0x15] sm:$0xff]  ;;  %v4559_v10 = vpack.c.bf16 %v3408_v0, %v3407_v63  ;;  %v3410_v12 = vld [vmem:[%s7111_s1 + $0xc8] sm:$0xff]  ;;  %v599_v14 = vsel %vm573_vm6, 1, %v4997_v3  ;;  %v4658_v15 = vpack.c.bf16 %v3510_v6, %v3509_v5  ;;  %v1908_v18 = vld [vmem:[%s7113_s3 + $0x1d] sm:$0xff]  ;;  %3256 = vst [vmem:[%s6969_s12 + $0x8] sm:$0xff] %v5000_v47 }
  0x16   : > { %4651 = vmatprep.subr.bf16.mxu0 %v4998_v9  ;;  %v535_v8 = vld [vmem:[%s7113_s3 + $0x52] sm:$0xff]  ;;  %vm1946_vm7 = vcmp.gt.f32.partialorder %v1907_v7, 0.5  ;;  %v536_v19 = vld [vmem:[%s7113_s3 + $0x5a] sm:$0xff]  ;;  %v4562_v20 = vpack.c.bf16 %v3410_v12, %v3409_v11  ;;  %vm1947_vm9 = vcmp.gt.f32.partialorder %v1908_v18, 0.5  ;;  %v1909_v28 = vld [vmem:[%s7113_s3 + $0x25] sm:$0xff]  ;;  %3271 = vst [vmem:[%s6969_s12 + $0x7c] sm:$0xff] %v5000_v47 }
  0x17   : > { %4554 = vmatpush3.bf16.msra.mxu1 %v4553_v52  ;;  %vm574_vm8 = vcmp.gt.f32.partialorder %v535_v8, 0.5  ;;  %v3511_v16 = vld [vmem:[%s7111_s1 + $0x250] sm:$0xff]  ;;  %v3512_v17 = vld [vmem:[%s7111_s1 + $0x258] sm:$0xff]  ;;  %vm575_vm10 = vcmp.gt.f32.partialorder %v536_v19, 0.5  ;;  %v537_v29 = vld [vmem:[%s7113_s3 + $0x62] sm:$0xff]  ;;  %v5264_v33 = vsel %vm1947_vm9, 1, %v4997_v3 }
  0x18   : > { %1688 = vperm.xlu1 %4984, %v1662_v22   ;;  %611 = vperm.xlu0 %4983, %v593_v23   ;;  %v3411_v21 = vld [vmem:[%s7111_s1 + $0xd0] sm:$0xff]  ;;  %v3412_v22 = vld [vmem:[%s7111_s1 + $0xd8] sm:$0xff]  ;;  %v1972_v23 = vsel %vm1946_vm7, 1, %v4997_v3  ;;  %v600_v24 = vsel %vm574_vm8, 1, %v4997_v3  ;;  %v4661_v25 = vpack.c.bf16 %v3512_v17, %v3511_v16  ;;  %v601_v34 = vsel %vm575_vm10, 1, %v4997_v3  ;;  %v343_v61 = vld [vmem:[%s7113_s3 + $0x21] sm:$0xff] }
  0x19   : > { %4653 = vmatpush3.bf16.msra.mxu0 %v4652_v57  ;;  %4555 = vmatprep.subr.bf16.mxu1 %v4998_v9  ;;  %v4565_v30 = vpack.c.bf16 %v3412_v22, %v3411_v21  ;;  %vm1948_vm11 = vcmp.gt.f32.partialorder %v1909_v28, 0.5  ;;  %vm576_vm12 = vcmp.gt.f32.partialorder %v537_v29, 0.5  ;;  %v3515_v36 = vld [vmem:[%s7111_s1 + $0x270] sm:$0xff]  ;;  %v3516_v37 = vld [vmem:[%s7111_s1 + $0x278] sm:$0xff]  ;;  %vm396_vm7 = vcmp.gt.f32.partialorder %v343_v61, 0.5  ;;  %3272 = vst [vmem:[%s6969_s12 + $0x84] sm:$0xff] %v5000_v47 }
  0x1a   : > { %4654 = vmatprep.subr.bf16.mxu0 %v4998_v9  ;;  %v1910_v38 = vld [vmem:[%s7113_s3 + $0x2d] sm:$0xff]  ;;  %v5289_v43 = vsel %vm1948_vm11, 1, %v4997_v3  ;;  %v602_v44 = vsel %vm576_vm12, 1, %v4997_v3  ;;  %v4667_v45 = vpack.c.bf16 %v3516_v37, %v3515_v36  ;;  %v1911_v46 = vld [vmem:[%s7113_s3 + $0x35] sm:$0xff]  ;;  %v1912_v52 = vld [vmem:[%s7113_s3 + $0x3d] sm:$0xff] }
  0x1b   : > { %4557 = vmatpush3.bf16.msra.mxu1 %v4556_v62  ;;  %v538_v39 = vld [vmem:[%s7113_s3 + $0x6a] sm:$0xff]  ;;  %vm1949_vm13 = vcmp.gt.f32.partialorder %v1910_v38, 0.5  ;;  %vm1950_vm15 = vcmp.gt.f32.partialorder %v1911_v46, 0.5  ;;  %vm1951_vm2 = vcmp.gt.f32.partialorder %v1912_v52, 0.5  ;;  %v342_v57 = vld [vmem:[%s7113_s3 + $0x19] sm:$0xff] }
  0x1c   : > { %1691 = vperm.xlu1 %4984, %v1663_v26   ;;  %614 = vperm.xlu0 %4983, %v594_v27   ;;  %v3513_v26 = vld [vmem:[%s7111_s1 + $0x260] sm:$0xff]  ;;  %v3514_v27 = vld [vmem:[%s7111_s1 + $0x268] sm:$0xff]  ;;  %vm577_vm14 = vcmp.gt.f32.partialorder %v538_v39, 0.5  ;;  %v5302_v50 = vsel %vm1949_vm13, 1, %v4997_v3  ;;  %v341_v53 = vld [vmem:[%s7113_s3 + $0x11] sm:$0xff]  ;;  %v5315_v54 = vsel %vm1950_vm15, 1, %v4997_v3 }
  0x1d   : > { %4656 = vmatpush3.bf16.msra.mxu0 %v4655_v4  ;;  %4558 = vmatprep.subr.bf16.mxu1 %v4998_v9  ;;  %v4664_v35 = vpack.c.bf16 %v3514_v27, %v3513_v26  ;;  %v340_v48 = vld [vmem:[%s7113_s3 + $0x9] sm:$0xff]  ;;  %v603_v51 = vsel %vm577_vm14, 1, %v4997_v3  ;;  %vm394_vm3 = vcmp.gt.f32.partialorder %v341_v53, 0.5  ;;  %v5327_v58 = vsel %vm1951_vm2, 1, %v4997_v3  ;;  %v1915_v0 = vld [vmem:[%s7113_s3 + $0x55] sm:$0xff]  ;;  %v1916_v5 = vld [vmem:[%s7113_s3 + $0x5d] sm:$0xff] }
  0x1e   : > { %4657 = vmatprep.subr.bf16.mxu0 %v4998_v9  ;;  %vm393_vm1 = vcmp.gt.f32.partialorder %v340_v48, 0.5  ;;  %v420_v59 = vsel %vm394_vm3, 1, %v4997_v3  ;;  %vm395_vm5 = vcmp.gt.f32.partialorder %v342_v57, 0.5  ;;  %v1914_v60 = vld [vmem:[%s7113_s3 + $0x4d] sm:$0xff]  ;;  %v422_v4 = vsel %vm396_vm7, 1, %v4997_v3  ;;  %v346_v11 = vld [vmem:[%s7113_s3 + $0x39] sm:$0xff] }
  0x1f   : > { %4560 = vmatpush3.bf16.msra.mxu1 %v4559_v10  ;;  %v421_v63 = vsel %vm395_vm5, 1, %v4997_v3  ;;  %vm1953_vm6 = vcmp.gt.f32.partialorder %v1914_v60, 0.5  ;;  %vm1954_vm8 = vcmp.gt.f32.partialorder %v1915_v0, 0.5  ;;  %v345_v6 = vld [vmem:[%s7113_s3 + $0x31] sm:$0xff]  ;;  %vm1955_vm10 = vcmp.gt.f32.partialorder %v1916_v5, 0.5  ;;  %v1917_v10 = vld [vmem:[%s7113_s3 + $0x65] sm:$0xff] }
  0x20   : > { %1694 = vperm.xlu1 %4984, %v1664_v31   ;;  %617 = vperm.xlu0 %4983, %v595_v32   ;;  %v3413_v31 = vld [vmem:[%s7111_s1 + $0xe0] sm:$0xff]  ;;  %v3414_v32 = vld [vmem:[%s7111_s1 + $0xe8] sm:$0xff]  ;;  %v5360_v7 = vsel %vm1954_vm8, 1, %v4997_v3  ;;  %vm398_vm11 = vcmp.gt.f32.partialorder %v345_v6, 0.5  ;;  %v5371_v12 = vsel %vm1955_vm10, 1, %v4997_v3  ;;  %vm1956_vm12 = vcmp.gt.f32.partialorder %v1917_v10, 0.5 }
  0x21   : > { %4659 = vmatpush3.bf16.msra.mxu0 %v4658_v15  ;;  %4561 = vmatprep.subr.bf16.mxu1 %v4998_v9  ;;  %v4568_v40 = vpack.c.bf16 %v3414_v32, %v3413_v31  ;;  %vm399_vm13 = vcmp.gt.f32.partialorder %v346_v11, 0.5  ;;  %v347_v15 = vld [vmem:[%s7113_s3 + $0x41] sm:$0xff]  ;;  %v5382_v16 = vsel %vm1956_vm12, 1, %v4997_v3  ;;  %v1919_v18 = vld [vmem:[%s7113_s3 + $0x75] sm:$0xff]  ;;  %v348_v19 = vld [vmem:[%s7113_s3 + $0x49] sm:$0xff] }
  0x22   : > { %4660 = vmatprep.subr.bf16.mxu0 %v4998_v9  ;;  %v425_v17 = vsel %vm399_vm13, 1, %v4997_v3  ;;  %vm400_vm15 = vcmp.gt.f32.partialorder %v347_v15, 0.5  ;;  %vm401_vm2 = vcmp.gt.f32.partialorder %v348_v19, 0.5  ;;  %v349_v22 = vld [vmem:[%s7113_s3 + $0x51] sm:$0xff]  ;;  %v351_v27 = vld [vmem:[%s7113_s3 + $0x61] sm:$0xff]  ;;  %v352_v29 = vld [vmem:[%s7113_s3 + $0x69] sm:$0xff] }
  0x23   : > { %4563 = vmatpush3.bf16.msra.mxu1 %v4562_v20  ;;  %v426_v21 = vsel %vm400_vm15, 1, %v4997_v3  ;;  %vm402_vm3 = vcmp.gt.f32.partialorder %v349_v22, 0.5  ;;  %vm404_vm5 = vcmp.gt.f32.partialorder %v351_v27, 0.5  ;;  %v959_v31 = vld [vmem:[%s7113_s3 + $0xb] sm:$0xff]  ;;  %v5453_v37 = vld [vmem:[%s7114_s4] ss:$0 sm:$0xff] }
  0x24   : > { %1697 = vperm.xlu1 %4984, %v1665_v41   ;;  %620 = vperm.xlu0 %4983, %v596_v42   ;;  %v3415_v41 = vld [vmem:[%s7111_s1 + $0xf0] sm:$0xff]  ;;  %v3416_v42 = vld [vmem:[%s7111_s1 + $0xf8] sm:$0xff]  ;;  %v428_v26 = vsel %vm402_vm3, 1, %v4997_v3  ;;  %vm998_vm7 = vcmp.gt.f32.partialorder %v959_v31, 0.5  ;;  %v962_v39 = vld [vmem:[%s7113_s3 + $0x23] sm:$0xff] }
  0x25   : > { %4662 = vmatpush3.bf16.msra.mxu0 %v4661_v25  ;;  %4564 = vmatprep.subr.bf16.mxu1 %v4998_v9  ;;  %v4571_v49 = vpack.c.bf16 %v3416_v42, %v3415_v41  ;;  %v350_v25 = vld [vmem:[%s7113_s3 + $0x59] sm:$0xff]  ;;  %vm1001_vm10 = vcmp.gt.f32.partialorder %v962_v39, 0.5  ;;  %v963_v42 = vld [vmem:[%s7113_s3 + $0x2b] sm:$0xff]  ;;  %v966_v10 = vld [vmem:[%s7113_s3 + $0x43] sm:$0xff]  ;;  %3257 = vst [vmem:[%s6969_s12 + $0x10] sm:$0xf] %v5000_v47 }
  0x26   : > { %4663 = vmatprep.subr.bf16.mxu0 %v4998_v9  ;;  %v1578_v38 = vld [vmem:[%s5444_s24 + $0x14] sm:$0xff]  ;;  %v3530_v52 = vld [vmem:[%s7111_s1 + $0x280] sm:$0xff]  ;;  %v3531_v53 = vld [vmem:[%s7111_s1 + $0x288] sm:$0xff] }
  0x27   : > { %4566 = vmatpush3.bf16.msra.mxu1 %v4565_v30  ;;  %v430_v30 = vsel %vm404_vm5, 1, %v4997_v3  ;;  %v1604_v41 = vmul.f32 %v5453_v37, %v1578_v38  ;;  %v964_v48 = vld [vmem:[%s7113_s3 + $0x33] sm:$0xff]  ;;  %v965_v57 = vld [vmem:[%s7113_s3 + $0x3b] sm:$0xff]  ;;  %v4670_v61 = vpack.c.bf16 %v3531_v53, %v3530_v52  ;;  %v517_v52 = vld [vmem:[%s5444_s24 + $0x2a] sm:$0xff] }
  0x28   : > { %1700 = vperm.xlu1 %4984, %v1666_v55   ;;  %623 = vperm.xlu0 %4983, %v597_v56   ;;  %v419_v55 = vsel %vm393_vm1, 1, %v4997_v3  ;;  %v1913_v56 = vld [vmem:[%s7113_s3 + $0x45] sm:$0xff]  ;;  %vm1958_vm1 = vcmp.gt.f32.partialorder %v1919_v18, 0.5  ;;  %vm1003_vm12 = vcmp.gt.f32.partialorder %v964_v48, 0.5  ;;  %v514_v60 = vld [vmem:[%s5444_s24 + $0x12] sm:$0xff] }
  0x29   : > { %4665 = vmatpush3.bf16.msra.mxu0 %v4664_v35  ;;  %4567 = vmatprep.subr.bf16.mxu1 %v4998_v9  ;;  %vm1952_vm4 = vcmp.gt.f32.partialorder %v1913_v56, 0.5  ;;  %v961_v35 = vld [vmem:[%s7113_s3 + $0x1b] sm:$0xff]  ;;  %v540_v5 = vmul.f32 %v5453_v37, %v514_v60  ;;  %v968_v48 = vld [vmem:[%s7113_s3 + $0x53] sm:$0xff] }
  0x2a   : > { %4666 = vmatprep.subr.bf16.mxu0 %v4998_v9  ;;  %v5338_v62 = vsel %vm1952_vm4, 1, %v4997_v3  ;;  %vm403_vm4 = vcmp.gt.f32.partialorder %v350_v25, 0.5  ;;  %v3534_v19 = vld [vmem:[%s7111_s1 + $0x2a0] sm:$0xff]  ;;  %v3537_v60 = vld [vmem:[%s7111_s1 + $0x2b8] sm:$0xff] }
  0x2b   : > { %4569 = vmatpush3.bf16.msra.mxu1 %v4568_v40  ;;  %v429_v28 = vsel %vm403_vm4, 1, %v4997_v3 }
  0x2c   : > { %1703 = vperm.xlu1 %4984, %v1667_v1   ;;  %626 = vperm.xlu0 %4983, %v598_v2   ;;  %v344_v1 = vld [vmem:[%s7113_s3 + $0x29] sm:$0xff]  ;;  %v5349_v2 = vsel %vm1953_vm6, 1, %v4997_v3  ;;  %vm405_vm6 = vcmp.gt.f32.partialorder %v352_v29, 0.5 }
  0x2d   : > { %4668 = vmatpush3.bf16.msra.mxu0 %v4667_v45  ;;  %4570 = vmatprep.subr.bf16.mxu1 %v4998_v9  ;;  %vm397_vm9 = vcmp.gt.f32.partialorder %v344_v1, 0.5  ;;  %v431_v32 = vsel %vm405_vm6, 1, %v4997_v3  ;;  %v5477_v45 = vsel %vm1001_vm10, 1, %v4997_v3  ;;  %v3532_v1 = vld [vmem:[%s7111_s1 + $0x290] sm:$0xff] }
  0x2e   : > { %4669 = vmatprep.subr.bf16.mxu0 %v4998_v9  ;;  %v423_v8 = vsel %vm397_vm9, 1, %v4997_v3  ;;  %vm1000_vm9 = vcmp.gt.f32.partialorder %v961_v35, 0.5 }
  0x2f   : > { %4572 = vmatpush3.bf16.msra.mxu1 %v4571_v49  ;;  %v5462_v40 = vsel %vm1000_vm9, 1, %v4997_v3 }
  0x30   : > { %1706 = vperm.xlu1 %4984, %v1668_v13   ;;  %629 = vperm.xlu0 %4983, %v599_v14   ;;  %v424_v13 = vsel %vm398_vm11, 1, %v4997_v3  ;;  %v1918_v14 = vld [vmem:[%s7113_s3 + $0x6d] sm:$0xff]  ;;  %vm1002_vm11 = vcmp.gt.f32.partialorder %v963_v42, 0.5 }
  0x31   : > { %4573 = vmatprep.subr.bf16.mxu1 %v4998_v9  ;;  %vm1957_vm14 = vcmp.gt.f32.partialorder %v1918_v14, 0.5  ;;  %v1582_v14 = vld [vmem:[%s5444_s24 + $0x34] sm:$0xff] }
  0x32   : > { %v5393_v20 = vsel %vm1957_vm14, 1, %v4997_v3  ;;  %vm1004_vm14 = vcmp.gt.f32.partialorder %v965_v57, 0.5  ;;  %v1608_v31 = vmul.f32 %v5453_v37, %v1582_v14  ;;  %v1585_v14 = vld [vmem:[%s5444_s24 + $0x4c] sm:$0xff] }
  0x33   : > { %v5542_v18 = vsel %vm1004_vm14, 1, %v4997_v3 }
  0x34   : > { %1986 = vperm.xlu1 %4984, %v1972_v23   ;;  %632 = vperm.xlu0 %4983, %v600_v24   ;;  %v5401_v23 = vsel %vm1958_vm1, 1, %v4997_v3  ;;  %v427_v24 = vsel %vm401_vm2, 1, %v4997_v3  ;;  %vm1005_vm1 = vcmp.gt.f32.partialorder %v966_v10, 0.5 }
  0x35   : > { %v5580_v38 = vsel %vm1005_vm1, 1, %v4997_v3 }
  0x38   : > { %1989 = vperm.xlu1 %4984, %v5264_v33   ;;  %635 = vperm.xlu0 %4983, %v601_v34   ;;  %v1024_v34 = vsel %vm998_vm7, 1, %v4997_v3  ;;  %vm1007_vm7 = vcmp.gt.f32.partialorder %v968_v48, 0.5  ;;  %v501_v48 = vld [vmem:[%s7111_s1 + $0x20] sm:$0xff] }
  0x3c   : > { %1992 = vperm.xlu1 %4984, %v5289_v43   ;;  %638 = vperm.xlu0 %4983, %v602_v44   ;;  %v1579_v44 = vld [vmem:[%s5444_s24 + $0x1c] sm:$0xff] }
  0x3d   : > { %v1605_v49 = vmul.f32 %v5453_v37, %v1579_v44 }
  0x40   : > { %1995 = vperm.xlu1 %4984, %v5302_v50   ;;  %641 = vperm.xlu0 %4983, %v603_v51   ;;  %v1580_v51 = vld [vmem:[%s5444_s24 + $0x24] sm:$0xff] }
  0x44   : > { %1998 = vperm.xlu1 %4984, %v5315_v54   ;;  %433 = vperm.xlu0 %4983, %v419_v55  }
  0x48   : > { %2001 = vperm.xlu1 %4984, %v5327_v58   ;;  %436 = vperm.xlu0 %4983, %v420_v59   ;;  %v1606_v59 = vmul.f32 %v5453_v37, %v1580_v51 }
  0x4c   : > { %2004 = vperm.xlu1 %4984, %v5338_v62   ;;  %439 = vperm.xlu0 %4983, %v421_v63  }
  0x50   : > { %2007 = vperm.xlu1 %4984, %v5349_v2   ;;  %442 = vperm.xlu0 %4983, %v422_v4   ;;  %v5520_v4 = vsel %vm1003_vm12, 1, %v4997_v3 }
  0x54   : > { %2010 = vperm.xlu1 %4984, %v5360_v7   ;;  %445 = vperm.xlu0 %4983, %v423_v8  }
  0x58   : > { %2013 = vperm.xlu1 %4984, %v5371_v12   ;;  %448 = vperm.xlu0 %4983, %v424_v13  }
  0x5c   : > { %2016 = vperm.xlu1 %4984, %v5382_v16   ;;  %451 = vperm.xlu0 %4983, %v425_v17  }
  0x60   : > { %2019 = vperm.xlu1 %4984, %v5393_v20   ;;  %454 = vperm.xlu0 %4983, %v426_v21   ;;  %v3535_v21 = vld [vmem:[%s7111_s1 + $0x2a8] sm:$0xff] }
  0x61   : > { %v4676_v39 = vpack.c.bf16 %v3535_v21, %v3534_v19 }
  0x64   : > { %2022 = vperm.xlu1 %4984, %v5401_v23   ;;  %457 = vperm.xlu0 %4983, %v427_v24   ;;  %v2235_v24 = vld [vmem:[%s7113_s3 + $0x7d] sm:$0xff] }
  0x65   : > { %vm2274_vm3 = vcmp.gt.f32.partialorder %v2235_v24, 0.5 }
  0x66   : > { %v2300_v53 = vsel %vm2274_vm3, 1, %v4997_v3 }
  0x68   : > { %2302 = vperm.xlu1 %4984, %v5264_v33   ;;  %460 = vperm.xlu0 %4983, %v428_v26   ;;  %v960_v33 = vld [vmem:[%s7113_s3 + $0x13] sm:$0xff]  ;;  %v497_v26 = vld [vmem:[%s7111_s1] sm:$0xff] }
  0x69   : > { %vm999_vm8 = vcmp.gt.f32.partialorder %v960_v33, 0.5  ;;  %v1583_v33 = vld [vmem:[%s5444_s24 + $0x3c] sm:$0xff] }
  0x6a   : > { %v5448_v36 = vsel %vm999_vm8, 1, %v4997_v3  ;;  %v1609_v51 = vmul.f32 %v5453_v37, %v1583_v33  ;;  %v519_v33 = vld [vmem:[%s5444_s24 + $0x3a] sm:$0xff] }
  0x6c   : > { %2305 = vperm.xlu1 %4984, %v5289_v43   ;;  %463 = vperm.xlu0 %4983, %v429_v28   ;;  %v5471_v43 = vld [vmem:[%s7115_s5] ss:$0 sm:$0xff] }
  0x6d   : > { %v1617_v46 = vadd.f32 %v5471_v43, %v1604_v41  ;;  %v1618_v56 = vadd.f32 %v5471_v43, %v1605_v49  ;;  %v1619_v8 = vadd.f32 %v5471_v43, %v1606_v59  ;;  %v553_v22 = vadd.f32 %v5471_v43, %v540_v5  ;;  %v3536_v59 = vld [vmem:[%s7111_s1 + $0x2b0] sm:$0xff]  ;;  %v500_v5 = vld [vmem:[%s7111_s1 + $0x18] sm:$0xff] }
  0x6e   : > { %v1621_v49 = vadd.f32 %v5471_v43, %v1608_v31  ;;  %v1611_v31 = vmul.f32 %v5453_v37, %v1585_v14 }
  0x6f   : > { %v1643_v55 = vmax.f32 %v1617_v46, 0.0  ;;  %v1644_v6 = vmax.f32 %v1618_v56, 0.0  ;;  %v1645_v28 = vmax.f32 %v1619_v8, 0.0  ;;  %v579_v42 = vmax.f32 %v553_v22, 0.0  ;;  %v2539_v46 = vld [vmem:[%s7113_s3 + $0x1e] sm:$0xff] }
  0x70   : > { %2308 = vperm.xlu1 %4984, %v5302_v50   ;;  %466 = vperm.xlu0 %4983, %v430_v30   ;;  %v513_v50 = vld [vmem:[%s5444_s24 + $0xa] sm:$0xff]  ;;  %vm2578_vm6 = vcmp.gt.f32.partialorder %v2539_v46, 0.5  ;;  %v1622_v8 = vadd.f32 %v5471_v43, %v1609_v51  ;;  %v4679_v22 = vpack.c.bf16 %v3537_v60, %v3536_v59  ;;  %v2542_v51 = vld [vmem:[%s7113_s3 + $0x36] sm:$0xff]  ;;  %v520_v60 = vld [vmem:[%s5444_s24 + $0x42] sm:$0xff] }
  0x71   : > { %v967_v30 = vld [vmem:[%s7113_s3 + $0x4b] sm:$0xff] }
  0x72   : > { %vm1006_vm5 = vcmp.gt.f32.partialorder %v967_v30, 0.5  ;;  %v3539_v46 = vld [vmem:[%s7111_s1 + $0x2c8] sm:$0xff] }
  0x74   : > { %2311 = vperm.xlu1 %4984, %v5315_v54   ;;  %469 = vperm.xlu0 %4983, %v431_v32   ;;  %v5495_v54 = vsel %vm1002_vm11, 1, %v4997_v3  ;;  %v516_v32 = vld [vmem:[%s5444_s24 + $0x22] sm:$0xff] }
  0x78   : > { %2314 = vperm.xlu1 %4984, %v5327_v58   ;;  %1038 = vperm.xlu0 %4983, %v1024_v34   ;;  %v539_v58 = vmul.f32 %v5453_v37, %v513_v50  ;;  %v542_v50 = vmul.f32 %v5453_v37, %v516_v32  ;;  %v3538_v32 = vld [vmem:[%s7111_s1 + $0x2c0] sm:$0xff] }
  0x7c   : > { %2317 = vperm.xlu1 %4984, %v5338_v62   ;;  %1041 = vperm.xlu0 %4983, %v5448_v36   ;;  %v1581_v62 = vld [vmem:[%s5444_s24 + $0x2c] sm:$0xff] }
  0x7d   : > { %v1607_v11 = vmul.f32 %v5453_v37, %v1581_v62 }
  0x7f   : > { %v1620_v29 = vadd.f32 %v5471_v43, %v1607_v11  ;;  %v518_v11 = vld [vmem:[%s5444_s24 + $0x32] sm:$0xff] }
  0x80   : > { %2320 = vperm.xlu1 %4984, %v5349_v2   ;;  %1044 = vperm.xlu0 %4983, %v5462_v40   ;;  %v3533_v2 = vld [vmem:[%s7111_s1 + $0x298] sm:$0xff] }
  0x81   : > { %v4673_v13 = vpack.c.bf16 %v3533_v2, %v3532_v1  ;;  %v969_v1 = vld [vmem:[%s7113_s3 + $0x5b] sm:$0xff]  ;;  %v499_v2 = vld [vmem:[%s7111_s1 + $0x10] sm:$0xff] }
  0x82   : > { %vm1008_vm11 = vcmp.gt.f32.partialorder %v969_v1, 0.5  ;;  %v4577_v24 = vpack.c.bf16 %v500_v5, %v499_v2  ;;  %v1587_v1 = vld [vmem:[%s5444_s24 + $0x5c] sm:$0xff] }
  0x84   : > { %2323 = vperm.xlu1 %4984, %v5360_v7   ;;  %1047 = vperm.xlu0 %4983, %v5477_v45   ;;  %v552_v7 = vadd.f32 %v5471_v43, %v539_v58  ;;  %v5609_v58 = vsel %vm1006_vm5, 1, %v4997_v3 }
  0x86   : > { %v578_v27 = vmax.f32 %v552_v7, 0.0  ;;  %v555_v7 = vadd.f32 %v5471_v43, %v542_v50  ;;  %v502_v50 = vld [vmem:[%s7111_s1 + $0x28] sm:$0xff] }
  0x87   : > { %v5505_v63 = vpop.permute.xlu1 %1676  ;;  %v5507_v0 = vpop.permute.xlu0 %1670 }
  0x88   : > { %vm1708_vm13 = vcmp.eq.s32.totalorder %v5507_v0, 1  ;;  %2326 = vperm.xlu1 %4984, %v5371_v12   ;;  %1050 = vperm.xlu0 %4983, %v5495_v54   ;;  %v515_v12 = vld [vmem:[%s5444_s24 + $0x1a] sm:$0xff]  ;;  %vm1710_vm2 = vcmp.eq.s32.totalorder %v5505_v63, 1 }
  0x89   : > { %4227 = vmatmul.mubr.msk.f32.vlgmr.msra.gmra.mrb[0].mxu0 %vm1708_vm13, %v1643_v55  ;;  %v541_v25 = vmul.f32 %v5453_v37, %v515_v12  ;;  %v1584_v55 = vld [vmem:[%s5444_s24 + $0x44] sm:$0xff]  ;;  %v2604_v12 = vsel %vm2578_vm6, 1, %v4997_v3  ;;  %vm2581_vm6 = vcmp.gt.f32.partialorder %v2542_v51, 0.5 }
  0x8a   : > { %4671 = vmatpush3.bf16.msra.mxu0 %v4670_v61  ;;  %4229 = vmatprep.mubr.msk.f32.mxu0 %vm4999_vm0, %v5000_v47  ;;  %v2540_v61 = vld [vmem:[%s7113_s3 + $0x26] sm:$0xff]  ;;  %v1610_v10 = vmul.f32 %v5453_v37, %v1584_v55  ;;  %v1624_v55 = vadd.f32 %v5471_v43, %v1611_v31  ;;  %v503_v31 = vld [vmem:[%s7111_s1 + $0x30] sm:$0xff] }
  0x8b   : > { %v5535_v15 = vpop.permute.xlu1 %1679  ;;  %v5537_v17 = vpop.permute.xlu0 %1673  ;;  %4672 = vmatprep.subr.bf16.mxu0 %v4998_v9  ;;  %v554_v44 = vadd.f32 %v5471_v43, %v541_v25  ;;  %vm2579_vm10 = vcmp.gt.f32.partialorder %v2540_v61, 0.5  ;;  %v4682_v61 = vpack.c.bf16 %v3539_v46, %v3538_v32  ;;  %v504_v32 = vld [vmem:[%s7111_s1 + $0x38] sm:$0xff] }
  0x8c   : > { %vm1709_vm15 = vcmp.eq.s32.totalorder %v5537_v17, 1  ;;  %2329 = vperm.xlu1 %4984, %v5382_v16   ;;  %1053 = vperm.xlu0 %4983, %v5520_v4   ;;  %v498_v16 = vld [vmem:[%s7111_s1 + $0x8] sm:$0xff]  ;;  %vm1711_vm8 = vcmp.eq.s32.totalorder %v5535_v15, 1  ;;  %v1623_v30 = vadd.f32 %v5471_v43, %v1610_v10  ;;  %v546_v10 = vmul.f32 %v5453_v37, %v520_v60 }
  0x8d   : > { %4230 = vmatmul.mubr.msk.f32.gmra.mrb[2].mxu0 %vm1709_vm15, %v1644_v6  ;;  %v4574_v41 = vpack.c.bf16 %v498_v16, %v497_v26  ;;  %v580_v62 = vmax.f32 %v554_v44, 0.0  ;;  %v543_v6 = vmul.f32 %v5453_v37, %v517_v52  ;;  %v2541_v26 = vld [vmem:[%s7113_s3 + $0x2e] sm:$0xff]  ;;  %v970_v16 = vld [vmem:[%s7113_s3 + $0x63] sm:$0xff]  ;;  %v5683_v44 = vsel %vm1008_vm11, 1, %v4997_v3 }
  0x8e   : > { %4232 = vmatprep.mubr.msk.f32.mxu0 %vm4999_vm0, %v5000_v47  ;;  %4674 = vmatpush3.bf16.msra.mxu0 %v4673_v13  ;;  %v5647_v13 = vsel %vm1007_vm7, 1, %v4997_v3  ;;  %vm2580_vm1 = vcmp.gt.f32.partialorder %v2541_v26, 0.5  ;;  %vm1009_vm3 = vcmp.gt.f32.partialorder %v970_v16, 0.5  ;;  %v971_v52 = vld [vmem:[%s7113_s3 + $0x6b] sm:$0xff]  ;;  %v2607_v16 = vsel %vm2581_vm6, 1, %v4997_v3 }
  0x8f   : > { %v5576_v34 = vpop.permute.xlu1 %1682  ;;  %v606_v35 = vpop.permute.xlu0 %605  ;;  %4675 = vmatprep.subr.bf16.mxu0 %v4998_v9  ;;  %v556_v25 = vadd.f32 %v5471_v43, %v543_v6  ;;  %v5721_v6 = vsel %vm1009_vm3, 1, %v4997_v3  ;;  %vm1010_vm7 = vcmp.gt.f32.partialorder %v971_v52, 0.5  ;;  %v3543_v60 = vld [vmem:[%s7111_s1 + $0x2e8] sm:$0xff] }
  0x90   : > { %vm643_vm4 = vcmp.eq.s32.totalorder %v606_v35, 1  ;;  %2332 = vperm.xlu1 %4984, %v5393_v20   ;;  %1056 = vperm.xlu0 %4983, %v5542_v18   ;;  %v1646_v20 = vmax.f32 %v1620_v29, 0.0  ;;  %vm1712_vm12 = vcmp.eq.s32.totalorder %v5576_v34, 1  ;;  %v1648_v29 = vmax.f32 %v1622_v8, 0.0  ;;  %v1586_v35 = vld [vmem:[%s5444_s24 + $0x54] sm:$0xff]  ;;  %v2543_v8 = vld [vmem:[%s7113_s3 + $0x3e] sm:$0xff] }
  0x91   : > { %3943 = vmatmul.mubr.msk.f32.vlgmr.msra.gmra.mrb[0].mxu1 %vm643_vm4, %v578_v27  ;;  %4233 = vmatmul.mubr.msk.f32.gmra.mrb[4].mxu0 %vm1710_vm2, %v1645_v28  ;;  %v544_v27 = vmul.f32 %v5453_v37, %v518_v11  ;;  %v581_v28 = vmax.f32 %v555_v7, 0.0  ;;  %v1612_v59 = vmul.f32 %v5453_v37, %v1586_v35  ;;  %v1650_v11 = vmax.f32 %v1624_v55, 0.0 }
  0x92   : > { %3945 = vmatprep.mubr.msk.f32.mxu1 %vm4999_vm0, %v5000_v47  ;;  %4235 = vmatprep.mubr.msk.f32.mxu0 %vm4999_vm0, %v5000_v47  ;;  %vm2582_vm11 = vcmp.gt.f32.partialorder %v2543_v8, 0.5  ;;  %v4583_v55 = vpack.c.bf16 %v504_v32, %v503_v31  ;;  %v523_v8 = vld [vmem:[%s5444_s24 + $0x5a] sm:$0xff]  ;;  %v524_v31 = vld [vmem:[%s5444_s24 + $0x62] sm:$0xff] }
  0x93   : > { %v5605_v56 = vpop.permute.xlu1 %1685  ;;  %v609_v57 = vpop.permute.xlu0 %608  ;;  %4677 = vmatpush3.bf16.msra.mxu0 %v4676_v39  ;;  %4575 = vmatpush3.bf16.msra.mxu1 %v4574_v41  ;;  %v1625_v14 = vadd.f32 %v5471_v43, %v1612_v59  ;;  %v3542_v59 = vld [vmem:[%s7111_s1 + $0x2e0] sm:$0xff] }
  0x94   : > { %vm644_vm9 = vcmp.eq.s32.totalorder %v609_v57, 1  ;;  %2335 = vperm.xlu1 %4984, %v5401_v23   ;;  %1059 = vperm.xlu0 %4983, %v5580_v38   ;;  %v1647_v23 = vmax.f32 %v1621_v49, 0.0  ;;  %vm1713_vm4 = vcmp.eq.s32.totalorder %v5605_v56, 1  ;;  %v557_v49 = vadd.f32 %v5471_v43, %v544_v27 }
  0x95   : > { %3946 = vmatmul.mubr.msk.f32.gmra.mrb[2].mxu1 %vm644_vm9, %v579_v42  ;;  %4236 = vmatmul.mubr.msk.f32.gmra.mrb[6].mxu0 %vm1711_vm8, %v1646_v20  ;;  %v2605_v42 = vsel %vm2579_vm10, 1, %v4997_v3  ;;  %v582_v20 = vmax.f32 %v556_v25, 0.0  ;;  %v545_v57 = vmul.f32 %v5453_v37, %v519_v33  ;;  %v5747_v27 = vsel %vm1010_vm7, 1, %v4997_v3  ;;  %v2544_v33 = vld [vmem:[%s7113_s3 + $0x46] sm:$0xff] }
  0x96   : > { %3948 = vmatprep.mubr.msk.f32.mxu1 %vm4999_vm0, %v5000_v47  ;;  %4238 = vmatprep.mubr.msk.f32.mxu0 %vm4999_vm0, %v5000_v47  ;;  %v583_v7 = vmax.f32 %v557_v49, 0.0  ;;  %v522_v49 = vld [vmem:[%s5444_s24 + $0x52] sm:$0xff]  ;;  %vm2583_vm3 = vcmp.gt.f32.partialorder %v2544_v33, 0.5 }
  0x97   : > { %v5650_v19 = vpop.permute.xlu1 %1688  ;;  %v612_v21 = vpop.permute.xlu0 %611  ;;  %4678 = vmatprep.subr.bf16.mxu0 %v4998_v9  ;;  %4576 = vmatprep.subr.bf16.mxu1 %v4998_v9 }
  0x98   : > { %vm645_vm14 = vcmp.eq.s32.totalorder %v612_v21, 1  ;;  %2338 = vperm.xlu1 %4984, %v2300_v53   ;;  %1062 = vperm.xlu0 %4983, %v5609_v58   ;;  %v1649_v53 = vmax.f32 %v1623_v30, 0.0  ;;  %vm1714_vm9 = vcmp.eq.s32.totalorder %v5650_v19, 1  ;;  %v1613_v21 = vmul.f32 %v5453_v37, %v1587_v1 }
  0x99   : > { %3949 = vmatmul.mubr.msk.f32.gmra.mrb[4].mxu1 %vm645_vm14, %v580_v62  ;;  %4239 = vmatmul.mubr.msk.f32.gmra.mrb[8].mxu0 %vm1712_vm12, %v1647_v23  ;;  %v2606_v62 = vsel %vm2580_vm1, 1, %v4997_v3  ;;  %v4580_v23 = vpack.c.bf16 %v502_v50, %v501_v48  ;;  %v559_v30 = vadd.f32 %v5471_v43, %v546_v10  ;;  %v1589_v50 = vld [vmem:[%s5444_s24 + $0x6c] sm:$0xff] }
  0x9a   : > { %3951 = vmatprep.mubr.msk.f32.mxu1 %vm4999_vm0, %v5000_v47  ;;  %4241 = vmatprep.mubr.msk.f32.mxu0 %vm4999_vm0, %v5000_v47  ;;  %v1626_v46 = vadd.f32 %v5471_v43, %v1613_v21  ;;  %v1590_v21 = vld [vmem:[%s5444_s24 + $0x74] sm:$0xff] }
  0x9b   : > { %v5677_v39 = vpop.permute.xlu1 %1691  ;;  %v615_v41 = vpop.permute.xlu0 %614  ;;  %4680 = vmatpush3.bf16.msra.mxu0 %v4679_v22  ;;  %4578 = vmatpush3.bf16.msra.mxu1 %v4577_v24  ;;  %v521_v22 = vld [vmem:[%s5444_s24 + $0x4a] sm:$0xff] }
  0x9c   : > { %vm646_vm5 = vcmp.eq.s32.totalorder %v615_v41, 1  ;;  %2618 = vperm.xlu1 %4984, %v2604_v12   ;;  %1065 = vperm.xlu0 %4983, %v5647_v13   ;;  %v558_v12 = vadd.f32 %v5471_v43, %v545_v57  ;;  %v1588_v24 = vld [vmem:[%s5444_s24 + $0x64] sm:$0xff]  ;;  %vm1715_vm14 = vcmp.eq.s32.totalorder %v5677_v39, 1  ;;  %v547_v35 = vmul.f32 %v5453_v37, %v521_v22 }
  0x9d   : > { %3952 = vmatmul.mubr.msk.f32.gmra.mrb[6].mxu1 %vm646_vm5, %v581_v28  ;;  %4242 = vmatmul.mubr.msk.f32.gmra.mrb[10].mxu0 %vm1713_vm4, %v1648_v29  ;;  %v3540_v28 = vld [vmem:[%s7111_s1 + $0x2d0] sm:$0xff]  ;;  %v3541_v29 = vld [vmem:[%s7111_s1 + $0x2d8] sm:$0xff]  ;;  %v1614_v48 = vmul.f32 %v5453_v37, %v1588_v24  ;;  %v585_v57 = vmax.f32 %v559_v30, 0.0  ;;  %v505_v24 = vld [vmem:[%s7111_s1 + $0x40] sm:$0xff]  ;;  %v1616_v30 = vmul.f32 %v5453_v37, %v1590_v21 }
  0x9e   : > { %3954 = vmatprep.mubr.msk.f32.mxu1 %vm4999_vm0, %v5000_v47  ;;  %4244 = vmatprep.mubr.msk.f32.mxu0 %vm4999_vm0, %v5000_v47  ;;  %v584_v41 = vmax.f32 %v558_v12, 0.0  ;;  %v2609_v12 = vsel %vm2583_vm3, 1, %v4997_v3  ;;  %v3559_v21 = vld [vmem:[%s7111_s1 + $0x300] sm:$0xff] }
  0x9f   : > { %v5716_v2 = vpop.permute.xlu1 %1694  ;;  %v618_v5 = vpop.permute.xlu0 %617  ;;  %4681 = vmatprep.subr.bf16.mxu0 %v4998_v9  ;;  %4579 = vmatprep.subr.bf16.mxu1 %v4998_v9  ;;  %v1627_v1 = vadd.f32 %v5471_v43, %v1614_v48  ;;  %v3544_v48 = vld [vmem:[%s7111_s1 + $0x2f0] sm:$0xff] }
  0xa0   : > { %vm647_vm10 = vcmp.eq.s32.totalorder %v618_v5, 1  ;;  %2621 = vperm.xlu1 %4984, %v2605_v42   ;;  %1068 = vperm.xlu0 %4983, %v5683_v44   ;;  %v1651_v42 = vmax.f32 %v1625_v14, 0.0  ;;  %vm1716_vm5 = vcmp.eq.s32.totalorder %v5716_v2, 1  ;;  %v2545_v5 = vld [vmem:[%s7113_s3 + $0x4e] sm:$0xff]  ;;  %v4688_v14 = vpack.c.bf16 %v3543_v60, %v3542_v59 }
  0xa1   : > { %3955 = vmatmul.mubr.msk.f32.gmra.mrb[8].mxu1 %vm647_vm10, %v582_v20  ;;  %4245 = vmatmul.mubr.msk.f32.gmra.mrb[12].mxu0 %vm1714_vm9, %v1649_v53  ;;  %v4685_v20 = vpack.c.bf16 %v3541_v29, %v3540_v28  ;;  %v2608_v53 = vsel %vm2582_vm11, 1, %v4997_v3  ;;  %vm2584_vm11 = vcmp.gt.f32.partialorder %v2545_v5, 0.5  ;;  %v549_v29 = vmul.f32 %v5453_v37, %v523_v8  ;;  %v525_v5 = vld [vmem:[%s5444_s24 + $0x6a] sm:$0xff] }
  0xa2   : > { %4683 = vmatpush3.bf16.msra.mxu0 %v4682_v61  ;;  %3957 = vmatprep.mubr.msk.f32.mxu1 %vm4999_vm0, %v5000_v47  ;;  %v560_v61 = vadd.f32 %v5471_v43, %v547_v35 }
  0xa3   : > { %v5739_v25 = vpop.permute.xlu1 %1697  ;;  %v621_v26 = vpop.permute.xlu0 %620  ;;  %4247 = vmatprep.mubr.msk.f32.mxu0 %vm4999_vm0, %v5000_v47  ;;  %4581 = vmatpush3.bf16.msra.mxu1 %v4580_v23  ;;  %v548_v23 = vmul.f32 %v5453_v37, %v522_v49 }
  0xa4   : > { %vm648_vm1 = vcmp.eq.s32.totalorder %v621_v26, 1  ;;  %2624 = vperm.xlu1 %4984, %v2606_v62   ;;  %1071 = vperm.xlu0 %4983, %v5721_v6   ;;  %v1652_v62 = vmax.f32 %v1626_v46, 0.0  ;;  %vm1717_vm7 = vcmp.eq.s32.totalorder %v5739_v25, 1  ;;  %v586_v22 = vmax.f32 %v560_v61, 0.0  ;;  %v506_v26 = vld [vmem:[%s7111_s1 + $0x48] sm:$0xff] }
  0xa5   : > { %3958 = vmatmul.mubr.msk.f32.gmra.mrb[10].mxu1 %vm648_vm1, %v583_v7  ;;  %4248 = vmatmul.mubr.msk.f32.gmra.mrb[14].mxu0 %vm1715_vm14, %v1650_v11  ;;  %v1615_v7 = vmul.f32 %v5453_v37, %v1589_v50  ;;  %v561_v28 = vadd.f32 %v5471_v43, %v548_v23  ;;  %v4586_v35 = vpack.c.bf16 %v506_v26, %v505_v24  ;;  %v2610_v46 = vsel %vm2584_vm11, 1, %v4997_v3  ;;  %v1895_v23 = vld [vmem:[%s5444_s24 + $0x1d] sm:$0xff] }
  0xa6   : > { %3960 = vmatprep.mubr.msk.f32.mxu1 %vm4999_vm0, %v5000_v47  ;;  %4250 = vmatprep.mubr.msk.f32.mxu0 %vm4999_vm0, %v5000_v47  ;;  %v551_v24 = vmul.f32 %v5453_v37, %v525_v5 }
  0xa7   : > { %v5778_v51 = vpop.permute.xlu1 %1700  ;;  %v624_v52 = vpop.permute.xlu0 %623  ;;  %4684 = vmatprep.subr.bf16.mxu0 %v4998_v9  ;;  %4582 = vmatprep.subr.bf16.mxu1 %v4998_v9  ;;  %v587_v49 = vmax.f32 %v561_v28, 0.0  ;;  %v509_v28 = vld [vmem:[%s7111_s1 + $0x60] sm:$0xff] }
  0xa8   : > { %vm649_vm6 = vcmp.eq.s32.totalorder %v624_v52, 1  ;;  %2627 = vperm.xlu1 %4984, %v2607_v16   ;;  %1074 = vperm.xlu0 %4983, %v5747_v27   ;;  %v1653_v16 = vmax.f32 %v1627_v1, 0.0  ;;  %vm7121_vm1 = vcmp.eq.s32.totalorder %v5778_v51, 1  ;;  %v550_v52 = vmul.f32 %v5453_v37, %v524_v31  ;;  %v2547_v1 = vld [vmem:[%s7113_s3 + $0x5e] sm:$0xff]  ;;  %v327_v31 = vld [vmem:[%s5444_s24 + $0x9] sm:$0xff] }
  0xa9   : > { %3961 = vmatmul.mubr.msk.f32.gmra.mrb[12].mxu1 %vm649_vm6, %v584_v41  ;;  %4251 = vmatmul.mubr.msk.f32.gmra.mrb[16].mxu0 %vm1716_vm5, %v1651_v42  ;;  %v2546_v41 = vld [vmem:[%s7113_s3 + $0x56] sm:$0xff] }
  0xaa   : > { %4686 = vmatpush3.bf16.msra.mxu0 %v4685_v20  ;;  %3963 = vmatprep.mubr.msk.f32.mxu1 %vm4999_vm0, %v5000_v47  ;;  %v1894_v42 = vld [vmem:[%s5444_s24 + $0x15] sm:$0xff]  ;;  %vm2585_vm6 = vcmp.gt.f32.partialorder %v2546_v41, 0.5 }
  0xab   : > { %v5804_v10 = vpop.permute.xlu1 %1703  ;;  %v627_v11 = vpop.permute.xlu0 %626  ;;  %4253 = vmatprep.mubr.msk.f32.mxu0 %vm4999_vm0, %v5000_v47  ;;  %4584 = vmatpush3.bf16.msra.mxu1 %v4583_v55  ;;  %v3545_v20 = vld [vmem:[%s7111_s1 + $0x2f8] sm:$0xff]  ;;  %v507_v55 = vld [vmem:[%s7111_s1 + $0x50] sm:$0xff]  ;;  %v1920_v59 = vmul.f32 %v5453_v37, %v1894_v42 }
  0xac   : > { %vm650_vm10 = vcmp.eq.s32.totalorder %v627_v11, 1  ;;  %2630 = vperm.xlu1 %4984, %v2608_v53   ;;  %1354 = vperm.xlu0 %4983, %v5448_v36   ;;  %v1628_v36 = vadd.f32 %v5471_v43, %v1615_v7  ;;  %v1629_v53 = vadd.f32 %v5471_v43, %v1616_v30  ;;  %v2611_v7 = vsel %vm2585_vm6, 1, %v4997_v3 }
  0xad   : > { %3964 = vmatmul.mubr.msk.f32.gmra.mrb[14].mxu1 %vm650_vm10, %v585_v57  ;;  %4254 = vmatmul.mubr.msk.f32.gmra.mrb[18].mxu0 %vm1717_vm7, %v1652_v62  ;;  %v508_v57 = vld [vmem:[%s7111_s1 + $0x58] sm:$0xff]  ;;  %v4691_v62 = vpack.c.bf16 %v3545_v20, %v3544_v48  ;;  %vm7119_vm10 = vcmp.eq.s32.totalorder %v5804_v10, 1  ;;  %v1921_v30 = vmul.f32 %v5453_v37, %v1895_v23  ;;  %v511_v20 = vld [vmem:[%s7111_s1 + $0x70] sm:$0xff] }
  0xae   : > { %4687 = vmatprep.subr.bf16.mxu0 %v4998_v9  ;;  %3966 = vmatprep.mubr.msk.f32.mxu1 %vm4999_vm0, %v5000_v47  ;;  %v1654_v50 = vmax.f32 %v1628_v36, 0.0  ;;  %v4589_v11 = vpack.c.bf16 %v508_v57, %v507_v55  ;;  %v510_v36 = vld [vmem:[%s7111_s1 + $0x68] sm:$0xff]  ;;  %v360_v55 = vmul.f32 %v5453_v37, %v327_v31 }
  0xaf   : > { %v5829_v32 = vpop.permute.xlu1 %1706  ;;  %v630_v33 = vpop.permute.xlu0 %629  ;;  %4256 = vmatprep.mubr.msk.f32.mxu0 %vm4999_vm0, %v5000_v47  ;;  %4689 = vmatpush3.bf16.msra.mxu0 %v4688_v14  ;;  %v1655_v14 = vmax.f32 %v1629_v53, 0.0  ;;  %v4592_v48 = vpack.c.bf16 %v510_v36, %v509_v28  ;;  %v2549_v53 = vld [vmem:[%s7113_s3 + $0x6e] sm:$0xff] }
  0xb0   : > { %vm651_vm3 = vcmp.eq.s32.totalorder %v630_v33, 1  ;;  %2633 = vperm.xlu1 %4984, %v2609_v12   ;;  %1357 = vperm.xlu0 %4983, %v5462_v40   ;;  %v562_v40 = vadd.f32 %v5471_v43, %v549_v29  ;;  %v563_v12 = vadd.f32 %v5471_v43, %v550_v52  ;;  %v2548_v29 = vld [vmem:[%s7113_s3 + $0x66] sm:$0xff]  ;;  %v512_v52 = vld [vmem:[%s7111_s1 + $0x78] sm:$0xff] }
  0xb1   : > { %3967 = vmatmul.mubr.msk.f32.gmra.mrb[16].mxu1 %vm651_vm3, %v586_v22  ;;  %4257 = vmatmul.mubr.msk.f32.gmra.mrb[20].mxu0 %vm7121_vm1, %v1653_v16  ;;  %vm2586_vm3 = vcmp.gt.f32.partialorder %v2547_v1, 0.5  ;;  %v3560_v22 = vld [vmem:[%s7111_s1 + $0x308] sm:$0xff]  ;;  %v4595_v5 = vpack.c.bf16 %v512_v52, %v511_v20 }
  0xb2   : > { %4585 = vmatprep.subr.bf16.mxu1 %v4998_v9  ;;  %3969 = vmatprep.mubr.msk.f32.mxu1 %vm4999_vm0, %v5000_v47  ;;  %v588_v8 = vmax.f32 %v562_v40, 0.0  ;;  %v1896_v33 = vld [vmem:[%s5444_s24 + $0x25] sm:$0xff]  ;;  %v589_v41 = vmax.f32 %v563_v12, 0.0  ;;  %v4694_v42 = vpack.c.bf16 %v3560_v22, %v3559_v21  ;;  %v5923_v40 = vadd.f32 %v5471_v43, %v1921_v30  ;;  %v329_v22 = vld [vmem:[%s5444_s24 + $0x19] sm:$0xff] }
  0xb3   : > { %v5862_v60 = vpop.permute.xlu1 %1986  ;;  %v633_v61 = vpop.permute.xlu0 %632  ;;  %4587 = vmatpush3.bf16.msra.mxu1 %v4586_v35  ;;  %4259 = vmatprep.mubr.msk.f32.mxu0 %vm4999_vm0, %v5000_v47  ;;  %v2612_v35 = vsel %vm2586_vm3, 1, %v4997_v3  ;;  %v1922_v57 = vmul.f32 %v5453_v37, %v1896_v33  ;;  %v380_v12 = vadd.f32 %v5471_v43, %v360_v55  ;;  %v362_v36 = vmul.f32 %v5453_v37, %v329_v22  ;;  %v3564_v20 = vld [vmem:[%s7111_s1 + $0x328] sm:$0xff] }
  0xb4   : > { %vm652_vm11 = vcmp.eq.s32.totalorder %v633_v61, 1  ;;  %2636 = vperm.xlu1 %4984, %v2610_v46   ;;  %1360 = vperm.xlu0 %4983, %v5477_v45   ;;  %v1933_v45 = vadd.f32 %v5471_v43, %v1920_v59  ;;  %v328_v59 = vld [vmem:[%s5444_s24 + $0x11] sm:$0xff]  ;;  %v3444_v52 = vld [vmem:[%s7111_s1 + $0x108] sm:$0xff] }
  0xb5   : > { %3970 = vmatmul.mubr.msk.f32.gmra.mrb[18].mxu1 %vm652_vm11, %v587_v49  ;;  %4260 = vmatmul.mubr.msk.f32.gmra.mrb[22].mxu0 %vm7119_vm10, %v1654_v50  ;;  %vm7120_vm11 = vcmp.eq.s32.totalorder %v5829_v32, 1  ;;  %vm2587_vm10 = vcmp.gt.f32.partialorder %v2548_v29, 0.5  ;;  %v1897_v61 = vld [vmem:[%s5444_s24 + $0x2d] sm:$0xff]  ;;  %v361_v23 = vmul.f32 %v5453_v37, %v328_v59  ;;  %v406_v31 = vmax.f32 %v380_v12, 0.0 }
  0xb6   : > { %4690 = vmatprep.subr.bf16.mxu0 %v4998_v9  ;;  %3972 = vmatprep.mubr.msk.f32.mxu1 %vm4999_vm0, %v5000_v47  ;;  %v1959_v46 = vmax.f32 %v1933_v45, 0.0  ;;  %v2550_v45 = vld [vmem:[%s7113_s3 + $0x76] sm:$0xff]  ;;  %v1923_v21 = vmul.f32 %v5453_v37, %v1897_v61 }
  0xb7   : > { %v5889_v26 = vpop.permute.xlu1 %1989  ;;  %v636_v16 = vpop.permute.xlu0 %635  ;;  %4692 = vmatpush3.bf16.msra.mxu0 %v4691_v62  ;;  %4262 = vmatprep.mubr.msk.f32.mxu0 %vm4999_vm0, %v5000_v47  ;;  %v2613_v62 = vsel %vm2587_vm10, 1, %v4997_v3 }
  0xb8   : > { %vm653_vm6 = vcmp.eq.s32.totalorder %v636_v16, 1  ;;  %2639 = vperm.xlu1 %4984, %v2611_v7   ;;  %1363 = vperm.xlu0 %4983, %v5495_v54   ;;  %v564_v54 = vadd.f32 %v5471_v43, %v551_v24  ;;  %v1898_v24 = vld [vmem:[%s5444_s24 + $0x35] sm:$0xff] }
  0xb9   : > { %3973 = vmatmul.mubr.msk.f32.gmra.mrb[20].mxu1 %vm653_vm6, %v588_v8  ;;  %4588 = vmatprep.subr.bf16.mxu1 %v4998_v9  ;;  %vm2024_vm6 = vcmp.eq.s32.totalorder %v5862_v60, 1  ;;  %v3562_v60 = vld [vmem:[%s7111_s1 + $0x318] sm:$0xff] }
  0xba   : > { %4263 = vmatmul.mubr.msk.f32.gmra.mrb[24].mxu0 %vm7120_vm11, %v1655_v14  ;;  %4590 = vmatpush3.bf16.msra.mxu1 %v4589_v11  ;;  %v590_v1 = vmax.f32 %v564_v54, 0.0  ;;  %vm2588_vm11 = vcmp.gt.f32.partialorder %v2549_v53, 0.5  ;;  %v1960_v11 = vmax.f32 %v5923_v40, 0.0  ;;  %v5953_v14 = vadd.f32 %v5471_v43, %v1922_v57  ;;  %v3563_v54 = vld [vmem:[%s7111_s1 + $0x320] sm:$0xff] }
  0xbb   : > { %v5916_v49 = vpop.permute.xlu1 %1992  ;;  %v639_v50 = vpop.permute.xlu0 %638  ;;  %3975 = vmatprep.mubr.msk.f32.mxu1 %vm4999_vm0, %v5000_v47  ;;  %4297 = vmatprep.mubr.msk.f32.mxu0 %vm4999_vm0, %v5000_v47  ;;  %v2614_v16 = vsel %vm2588_vm11, 1, %v4997_v3  ;;  %v3472_v40 = vld [vmem:[%s7111_s1 + $0x180] sm:$0xff] }
  0xbc   : > { %vm654_vm3 = vcmp.eq.s32.totalorder %v639_v50, 1  ;;  %2642 = vperm.xlu1 %4984, %v2612_v35   ;;  %1366 = vperm.xlu0 %4983, %v5520_v4   ;;  %v3561_v4 = vld [vmem:[%s7111_s1 + $0x310] sm:$0xff]  ;;  %v1961_v33 = vmax.f32 %v5953_v14, 0.0  ;;  %v2551_v35 = vld [vmem:[%s7113_s3 + $0x7e] sm:$0xff] }
  0xbd   : > { %4693 = vmatprep.subr.bf16.mxu0 %v4998_v9  ;;  %3976 = vmatmul.mubr.msk.f32.gmra.mrb[22].mxu1 %vm654_vm3, %v589_v41  ;;  %v4697_v28 = vpack.c.bf16 %v3562_v60, %v3561_v4  ;;  %vm2025_vm3 = vcmp.eq.s32.totalorder %v5889_v26, 1  ;;  %v5978_v26 = vadd.f32 %v5471_v43, %v1923_v21  ;;  %v1924_v41 = vmul.f32 %v5453_v37, %v1898_v24  ;;  %v3443_v50 = vld [vmem:[%s7111_s1 + $0x100] sm:$0xff]  ;;  %v331_v4 = vld [vmem:[%s5444_s24 + $0x29] sm:$0xff] }
  0xbe   : > { %4591 = vmatprep.subr.bf16.mxu1 %v4998_v9  ;;  %4298 = vmatmul.mubr.msk.f32.vlgmr.msra.gmra.mrb[0].mxu0 %vm2024_vm6, %v1959_v46  ;;  %vm2589_vm6 = vcmp.gt.f32.partialorder %v2550_v45, 0.5  ;;  %v1899_v46 = vld [vmem:[%s5444_s24 + $0x3d] sm:$0xff]  ;;  %v1900_v60 = vld [vmem:[%s5444_s24 + $0x45] sm:$0xff]  ;;  %v3474_v14 = vld [vmem:[%s7111_s1 + $0x190] sm:$0xff] }
  0xbf   : > { %4695 = vmatpush3.bf16.msra.mxu0 %v4694_v42  ;;  %4593 = vmatpush3.bf16.msra.mxu1 %v4592_v48  ;;  %v5948_v7 = vpop.permute.xlu1 %1995  ;;  %v642_v8 = vpop.permute.xlu0 %641  ;;  %v330_v42 = vld [vmem:[%s5444_s24 + $0x21] sm:$0xff]  ;;  %v2615_v48 = vsel %vm2589_vm6, 1, %v4997_v3  ;;  %v1962_v59 = vmax.f32 %v5978_v26, 0.0  ;;  %v6016_v61 = vadd.f32 %v5471_v43, %v1924_v41 }
  0xc0   : > { %vm655_vm10 = vcmp.eq.s32.totalorder %v642_v8, 1  ;;  %2645 = vperm.xlu1 %4984, %v2613_v62   ;;  %1369 = vperm.xlu0 %4983, %v5542_v18   ;;  %v381_v18 = vadd.f32 %v5471_v43, %v361_v23  ;;  %v363_v53 = vmul.f32 %v5453_v37, %v330_v42  ;;  %v2855_v62 = vld [vmem:[%s7113_s3 + $0x1f] sm:$0xff]  ;;  %v4598_v8 = vpack.c.bf16 %v3444_v52, %v3443_v50  ;;  %v2856_v24 = vld [vmem:[%s7113_s3 + $0x27] sm:$0xff] }
  0xc1   : > { %3978 = vmatprep.mubr.msk.f32.mxu1 %vm4999_vm0, %v5000_v47  ;;  %4300 = vmatprep.mubr.msk.f32.mxu0 %vm4999_vm0, %v5000_v47  ;;  %v3476_v26 = vld [vmem:[%s7111_s1 + $0x1a0] sm:$0xff] }
  0xc2   : > { %3979 = vmatmul.mubr.msk.f32.gmra.mrb[24].mxu1 %vm655_vm10, %v590_v1  ;;  %4594 = vmatprep.subr.bf16.mxu1 %v4998_v9  ;;  %vm2026_vm10 = vcmp.eq.s32.totalorder %v5916_v49, 1  ;;  %v407_v57 = vmax.f32 %v381_v18, 0.0  ;;  %v1925_v1 = vmul.f32 %v5453_v37, %v1899_v46  ;;  %v383_v45 = vadd.f32 %v5471_v43, %v363_v53  ;;  %v332_v18 = vld [vmem:[%s5444_s24 + $0x31] sm:$0xff]  ;;  %v333_v53 = vld [vmem:[%s5444_s24 + $0x39] sm:$0xff] }
  0xc3   : > { %4301 = vmatmul.mubr.msk.f32.gmra.mrb[2].mxu0 %vm2025_vm3, %v1960_v11  ;;  %4596 = vmatpush3.bf16.msra.mxu1 %v4595_v5  ;;  %v5974_v29 = vpop.permute.xlu1 %1998  ;;  %v434_v30 = vpop.permute.xlu0 %433  ;;  %vm2590_vm3 = vcmp.gt.f32.partialorder %v2551_v35, 0.5  ;;  %v4700_v5 = vpack.c.bf16 %v3564_v20, %v3563_v54  ;;  %v3446_v46 = vld [vmem:[%s7111_s1 + $0x118] sm:$0xff]  ;;  %v2857_v20 = vld [vmem:[%s7113_s3 + $0x2f] sm:$0xff] }
  0xc4   : > { %vm471_vm11 = vcmp.eq.s32.totalorder %v434_v30, 1  ;;  %4696 = vmatprep.subr.bf16.mxu0 %v4998_v9  ;;  %2648 = vperm.xlu1 %4984, %v2614_v16   ;;  %v2616_v23 = vsel %vm2590_vm3, 1, %v4997_v3  ;;  %v6042_v22 = vadd.f32 %v5471_v43, %v1925_v1  ;;  %v364_v16 = vmul.f32 %v5453_v37, %v331_v4  ;;  %v3565_v30 = vld [vmem:[%s7111_s1 + $0x330] sm:$0xff]  ;;  %v3567_v1 = vld [vmem:[%s7111_s1 + $0x340] sm:$0xff] }
  0xc5   : > { %1372 = vperm.xlu0 %4983, %v5580_v38   ;;  %4013 = vmatprep.mubr.msk.f32.mxu1 %vm4999_vm0, %v5000_v47  ;;  %v382_v38 = vadd.f32 %v5471_v43, %v362_v36 }
  0xc6   : > { %4303 = vmatprep.mubr.msk.f32.mxu0 %vm4999_vm0, %v5000_v47  ;;  %4698 = vmatpush3.bf16.msra.mxu0 %v4697_v28  ;;  %v1926_v28 = vmul.f32 %v5453_v37, %v1900_v60  ;;  %v3566_v37 = vld [vmem:[%s7111_s1 + $0x338] sm:$0xff]  ;;  %v1964_v42 = vmax.f32 %v6042_v22, 0.0  ;;  %v3480_v22 = vld [vmem:[%s7111_s1 + $0x1c0] sm:$0xff] }
  0xc7   : > { %4014 = vmatmul.mubr.msk.f32.vlgmr.msra.gmra.mrb[0].mxu1 %vm471_vm11, %v406_v31  ;;  %4304 = vmatmul.mubr.msk.f32.gmra.mrb[4].mxu0 %vm2026_vm10, %v1961_v33  ;;  %v6012_v49 = vpop.permute.xlu1 %2001  ;;  %v437_v55 = vpop.permute.xlu0 %436  ;;  %vm2027_vm11 = vcmp.eq.s32.totalorder %v5948_v7, 1  ;;  %v408_v12 = vmax.f32 %v382_v38, 0.0  ;;  %vm2894_vm10 = vcmp.gt.f32.partialorder %v2855_v62, 0.5  ;;  %v1963_v7 = vmax.f32 %v6016_v61, 0.0  ;;  %v1901_v31 = vld [vmem:[%s5444_s24 + $0x4d] sm:$0xff] }
  0xc8   : > { %vm472_vm6 = vcmp.eq.s32.totalorder %v437_v55, 1  ;;  %2651 = vperm.xlu1 %4984, %v2615_v48   ;;  %4016 = vmatprep.mubr.msk.f32.mxu1 %vm4999_vm0, %v5000_v47  ;;  %v2920_v36 = vsel %vm2894_vm10, 1, %v4997_v3  ;;  %v384_v48 = vadd.f32 %v5471_v43, %v364_v16  ;;  %v6078_v54 = vadd.f32 %v5471_v43, %v1926_v28  ;;  %v6086_v38 = vld [vmem:[%s7114_s4] ss:$0 sm:$0xff]  ;;  %v3448_v28 = vld [vmem:[%s7111_s1 + $0x128] sm:$0xff]  ;;  %v3478_v61 = vld [vmem:[%s7111_s1 + $0x1b0] sm:$0xff] }
  0xc9   : > { %1375 = vperm.xlu0 %4983, %v5609_v58   ;;  %4306 = vmatprep.mubr.msk.f32.mxu0 %vm4999_vm0, %v5000_v47  ;;  %v365_v50 = vmul.f32 %v6086_v38, %v332_v18  ;;  %v4703_v52 = vpack.c.bf16 %v3566_v37, %v3565_v30  ;;  %v1927_v43 = vmul.f32 %v6086_v38, %v1901_v31  ;;  %v3447_v16 = vld [vmem:[%s7111_s1 + $0x120] sm:$0xff]  ;;  %v1287_v18 = vld [vmem:[%s7113_s3 + $0x73] sm:$0xff] }
  0xca   : > { %4699 = vmatprep.subr.bf16.mxu0 %v4998_v9  ;;  %4597 = vmatprep.subr.bf16.mxu1 %v4998_v9  ;;  %v410_v4 = vmax.f32 %v384_v48, 0.0  ;;  %v1965_v60 = vmax.f32 %v6078_v54, 0.0  ;;  %v1903_v31 = vld [vmem:[%s5444_s24 + $0x5d] sm:$0xff]  ;;  %v3482_v54 = vld [vmem:[%s7111_s1 + $0x1d0] sm:$0xff] }
  0xcb   : > { %4017 = vmatmul.mubr.msk.f32.gmra.mrb[2].mxu1 %vm472_vm6, %v407_v57  ;;  %4307 = vmatmul.mubr.msk.f32.gmra.mrb[6].mxu0 %vm2027_vm11, %v1962_v59  ;;  %v6038_v58 = vpop.permute.xlu1 %2004  ;;  %v440_v21 = vpop.permute.xlu0 %439  ;;  %vm2028_vm6 = vcmp.eq.s32.totalorder %v5974_v29, 1  ;;  %vm2895_vm11 = vcmp.gt.f32.partialorder %v2856_v24, 0.5  ;;  %v3445_v29 = vld [vmem:[%s7111_s1 + $0x110] sm:$0xff] }
  0xcc   : > { %4701 = vmatpush3.bf16.msra.mxu0 %v4700_v5  ;;  %vm473_vm3 = vcmp.eq.s32.totalorder %v440_v21, 1  ;;  %2654 = vperm.xlu1 %4984, %v2616_v23   ;;  %v2921_v55 = vsel %vm2895_vm11, 1, %v4997_v3  ;;  %v1902_v57 = vld [vmem:[%s5444_s24 + $0x55] sm:$0xff]  ;;  %v4601_v62 = vpack.c.bf16 %v3446_v46, %v3445_v29  ;;  %v6117_v23 = vld [vmem:[%s7115_s5] ss:$0 sm:$0xff]  ;;  %v334_v21 = vld [vmem:[%s5444_s24 + $0x41] sm:$0xff]  ;;  %v4604_v46 = vpack.c.bf16 %v3448_v28, %v3447_v16 }
  0xcd   : > { %1378 = vperm.xlu0 %4983, %v5647_v13   ;;  %4019 = vmatprep.mubr.msk.f32.mxu1 %vm4999_vm0, %v5000_v47  ;;  %v409_v13 = vmax.f32 %v383_v45, 0.0  ;;  %v366_v45 = vmul.f32 %v6086_v38, %v333_v53  ;;  %v6126_v24 = vadd.f32 %v6117_v23, %v1927_v43  ;;  %v2862_v48 = vld [vmem:[%s7113_s3 + $0x57] sm:$0xff]  ;;  %v2859_v43 = vld [vmem:[%s7113_s3 + $0x3f] sm:$0xff]  ;;  %v1929_v53 = vmul.f32 %v6086_v38, %v1903_v31 }
  0xce   : > { %4309 = vmatprep.mubr.msk.f32.mxu0 %vm4999_vm0, %v5000_v47  ;;  %4599 = vmatpush3.bf16.msra.mxu1 %v4598_v8  ;;  %v385_v8 = vadd.f32 %v6117_v23, %v365_v50  ;;  %v2863_v28 = vld [vmem:[%s7113_s3 + $0x5f] sm:$0xff] }
  0xcf   : > { %4020 = vmatmul.mubr.msk.f32.gmra.mrb[4].mxu1 %vm473_vm3, %v408_v12  ;;  %4310 = vmatmul.mubr.msk.f32.gmra.mrb[8].mxu0 %vm2028_vm6, %v1963_v7  ;;  %v6067_v35 = vpop.permute.xlu1 %2007  ;;  %v443_v41 = vpop.permute.xlu0 %442  ;;  %vm2029_vm3 = vcmp.eq.s32.totalorder %v6012_v49, 1  ;;  %vm2896_vm6 = vcmp.gt.f32.partialorder %v2857_v20, 0.5  ;;  %v2858_v12 = vld [vmem:[%s7113_s3 + $0x37] sm:$0xff]  ;;  %v335_v20 = vld [vmem:[%s5444_s24 + $0x49] sm:$0xff]  ;;  %v1966_v50 = vmax.f32 %v6126_v24, 0.0  ;;  %v6200_v16 = vadd.f32 %v6117_v23, %v1929_v53  ;;  %v3571_v53 = vld [vmem:[%s7111_s1 + $0x360] sm:$0xff] }
  0xd0   : > { %vm474_vm10 = vcmp.eq.s32.totalorder %v443_v41, 1  ;;  %2934 = vperm.xlu1 %4984, %v2920_v36   ;;  %4022 = vmatprep.mubr.msk.f32.mxu1 %vm4999_vm0, %v5000_v47  ;;  %v1928_v36 = vmul.f32 %v6086_v38, %v1902_v57  ;;  %v2922_v37 = vsel %vm2896_vm6, 1, %v4997_v3  ;;  %v411_v29 = vmax.f32 %v385_v8, 0.0  ;;  %v1904_v57 = vld [vmem:[%s5444_s24 + $0x65] sm:$0xff] }
  0xd1   : > { %1381 = vperm.xlu0 %4983, %v5683_v44   ;;  %4312 = vmatprep.mubr.msk.f32.mxu0 %vm4999_vm0, %v5000_v47  ;;  %v3568_v44 = vld [vmem:[%s7111_s1 + $0x348] sm:$0xff]  ;;  %vm1326_vm6 = vcmp.gt.f32.partialorder %v1287_v18, 0.5  ;;  %v3484_v24 = vld [vmem:[%s7111_s1 + $0x1e0] sm:$0xff] }
  0xd2   : > { %4702 = vmatprep.subr.bf16.mxu0 %v4998_v9  ;;  %4600 = vmatprep.subr.bf16.mxu1 %v4998_v9  ;;  %v4706_v30 = vpack.c.bf16 %v3568_v44, %v3567_v1  ;;  %v3569_v1 = vld [vmem:[%s7111_s1 + $0x350] sm:$0xff]  ;;  %v2860_v18 = vld [vmem:[%s7113_s3 + $0x47] sm:$0xff] }
  0xd3   : > { %4023 = vmatmul.mubr.msk.f32.gmra.mrb[6].mxu1 %vm474_vm10, %v409_v13  ;;  %4313 = vmatmul.mubr.msk.f32.gmra.mrb[10].mxu0 %vm2029_vm3, %v1964_v42  ;;  %v6111_v49 = vpop.permute.xlu1 %2010  ;;  %v446_v5 = vpop.permute.xlu0 %445  ;;  %vm2030_vm10 = vcmp.eq.s32.totalorder %v6038_v58, 1  ;;  %vm2897_vm3 = vcmp.gt.f32.partialorder %v2858_v12, 0.5  ;;  %v367_v13 = vmul.f32 %v6086_v38, %v334_v21  ;;  %v386_v58 = vadd.f32 %v6117_v23, %v366_v45  ;;  %v3449_v45 = vld [vmem:[%s7111_s1 + $0x130] sm:$0xff]  ;;  %v3450_v21 = vld [vmem:[%s7111_s1 + $0x138] sm:$0xff] }
  0xd4   : > { %4704 = vmatpush3.bf16.msra.mxu0 %v4703_v52  ;;  %vm475_vm11 = vcmp.eq.s32.totalorder %v446_v5, 1  ;;  %2937 = vperm.xlu1 %4984, %v2921_v55   ;;  %v6161_v52 = vadd.f32 %v6117_v23, %v1928_v36  ;;  %v2923_v55 = vsel %vm2897_vm3, 1, %v4997_v3  ;;  %v368_v5 = vmul.f32 %v6086_v38, %v335_v20 }
  0xd5   : > { %1384 = vperm.xlu0 %4983, %v5721_v6   ;;  %4025 = vmatprep.mubr.msk.f32.mxu1 %vm4999_vm0, %v5000_v47  ;;  %v387_v44 = vadd.f32 %v6117_v23, %v367_v13  ;;  %vm2031_vm3 = vcmp.eq.s32.totalorder %v6067_v35, 1  ;;  %v412_v12 = vmax.f32 %v386_v58, 0.0  ;;  %v1930_v36 = vmul.f32 %v6086_v38, %v1904_v57  ;;  %v1905_v13 = vld [vmem:[%s5444_s24 + $0x6d] sm:$0xff] }
  0xd6   : > { %4602 = vmatpush3.bf16.msra.mxu1 %v4601_v62  ;;  %4315 = vmatprep.mubr.msk.f32.mxu0 %vm4999_vm0, %v5000_v47  ;;  %v1352_v62 = vsel %vm1326_vm6, 1, %v4997_v3  ;;  %vm2898_vm6 = vcmp.gt.f32.partialorder %v2859_v43, 0.5  ;;  %v1967_v35 = vmax.f32 %v6161_v52, 0.0  ;;  %v6220_v58 = vadd.f32 %v6117_v23, %v368_v5  ;;  %v3486_v52 = vld [vmem:[%s7111_s1 + $0x1f0] sm:$0xff] }
  0xd7   : > { %4026 = vmatmul.mubr.msk.f32.gmra.mrb[8].mxu1 %vm475_vm11, %v410_v4  ;;  %4316 = vmatmul.mubr.msk.f32.gmra.mrb[12].mxu0 %vm2030_vm10, %v1965_v60  ;;  %v6151_v6 = vpop.permute.xlu1 %2013  ;;  %v449_v41 = vpop.permute.xlu0 %448  ;;  %vm2901_vm10 = vcmp.gt.f32.partialorder %v2862_v48, 0.5  ;;  %vm2899_vm1 = vcmp.gt.f32.partialorder %v2860_v18, 0.5  ;;  %v6240_v57 = vadd.f32 %v6117_v23, %v1930_v36  ;;  %v3452_v18 = vld [vmem:[%s7111_s1 + $0x148] sm:$0xff] }
  0xd8   : > { %4705 = vmatprep.subr.bf16.mxu0 %v4998_v9  ;;  %vm476_vm11 = vcmp.eq.s32.totalorder %v449_v41, 1  ;;  %2940 = vperm.xlu1 %4984, %v2922_v37   ;;  %v2927_v31 = vsel %vm2901_vm10, 1, %v4997_v3  ;;  %v2924_v41 = vsel %vm2898_vm6, 1, %v4997_v3  ;;  %vm2902_vm10 = vcmp.gt.f32.partialorder %v2863_v28, 0.5  ;;  %v3451_v28 = vld [vmem:[%s7111_s1 + $0x140] sm:$0xff] }
  0xd9   : > { %4707 = vmatpush3.bf16.msra.mxu0 %v4706_v30  ;;  %1387 = vperm.xlu0 %4983, %v5747_v27   ;;  %v3570_v27 = vld [vmem:[%s7111_s1 + $0x358] sm:$0xff]  ;;  %v2928_v5 = vsel %vm2902_vm10, 1, %v4997_v3 }
  0xda   : > { %4028 = vmatprep.mubr.msk.f32.mxu1 %vm4999_vm0, %v5000_v47  ;;  %4318 = vmatprep.mubr.msk.f32.mxu0 %vm4999_vm0, %v5000_v47  ;;  %v336_v30 = vld [vmem:[%s5444_s24 + $0x51] sm:$0xff]  ;;  %v4709_v37 = vpack.c.bf16 %v3570_v27, %v3569_v1  ;;  %v1931_v1 = vmul.f32 %v6086_v38, %v1905_v13 }
  0xdb   : > { %4029 = vmatmul.mubr.msk.f32.gmra.mrb[10].mxu1 %vm476_vm11, %v411_v29  ;;  %4603 = vmatprep.subr.bf16.mxu1 %v4998_v9  ;;  %v6188_v4 = vpop.permute.xlu1 %2016  ;;  %v452_v8 = vpop.permute.xlu0 %451  ;;  %v413_v29 = vmax.f32 %v387_v44, 0.0  ;;  %v369_v43 = vmul.f32 %v6086_v38, %v336_v30  ;;  %v2861_v27 = vld [vmem:[%s7113_s3 + $0x4f] sm:$0xff]  ;;  %v337_v44 = vld [vmem:[%s5444_s24 + $0x59] sm:$0xff] }
  0xdc   : > { %4319 = vmatmul.mubr.msk.f32.gmra.mrb[14].mxu0 %vm2031_vm3, %v1966_v50  ;;  %4605 = vmatpush3.bf16.msra.mxu1 %v4604_v46  ;;  %vm477_vm11 = vcmp.eq.s32.totalorder %v452_v8, 1  ;;  %v4607_v46 = vpack.c.bf16 %v3450_v21, %v3449_v45  ;;  %vm2032_vm3 = vcmp.eq.s32.totalorder %v6111_v49, 1  ;;  %v1968_v49 = vmax.f32 %v6200_v16, 0.0  ;;  %v1906_v45 = vld [vmem:[%s5444_s24 + $0x75] sm:$0xff] }
  0xdd   : > { %2943 = vperm.xlu1 %4984, %v2923_v55   ;;  %1390 = vperm.xlu0 %4983, %v1352_v62   ;;  %v3572_v55 = vld [vmem:[%s7111_s1 + $0x368] sm:$0xff]  ;;  %v2925_v8 = vsel %vm2899_vm1, 1, %v4997_v3  ;;  %v2866_v13 = vld [vmem:[%s7113_s3 + $0x77] sm:$0xff] }
  0xde   : > { %4031 = vmatprep.mubr.msk.f32.mxu1 %vm4999_vm0, %v5000_v47  ;;  %4321 = vmatprep.mubr.msk.f32.mxu0 %vm4999_vm0, %v5000_v47  ;;  %v2864_v62 = vld [vmem:[%s7113_s3 + $0x67] sm:$0xff]  ;;  %v4712_v30 = vpack.c.bf16 %v3572_v55, %v3571_v53 }
  0xdf   : > { %4032 = vmatmul.mubr.msk.f32.gmra.mrb[12].mxu1 %vm477_vm11, %v412_v12  ;;  %4708 = vmatprep.subr.bf16.mxu0 %v4998_v9  ;;  %v6225_v48 = vpop.permute.xlu1 %2019  ;;  %v455_v20 = vpop.permute.xlu0 %454  ;;  %v414_v12 = vmax.f32 %v6220_v58, 0.0  ;;  %vm2033_vm11 = vcmp.eq.s32.totalorder %v6151_v6, 1  ;;  %vm2903_vm1 = vcmp.gt.f32.partialorder %v2864_v62, 0.5  ;;  %v389_v6 = vadd.f32 %v6117_v23, %v369_v43  ;;  %v338_v58 = vld [vmem:[%s5444_s24 + $0x61] sm:$0xff] }
  0xe0   : > { %4322 = vmatmul.mubr.msk.f32.gmra.mrb[16].mxu0 %vm2032_vm3, %v1967_v35  ;;  %vm478_vm6 = vcmp.eq.s32.totalorder %v455_v20, 1  ;;  %4034 = vmatprep.mubr.msk.f32.mxu1 %vm4999_vm0, %v5000_v47  ;;  %vm2900_vm3 = vcmp.gt.f32.partialorder %v2861_v27, 0.5  ;;  %v4610_v20 = vpack.c.bf16 %v3452_v18, %v3451_v28  ;;  %v2929_v43 = vsel %vm2903_vm1, 1, %v4997_v3  ;;  %v3453_v18 = vld [vmem:[%s7111_s1 + $0x150] sm:$0xff] }
  0xe1   : > { %4710 = vmatpush3.bf16.msra.mxu0 %v4709_v37  ;;  %2955 = vperm.xlu1 %4984, %v2927_v31   ;;  %v1969_v37 = vmax.f32 %v6240_v57, 0.0  ;;  %v6274_v31 = vadd.f32 %v6117_v23, %v1931_v1  ;;  %v2926_v1 = vsel %vm2900_vm3, 1, %v4997_v3 }
  0xe2   : > { %2946 = vperm.xlu0 %4983, %v2924_v41   ;;  %4606 = vmatprep.subr.bf16.mxu1 %v4998_v9  ;;  %v370_v41 = vmul.f32 %v6086_v38, %v337_v44  ;;  %v415_v44 = vmax.f32 %v389_v6, 0.0  ;;  %v3454_v6 = vld [vmem:[%s7111_s1 + $0x158] sm:$0xff] }
  0xe3   : > { %4324 = vmatprep.mubr.msk.f32.mxu0 %vm4999_vm0, %v5000_v47  ;;  %4035 = vmatmul.mubr.msk.f32.gmra.mrb[14].mxu1 %vm478_vm6, %v413_v29  ;;  %v6261_v21 = vpop.permute.xlu1 %2022  ;;  %v458_v36 = vpop.permute.xlu0 %457  ;;  %v2865_v29 = vld [vmem:[%s7113_s3 + $0x6f] sm:$0xff]  ;;  %vm2034_vm6 = vcmp.eq.s32.totalorder %v6188_v4, 1  ;;  %v3574_v4 = vld [vmem:[%s7111_s1 + $0x378] sm:$0xff]  ;;  %v1970_v62 = vmax.f32 %v6274_v31, 0.0 }
  0xe4   : > { %4608 = vmatpush3.bf16.msra.mxu1 %v4607_v46  ;;  %4325 = vmatmul.mubr.msk.f32.gmra.mrb[18].mxu0 %vm2033_vm11, %v1968_v49  ;;  %vm479_vm10 = vcmp.eq.s32.totalorder %v458_v36, 1  ;;  %v1932_v46 = vmul.f32 %v6086_v38, %v1906_v45  ;;  %vm2905_vm11 = vcmp.gt.f32.partialorder %v2866_v13, 0.5  ;;  %vm2904_vm1 = vcmp.gt.f32.partialorder %v2865_v29, 0.5  ;;  %v339_v36 = vld [vmem:[%s5444_s24 + $0x69] sm:$0xff] }
  0xe5   : > { %4711 = vmatprep.subr.bf16.mxu0 %v4998_v9  ;;  %2958 = vperm.xlu1 %4984, %v2928_v5   ;;  %v3573_v5 = vld [vmem:[%s7111_s1 + $0x370] sm:$0xff]  ;;  %v390_v27 = vadd.f32 %v6117_v23, %v370_v41  ;;  %v2931_v28 = vsel %vm2905_vm11, 1, %v4997_v3 }
  0xe6   : > { %2949 = vperm.xlu0 %4983, %v2925_v8   ;;  %4037 = vmatprep.mubr.msk.f32.mxu1 %vm4999_vm0, %v5000_v47  ;;  %v371_v8 = vmul.f32 %v6086_v38, %v338_v58  ;;  %v6311_v45 = vadd.f32 %v6117_v23, %v1932_v46  ;;  %v2930_v46 = vsel %vm2904_vm1, 1, %v4997_v3  ;;  %v946_v29 = vld [vmem:[%s5444_s24 + $0xb] sm:$0xff]  ;;  %vm2036_vm1 = vcmp.eq.s32.totalorder %v6261_v21, 1 }
  0xe7   : > { %4327 = vmatprep.mubr.msk.f32.mxu0 %vm4999_vm0, %v5000_v47  ;;  %4713 = vmatpush3.bf16.msra.mxu0 %v4712_v30  ;;  %v6293_v53 = vpop.permute.xlu1 %2302  ;;  %v461_v55 = vpop.permute.xlu0 %460  ;;  %v4715_v30 = vpack.c.bf16 %v3574_v4, %v3573_v5  ;;  %v416_v58 = vmax.f32 %v390_v27, 0.0 }
  0xe8   : > { %4038 = vmatmul.mubr.msk.f32.gmra.mrb[16].mxu1 %vm479_vm10, %v414_v12  ;;  %4328 = vmatmul.mubr.msk.f32.gmra.mrb[20].mxu0 %vm2034_vm6, %v1969_v37  ;;  %vm480_vm3 = vcmp.eq.s32.totalorder %v461_v55, 1  ;;  %v2867_v12 = vld [vmem:[%s7113_s3 + $0x7f] sm:$0xff]  ;;  %vm2035_vm10 = vcmp.eq.s32.totalorder %v6225_v48, 1  ;;  %v391_v48 = vadd.f32 %v6117_v23, %v371_v8 }
  0xe9   : > { %4609 = vmatprep.subr.bf16.mxu1 %v4998_v9  ;;  %2961 = vperm.xlu1 %4984, %v2929_v43   ;;  %vm2906_vm6 = vcmp.gt.f32.partialorder %v2867_v12, 0.5  ;;  %v1971_v43 = vmax.f32 %v6311_v45, 0.0  ;;  %v3455_v55 = vld [vmem:[%s7111_s1 + $0x160] sm:$0xff]  ;;  %v972_v12 = vmul.f32 %v6086_v38, %v946_v29 }
  0xea   : > { %4611 = vmatpush3.bf16.msra.mxu1 %v4610_v20  ;;  %2952 = vperm.xlu0 %4983, %v2926_v1   ;;  %v372_v20 = vmul.f32 %v6086_v38, %v339_v36  ;;  %v4613_v1 = vpack.c.bf16 %v3454_v6, %v3453_v18  ;;  %v2932_v27 = vsel %vm2906_vm6, 1, %v4997_v3  ;;  %v3588_v8 = vld [vmem:[%s7111_s1 + $0x380] sm:$0xff]  ;;  %v3589_v36 = vld [vmem:[%s7111_s1 + $0x388] sm:$0xff]  ;;  %v947_v18 = vld [vmem:[%s5444_s24 + $0x13] sm:$0xff] }
  0xeb   : > { %4040 = vmatprep.mubr.msk.f32.mxu1 %vm4999_vm0, %v5000_v47  ;;  %4330 = vmatprep.mubr.msk.f32.mxu0 %vm4999_vm0, %v5000_v47  ;;  %v6330_v41 = vpop.permute.xlu1 %2305  ;;  %v464_v13 = vpop.permute.xlu0 %463  ;;  %v4718_v21 = vpack.c.bf16 %v3589_v36, %v3588_v8  ;;  %v3457_v6 = vld [vmem:[%s7111_s1 + $0x170] sm:$0xff]  ;;  %v985_v29 = vadd.f32 %v6117_v23, %v972_v12  ;;  %v3593_v12 = vld [vmem:[%s7111_s1 + $0x3a8] sm:$0xff]  ;;  %v3617_v45 = vld [vmem:[%s7111_s1 + $0x400] sm:$0xff] }
  0xec   : > { %4041 = vmatmul.mubr.msk.f32.gmra.mrb[18].mxu1 %vm480_vm3, %v415_v44  ;;  %4331 = vmatmul.mubr.msk.f32.gmra.mrb[22].mxu0 %vm2035_vm10, %v1970_v62  ;;  %vm481_vm11 = vcmp.eq.s32.totalorder %v464_v13, 1  ;;  %v3456_v44 = vld [vmem:[%s7111_s1 + $0x168] sm:$0xff]  ;;  %v3458_v13 = vld [vmem:[%s7111_s1 + $0x178] sm:$0xff]  ;;  %vm2340_vm10 = vcmp.eq.s32.totalorder %v6293_v53, 1 }
  0xed   : > { %4714 = vmatprep.subr.bf16.mxu0 %v4998_v9  ;;  %2967 = vperm.xlu1 %4984, %v2931_v28   ;;  %v392_v28 = vadd.f32 %v6117_v23, %v372_v20  ;;  %v4616_v3 = vpack.c.bf16 %v3456_v44, %v3455_v55  ;;  %v3590_v20 = vld [vmem:[%s7111_s1 + $0x390] sm:$0xff]  ;;  %v973_v55 = vmul.f32 %v6086_v38, %v947_v18  ;;  %v948_v44 = vld [vmem:[%s5444_s24 + $0x1b] sm:$0xff]  ;;  %v1011_v36 = vmax.f32 %v985_v29, 0.0 }
  0xee   : > { %4716 = vmatpush3.bf16.msra.mxu0 %v4715_v30  ;;  %2964 = vperm.xlu0 %4983, %v2930_v46   ;;  %v417_v30 = vmax.f32 %v391_v48, 0.0  ;;  %v4619_v53 = vpack.c.bf16 %v3458_v13, %v3457_v6  ;;  %v3595_v29 = vld [vmem:[%s7111_s1 + $0x3b8] sm:$0xff] }
  0xef   : > { %4043 = vmatprep.mubr.msk.f32.mxu1 %vm4999_vm0, %v5000_v47  ;;  %4333 = vmatprep.mubr.msk.f32.mxu0 %vm4999_vm0, %v5000_v47  ;;  %v6352_v5 = vpop.permute.xlu1 %2308  ;;  %v467_v4 = vpop.permute.xlu0 %466  ;;  %v418_v48 = vmax.f32 %v392_v28, 0.0  ;;  %v3592_v28 = vld [vmem:[%s7111_s1 + $0x3a0] sm:$0xff] }
  0xf0   : > { %4044 = vmatmul.mubr.msk.f32.gmra.mrb[20].mxu1 %vm481_vm11, %v416_v58  ;;  %4612 = vmatprep.subr.bf16.mxu1 %v4998_v9  ;;  %vm482_vm3 = vcmp.eq.s32.totalorder %v467_v4, 1  ;;  %vm2341_vm11 = vcmp.eq.s32.totalorder %v6330_v41, 1  ;;  %v949_v41 = vld [vmem:[%s5444_s24 + $0x23] sm:$0xff]  ;;  %v4724_v13 = vpack.c.bf16 %v3593_v12, %v3592_v28  ;;  %v951_v28 = vld [vmem:[%s5444_s24 + $0x33] sm:$0xff] }
  0xf1   : > { %4334 = vmatmul.mubr.msk.f32.gmra.mrb[24].mxu0 %vm2036_vm1, %v1971_v43  ;;  %4614 = vmatpush3.bf16.msra.mxu1 %v4613_v1  ;;  %v3591_v1 = vld [vmem:[%s7111_s1 + $0x398] sm:$0xff] }
  0xf2   : > { %2970 = vperm.xlu0 %4983, %v2932_v27   ;;  %4046 = vmatprep.mubr.msk.f32.mxu1 %vm4999_vm0, %v5000_v47  ;;  %v4721_v8 = vpack.c.bf16 %v3591_v1, %v3590_v20  ;;  %v975_v20 = vmul.f32 %v6086_v38, %v949_v41  ;;  %v3594_v1 = vld [vmem:[%s7111_s1 + $0x3b0] sm:$0xff] }
  0xf3   : > { %4368 = vmatprep.mubr.msk.f32.mxu0 %vm4999_vm0, %v5000_v47  ;;  %4717 = vmatprep.subr.bf16.mxu0 %v4998_v9  ;;  %v6381_v46 = vpop.permute.xlu1 %2311  ;;  %v470_v58 = vpop.permute.xlu0 %469 }
  0xf4   : > { %4047 = vmatmul.mubr.msk.f32.gmra.mrb[22].mxu1 %vm482_vm3, %v417_v30  ;;  %4615 = vmatprep.subr.bf16.mxu1 %v4998_v9  ;;  %vm483_vm6 = vcmp.eq.s32.totalorder %v470_v58, 1  ;;  %v6412_v30 = vadd.f32 %v6117_v23, %v973_v55  ;;  %vm2342_vm3 = vcmp.eq.s32.totalorder %v6352_v5, 1  ;;  %v950_v5 = vld [vmem:[%s5444_s24 + $0x2b] sm:$0xff] }
  0xf5   : > { %4369 = vmatmul.mubr.msk.f32.vlgmr.msra.gmra.mrb[0].mxu0 %vm2340_vm10, %v1960_v11  ;;  %4617 = vmatpush3.bf16.msra.mxu1 %v4616_v3  ;;  %v3473_v11 = vld [vmem:[%s7111_s1 + $0x188] sm:$0xff]  ;;  %v974_v3 = vmul.f32 %v6086_v38, %v948_v44 }
  0xf6   : > { %4719 = vmatpush3.bf16.msra.mxu0 %v4718_v21  ;;  %4049 = vmatprep.mubr.msk.f32.mxu1 %vm4999_vm0, %v5000_v47  ;;  %v4622_v18 = vpack.c.bf16 %v3473_v11, %v3472_v40  ;;  %v1012_v58 = vmax.f32 %v6412_v30, 0.0  ;;  %v6472_v40 = vadd.f32 %v6117_v23, %v975_v20  ;;  %v976_v11 = vmul.f32 %v6086_v38, %v950_v5  ;;  %v952_v20 = vld [vmem:[%s5444_s24 + $0x3b] sm:$0xff] }
  0xf7   : > { %4371 = vmatprep.mubr.msk.f32.mxu0 %vm4999_vm0, %v5000_v47  ;;  %4618 = vmatprep.subr.bf16.mxu1 %v4998_v9  ;;  %v6401_v4 = vpop.permute.xlu1 %2314  ;;  %v1039_v27 = vpop.permute.xlu0 %1038 }
  0xf8   : > { %4050 = vmatmul.mubr.msk.f32.gmra.mrb[24].mxu1 %vm483_vm6, %v418_v48  ;;  %4720 = vmatprep.subr.bf16.mxu0 %v4998_v9  ;;  %vm1076_vm1 = vcmp.eq.s32.totalorder %v1039_v27, 1  ;;  %v6441_v48 = vadd.f32 %v6117_v23, %v974_v3  ;;  %v4727_v27 = vpack.c.bf16 %v3595_v29, %v3594_v1  ;;  %vm2343_vm6 = vcmp.eq.s32.totalorder %v6381_v46, 1  ;;  %v3597_v46 = vld [vmem:[%s7111_s1 + $0x3c8] sm:$0xff] }
  0xf9   : > { %4372 = vmatmul.mubr.msk.f32.gmra.mrb[2].mxu0 %vm2341_vm11, %v1961_v33  ;;  %4620 = vmatpush3.bf16.msra.mxu1 %v4619_v53  ;;  %v3475_v33 = vld [vmem:[%s7111_s1 + $0x198] sm:$0xff] }
  0xfa   : > { %4084 = vmatprep.mubr.msk.f32.mxu1 %vm4999_vm0, %v5000_v47  ;;  %4374 = vmatprep.mubr.msk.f32.mxu0 %vm4999_vm0, %v5000_v47  ;;  %v4625_v55 = vpack.c.bf16 %v3475_v33, %v3474_v14  ;;  %v977_v14 = vmul.f32 %v6086_v38, %v951_v28  ;;  %v3598_v33 = vld [vmem:[%s7111_s1 + $0x3d0] sm:$0xff] }
  0xfb   : > { %4722 = vmatpush3.bf16.msra.mxu0 %v4721_v8  ;;  %v6428_v21 = vpop.permute.xlu1 %2317  ;;  %v1042_v6 = vpop.permute.xlu0 %1041  ;;  %4621 = vmatprep.subr.bf16.mxu1 %v4998_v9  ;;  %v1013_v8 = vmax.f32 %v6441_v48, 0.0 }
  0xfc   : > { %4085 = vmatmul.mubr.msk.f32.vlgmr.msra.gmra.mrb[0].mxu1 %vm1076_vm1, %v1011_v36  ;;  %4723 = vmatprep.subr.bf16.mxu0 %v4998_v9  ;;  %vm1077_vm10 = vcmp.eq.s32.totalorder %v1042_v6, 1  ;;  %v3596_v36 = vld [vmem:[%s7111_s1 + $0x3c0] sm:$0xff]  ;;  %vm2344_vm1 = vcmp.eq.s32.totalorder %v6401_v4, 1  ;;  %v1014_v6 = vmax.f32 %v6472_v40, 0.0  ;;  %v3599_v4 = vld [vmem:[%s7111_s1 + $0x3d8] sm:$0xff] }
  0xfd   : > { %4375 = vmatmul.mubr.msk.f32.gmra.mrb[4].mxu0 %vm2342_vm3, %v1962_v59  ;;  %4087 = vmatprep.mubr.msk.f32.mxu1 %vm4999_vm0, %v5000_v47  ;;  %v3477_v59 = vld [vmem:[%s7111_s1 + $0x1a8] sm:$0xff] }
  0xfe   : > { %4377 = vmatprep.mubr.msk.f32.mxu0 %vm4999_vm0, %v5000_v47  ;;  %4623 = vmatpush3.bf16.msra.mxu1 %v4622_v18  ;;  %v4628_v12 = vpack.c.bf16 %v3477_v59, %v3476_v26  ;;  %v4730_v18 = vpack.c.bf16 %v3597_v46, %v3596_v36  ;;  %v978_v26 = vmul.f32 %v6086_v38, %v952_v20  ;;  %v3600_v59 = vld [vmem:[%s7111_s1 + $0x3e0] sm:$0xff] }
  0xff   : > { %4725 = vmatpush3.bf16.msra.mxu0 %v4724_v13  ;;  %v6457_v53 = vpop.permute.xlu1 %2320  ;;  %v1045_v44 = vpop.permute.xlu0 %1044  ;;  %4624 = vmatprep.subr.bf16.mxu1 %v4998_v9  ;;  %v6502_v13 = vadd.f32 %v6117_v23, %v976_v11  ;;  %v953_v11 = vld [vmem:[%s5444_s24 + $0x43] sm:$0xff] }
 0x100   : > { %4088 = vmatmul.mubr.msk.f32.gmra.mrb[2].mxu1 %vm1077_vm10, %v1012_v58  ;;  %4726 = vmatprep.subr.bf16.mxu0 %v4998_v9  ;;  %vm1078_vm11 = vcmp.eq.s32.totalorder %v1045_v44, 1  ;;  %vm2345_vm10 = vcmp.eq.s32.totalorder %v6428_v21, 1  ;;  %v3601_v21 = vld [vmem:[%s7111_s1 + $0x3e8] sm:$0xff] }
 0x101   : > { %4378 = vmatmul.mubr.msk.f32.gmra.mrb[6].mxu0 %vm2343_vm6, %v1963_v7  ;;  %4090 = vmatprep.mubr.msk.f32.mxu1 %vm4999_vm0, %v5000_v47  ;;  %v3479_v7 = vld [vmem:[%s7111_s1 + $0x1b8] sm:$0xff]  ;;  %v1015_v44 = vmax.f32 %v6502_v13, 0.0 }
 0x102   : > { %4380 = vmatprep.mubr.msk.f32.mxu0 %vm4999_vm0, %v5000_v47  ;;  %4626 = vmatpush3.bf16.msra.mxu1 %v4625_v55  ;;  %v4631_v1 = vpack.c.bf16 %v3479_v7, %v3478_v61  ;;  %v4733_v55 = vpack.c.bf16 %v3599_v4, %v3598_v33  ;;  %v979_v61 = vmul.f32 %v6086_v38, %v953_v11  ;;  %v3602_v7 = vld [vmem:[%s7111_s1 + $0x3f0] sm:$0xff] }
 0x103   : > { %v6488_v3 = vpop.permute.xlu1 %2323  ;;  %v1048_v41 = vpop.permute.xlu0 %1047  ;;  %4728 = vmatpush3.bf16.msra.mxu0 %v4727_v27  ;;  %4627 = vmatprep.subr.bf16.mxu1 %v4998_v9  ;;  %v6533_v27 = vadd.f32 %v6117_v23, %v977_v14  ;;  %v954_v14 = vld [vmem:[%s5444_s24 + $0x4b] sm:$0xff] }
 0x104   : > { %4091 = vmatmul.mubr.msk.f32.gmra.mrb[4].mxu1 %vm1078_vm11, %v1013_v8  ;;  %4729 = vmatprep.subr.bf16.mxu0 %v4998_v9  ;;  %vm1079_vm3 = vcmp.eq.s32.totalorder %v1048_v41, 1  ;;  %vm2346_vm11 = vcmp.eq.s32.totalorder %v6457_v53, 1  ;;  %v3603_v53 = vld [vmem:[%s7111_s1 + $0x3f8] sm:$0xff] }
 0x105   : > { %4381 = vmatmul.mubr.msk.f32.gmra.mrb[8].mxu0 %vm2344_vm1, %v1964_v42  ;;  %4093 = vmatprep.mubr.msk.f32.mxu1 %vm4999_vm0, %v5000_v47  ;;  %v3481_v42 = vld [vmem:[%s7111_s1 + $0x1c8] sm:$0xff]  ;;  %v1016_v41 = vmax.f32 %v6533_v27, 0.0 }
 0x106   : > { %4383 = vmatprep.mubr.msk.f32.mxu0 %vm4999_vm0, %v5000_v47  ;;  %4629 = vmatpush3.bf16.msra.mxu1 %v4628_v12  ;;  %v4634_v36 = vpack.c.bf16 %v3481_v42, %v3480_v22  ;;  %v4736_v12 = vpack.c.bf16 %v3601_v21, %v3600_v59  ;;  %v980_v22 = vmul.f32 %v6086_v38, %v954_v14 }
 0x107   : > { %v6519_v29 = vpop.permute.xlu1 %2326  ;;  %v1051_v5 = vpop.permute.xlu0 %1050  ;;  %4731 = vmatpush3.bf16.msra.mxu0 %v4730_v18  ;;  %4630 = vmatprep.subr.bf16.mxu1 %v4998_v9  ;;  %v6564_v18 = vadd.f32 %v6117_v23, %v978_v26 }
 0x108   : > { %4094 = vmatmul.mubr.msk.f32.gmra.mrb[6].mxu1 %vm1079_vm3, %v1014_v6  ;;  %4732 = vmatprep.subr.bf16.mxu0 %v4998_v9  ;;  %vm1080_vm6 = vcmp.eq.s32.totalorder %v1051_v5, 1  ;;  %vm2347_vm3 = vcmp.eq.s32.totalorder %v6488_v3, 1  ;;  %v955_v3 = vld [vmem:[%s5444_s24 + $0x53] sm:$0xff]  ;;  %v6618_v11 = vadd.f32 %v6117_v23, %v980_v22 }
 0x109   : > { %4384 = vmatmul.mubr.msk.f32.gmra.mrb[10].mxu0 %vm2345_vm10, %v1965_v60  ;;  %4096 = vmatprep.mubr.msk.f32.mxu1 %vm4999_vm0, %v5000_v47  ;;  %v3483_v60 = vld [vmem:[%s7111_s1 + $0x1d8] sm:$0xff]  ;;  %v1017_v5 = vmax.f32 %v6564_v18, 0.0 }
 0x10a   : > { %4386 = vmatprep.mubr.msk.f32.mxu0 %vm4999_vm0, %v5000_v47  ;;  %4632 = vmatpush3.bf16.msra.mxu1 %v4631_v1  ;;  %v4637_v33 = vpack.c.bf16 %v3483_v60, %v3482_v54  ;;  %v4739_v1 = vpack.c.bf16 %v3603_v53, %v3602_v7  ;;  %v1019_v16 = vmax.f32 %v6618_v11, 0.0  ;;  %v2526_v53 = vld [vmem:[%s5444_s24 + $0x1e] sm:$0xff] }
 0x10b   : > { %v6550_v46 = vpop.permute.xlu1 %2329  ;;  %v1054_v28 = vpop.permute.xlu0 %1053  ;;  %4734 = vmatpush3.bf16.msra.mxu0 %v4733_v55  ;;  %4633 = vmatprep.subr.bf16.mxu1 %v4998_v9  ;;  %v6595_v55 = vadd.f32 %v6117_v23, %v979_v61  ;;  %v2842_v11 = vld [vmem:[%s5444_s24 + $0x1f] sm:$0xff] }
 0x10c   : > { %4097 = vmatmul.mubr.msk.f32.gmra.mrb[8].mxu1 %vm1080_vm6, %v1015_v44  ;;  %4735 = vmatprep.subr.bf16.mxu0 %v4998_v9  ;;  %vm1081_vm1 = vcmp.eq.s32.totalorder %v1054_v28, 1  ;;  %vm2348_vm6 = vcmp.eq.s32.totalorder %v6519_v29, 1  ;;  %v956_v29 = vld [vmem:[%s5444_s24 + $0x5b] sm:$0xff] }
 0x10d   : > { %4387 = vmatmul.mubr.msk.f32.gmra.mrb[12].mxu0 %vm2346_vm11, %v1966_v50  ;;  %4099 = vmatprep.mubr.msk.f32.mxu1 %vm4999_vm0, %v5000_v47  ;;  %v3485_v50 = vld [vmem:[%s7111_s1 + $0x1e8] sm:$0xff]  ;;  %v1018_v21 = vmax.f32 %v6595_v55, 0.0  ;;  %v2222_v28 = vld [vmem:[%s5444_s24 + $0x7d] sm:$0xff]  ;;  %v982_v61 = vmul.f32 %v6086_v38, %v956_v29 }
 0x10e   : > { %4389 = vmatprep.mubr.msk.f32.mxu0 %vm4999_vm0, %v5000_v47  ;;  %4635 = vmatpush3.bf16.msra.mxu1 %v4634_v36  ;;  %v4640_v42 = vpack.c.bf16 %v3485_v50, %v3484_v24  ;;  %v981_v36 = vmul.f32 %v6086_v38, %v955_v3  ;;  %v2248_v7 = vmul.f32 %v6086_v38, %v2222_v28  ;;  %v958_v24 = vld [vmem:[%s5444_s24 + $0x6b] sm:$0xff] }
 0x10f   : > { %v6581_v4 = vpop.permute.xlu1 %2332  ;;  %v1057_v20 = vpop.permute.xlu0 %1056  ;;  %4737 = vmatpush3.bf16.msra.mxu0 %v4736_v12  ;;  %4636 = vmatprep.subr.bf16.mxu1 %v4998_v9  ;;  %v2527_v50 = vld [vmem:[%s5444_s24 + $0x26] sm:$0xff] }
 0x110   : > { %4100 = vmatmul.mubr.msk.f32.gmra.mrb[10].mxu1 %vm1081_vm1, %v1016_v41  ;;  %4738 = vmatprep.subr.bf16.mxu0 %v4998_v9  ;;  %vm1082_vm10 = vcmp.eq.s32.totalorder %v1057_v20, 1  ;;  %vm2349_vm1 = vcmp.eq.s32.totalorder %v6550_v46, 1  ;;  %v957_v46 = vld [vmem:[%s5444_s24 + $0x63] sm:$0xff] }
 0x111   : > { %4390 = vmatmul.mubr.msk.f32.gmra.mrb[14].mxu0 %vm2347_vm3, %v1967_v35  ;;  %4102 = vmatprep.mubr.msk.f32.mxu1 %vm4999_vm0, %v5000_v47  ;;  %v3487_v35 = vld [vmem:[%s7111_s1 + $0x1f8] sm:$0xff]  ;;  %v983_v20 = vmul.f32 %v6086_v38, %v957_v46 }
 0x112   : > { %4392 = vmatprep.mubr.msk.f32.mxu0 %vm4999_vm0, %v5000_v47  ;;  %4638 = vmatpush3.bf16.msra.mxu1 %v4637_v33  ;;  %v4643_v12 = vpack.c.bf16 %v3487_v35, %v3486_v52  ;;  %v2553_v52 = vmul.f32 %v6086_v38, %v2527_v50  ;;  %v2528_v35 = vld [vmem:[%s5444_s24 + $0x2e] sm:$0xff]  ;;  %v2529_v46 = vld [vmem:[%s5444_s24 + $0x36] sm:$0xff] }
 0x113   : > { %v2336_v26 = vpop.permute.xlu1 %2335  ;;  %v1060_v59 = vpop.permute.xlu0 %1059  ;;  %4740 = vmatpush3.bf16.msra.mxu0 %v4739_v1  ;;  %4639 = vmatprep.subr.bf16.mxu1 %v4998_v9  ;;  %v2261_v1 = vadd.f32 %v6117_v23, %v2248_v7  ;;  %v2554_v7 = vmul.f32 %v6086_v38, %v2528_v35 }
 0x114   : > { %4103 = vmatmul.mubr.msk.f32.gmra.mrb[12].mxu1 %vm1082_vm10, %v1017_v5  ;;  %4741 = vmatprep.subr.bf16.mxu0 %v4998_v9  ;;  %vm1083_vm11 = vcmp.eq.s32.totalorder %v1060_v59, 1  ;;  %vm2350_vm10 = vcmp.eq.s32.totalorder %v6581_v4, 1  ;;  %v2552_v4 = vmul.f32 %v6086_v38, %v2526_v53 }
 0x115   : > { %4393 = vmatmul.mubr.msk.f32.gmra.mrb[16].mxu0 %vm2348_vm6, %v1968_v49  ;;  %4105 = vmatprep.mubr.msk.f32.mxu1 %vm4999_vm0, %v5000_v47  ;;  %v6636_v49 = vadd.f32 %v6117_v23, %v981_v36  ;;  %v2287_v59 = vmax.f32 %v2261_v1, 0.0  ;;  %v3620_v1 = vld [vmem:[%s7111_s1 + $0x418] sm:$0xff]  ;;  %v2567_v50 = vadd.f32 %v6117_v23, %v2554_v7 }
 0x116   : > { %4395 = vmatprep.mubr.msk.f32.mxu0 %vm4999_vm0, %v5000_v47  ;;  %4641 = vmatpush3.bf16.msra.mxu1 %v4640_v42  ;;  %v984_v42 = vmul.f32 %v6086_v38, %v958_v24 }
 0x117   : > { %v2339_v54 = vpop.permute.xlu1 %2338  ;;  %v1063_v60 = vpop.permute.xlu0 %1062  ;;  %4642 = vmatprep.subr.bf16.mxu1 %v4998_v9  ;;  %v1020_v57 = vmax.f32 %v6636_v49, 0.0  ;;  %v2593_v35 = vmax.f32 %v2567_v50, 0.0 }
 0x118   : > { %4106 = vmatmul.mubr.msk.f32.gmra.mrb[14].mxu1 %vm1083_vm11, %v1018_v21  ;;  %vm1084_vm3 = vcmp.eq.s32.totalorder %v1063_v60, 1  ;;  %vm2351_vm11 = vcmp.eq.s32.totalorder %v2336_v26, 1  ;;  %v2565_v26 = vadd.f32 %v6117_v23, %v2552_v4 }
 0x119   : > { %4396 = vmatmul.mubr.msk.f32.gmra.mrb[18].mxu0 %vm2349_vm1, %v1969_v37  ;;  %4108 = vmatprep.mubr.msk.f32.mxu1 %vm4999_vm0, %v5000_v47  ;;  %v6654_v37 = vadd.f32 %v6117_v23, %v982_v61  ;;  %v2566_v61 = vadd.f32 %v6117_v23, %v2553_v52  ;;  %v3621_v52 = vld [vmem:[%s7111_s1 + $0x420] sm:$0xff] }
 0x11a   : > { %4398 = vmatprep.mubr.msk.f32.mxu0 %vm4999_vm0, %v5000_v47  ;;  %4644 = vmatpush3.bf16.msra.mxu1 %v4643_v12  ;;  %v6693_v12 = vadd.f32 %v6117_v23, %v984_v42  ;;  %v2591_v60 = vmax.f32 %v2565_v26, 0.0  ;;  %v2530_v42 = vld [vmem:[%s5444_s24 + $0x3e] sm:$0xff] }
 0x11b   : > { %v2619_v14 = vpop.permute.xlu1 %2618  ;;  %v1066_v33 = vpop.permute.xlu0 %1065  ;;  %4765 = vmatprep.subr.bf16.mxu1 %v4998_v9  ;;  %v1021_v31 = vmax.f32 %v6654_v37, 0.0  ;;  %v2592_v24 = vmax.f32 %v2566_v61, 0.0  ;;  %v2844_v37 = vld [vmem:[%s5444_s24 + $0x2f] sm:$0xff] }
 0x11c   : > { %4109 = vmatmul.mubr.msk.f32.gmra.mrb[16].mxu1 %vm1084_vm3, %v1019_v16  ;;  %vm1085_vm6 = vcmp.eq.s32.totalorder %v1066_v33, 1  ;;  %vm2352_vm3 = vcmp.eq.s32.totalorder %v2339_v54, 1  ;;  %v1023_v4 = vmax.f32 %v6693_v12, 0.0  ;;  %v2846_v12 = vld [vmem:[%s5444_s24 + $0x3f] sm:$0xff] }
 0x11d   : > { %4399 = vmatmul.mubr.msk.f32.gmra.mrb[20].mxu0 %vm2350_vm10, %v1970_v62  ;;  %4111 = vmatprep.mubr.msk.f32.mxu1 %vm4999_vm0, %v5000_v47  ;;  %v6671_v62 = vadd.f32 %v6117_v23, %v983_v20  ;;  %v3619_v20 = vld [vmem:[%s7111_s1 + $0x410] sm:$0xff] }
 0x11e   : > { %4401 = vmatprep.mubr.msk.f32.mxu0 %vm4999_vm0, %v5000_v47 }
 0x11f   : > { %v2622_v22 = vpop.permute.xlu1 %2621  ;;  %v1069_v3 = vpop.permute.xlu0 %1068  ;;  %v1022_v28 = vmax.f32 %v6671_v62, 0.0  ;;  %v2845_v62 = vld [vmem:[%s5444_s24 + $0x37] sm:$0xff] }
 0x120   : > { %4112 = vmatmul.mubr.msk.f32.gmra.mrb[18].mxu1 %vm1085_vm6, %v1020_v57  ;;  %vm1086_vm1 = vcmp.eq.s32.totalorder %v1069_v3, 1  ;;  %vm2656_vm6 = vcmp.eq.s32.totalorder %v2619_v14, 1  ;;  %v2555_v3 = vmul.f32 %v6086_v38, %v2529_v46  ;;  %v4745_v14 = vpack.c.bf16 %v3620_v1, %v3619_v20  ;;  %v3622_v38 = vld [vmem:[%s7111_s1 + $0x428] sm:$0xff]  ;;  %v3623_v46 = vld [vmem:[%s7111_s1 + $0x430] sm:$0xff] }
 0x121   : > { %4402 = vmatmul.mubr.msk.f32.gmra.mrb[22].mxu0 %vm2351_vm11, %v1971_v43  ;;  %4114 = vmatprep.mubr.msk.f32.mxu1 %vm4999_vm0, %v5000_v47  ;;  %v3618_v43 = vld [vmem:[%s7111_s1 + $0x408] sm:$0xff] }
 0x122   : > { %4404 = vmatprep.mubr.msk.f32.mxu0 %vm4999_vm0, %v5000_v47  ;;  %v4742_v54 = vpack.c.bf16 %v3618_v43, %v3617_v45  ;;  %v6735_v45 = vld [vmem:[%s7114_s4] ss:$0 sm:$0xff] }
 0x123   : > { %v2625_v36 = vpop.permute.xlu1 %2624  ;;  %v1072_v29 = vpop.permute.xlu0 %1071  ;;  %v2556_v43 = vmul.f32 %v6735_v45, %v2530_v42  ;;  %v6778_v42 = vld [vmem:[%s7115_s5] ss:$0 sm:$0xff] }
 0x124   : > { %4115 = vmatmul.mubr.msk.f32.gmra.mrb[20].mxu1 %vm1086_vm1, %v1021_v31  ;;  %vm1087_vm10 = vcmp.eq.s32.totalorder %v1072_v29, 1  ;;  %vm2657_vm1 = vcmp.eq.s32.totalorder %v2622_v22, 1  ;;  %v2568_v29 = vadd.f32 %v6117_v23, %v2555_v3  ;;  %v4748_v22 = vpack.c.bf16 %v3622_v38, %v3621_v52 }
 0x125   : > { %4405 = vmatmul.mubr.msk.f32.gmra.mrb[24].mxu0 %vm2352_vm3, %v2287_v59  ;;  %4117 = vmatprep.mubr.msk.f32.mxu1 %vm4999_vm0, %v5000_v47  ;;  %v2569_v1 = vadd.f32 %v6117_v23, %v2556_v43  ;;  %v3626_v23 = vld [vmem:[%s7111_s1 + $0x448] sm:$0xff] }
 0x126   : > { %4439 = vmatprep.mubr.msk.f32.mxu0 %vm4999_vm0, %v5000_v47  ;;  %v2594_v20 = vmax.f32 %v2568_v29, 0.0  ;;  %v3628_v29 = vld [vmem:[%s7111_s1 + $0x458] sm:$0xff] }
 0x127   : > { %v2628_v53 = vpop.permute.xlu1 %2627  ;;  %v1075_v33 = vpop.permute.xlu0 %1074 }
 0x128   : > { %4118 = vmatmul.mubr.msk.f32.gmra.mrb[22].mxu1 %vm1087_vm10, %v1022_v28  ;;  %vm1088_vm11 = vcmp.eq.s32.totalorder %v1075_v33, 1  ;;  %v3624_v33 = vld [vmem:[%s7111_s1 + $0x438] sm:$0xff]  ;;  %vm2658_vm10 = vcmp.eq.s32.totalorder %v2625_v36, 1  ;;  %v2532_v36 = vld [vmem:[%s5444_s24 + $0x4e] sm:$0xff] }
 0x129   : > { %4440 = vmatmul.mubr.msk.f32.vlgmr.msra.gmra.mrb[0].mxu0 %vm2656_vm6, %v2591_v60  ;;  %4120 = vmatprep.mubr.msk.f32.mxu1 %vm4999_vm0, %v5000_v47  ;;  %v2531_v60 = vld [vmem:[%s5444_s24 + $0x46] sm:$0xff]  ;;  %v4751_v50 = vpack.c.bf16 %v3624_v33, %v3623_v46 }
 0x12a   : > { %4743 = vmatpush3.bf16.msra.mxu0 %v4742_v54  ;;  %4442 = vmatprep.mubr.msk.f32.mxu0 %vm4999_vm0, %v5000_v47  ;;  %v3629_v46 = vld [vmem:[%s7111_s1 + $0x460] sm:$0xff]  ;;  %v3630_v33 = vld [vmem:[%s7111_s1 + $0x468] sm:$0xff] }
 0x12b   : > { %v6718_v59 = vpop.permute.xlu1 %2630  ;;  %v1355_v26 = vpop.permute.xlu0 %1354  ;;  %4744 = vmatprep.subr.bf16.mxu0 %v4998_v9  ;;  %v4760_v13 = vpack.c.bf16 %v3630_v33, %v3629_v46  ;;  %v2843_v46 = vld [vmem:[%s5444_s24 + $0x27] sm:$0xff] }
 0x12c   : > { %4121 = vmatmul.mubr.msk.f32.gmra.mrb[24].mxu1 %vm1088_vm11, %v1023_v4  ;;  %vm1392_vm3 = vcmp.eq.s32.totalorder %v1355_v26, 1  ;;  %vm2659_vm11 = vcmp.eq.s32.totalorder %v2628_v53, 1  ;;  %v2558_v53 = vmul.f32 %v6735_v45, %v2532_v36  ;;  %v3631_v36 = vld [vmem:[%s7111_s1 + $0x470] sm:$0xff] }
 0x12d   : > { %4443 = vmatmul.mubr.msk.f32.gmra.mrb[2].mxu0 %vm2657_vm1, %v2592_v24  ;;  %4155 = vmatprep.mubr.msk.f32.mxu1 %vm4999_vm0, %v5000_v47  ;;  %v2557_v24 = vmul.f32 %v6735_v45, %v2531_v60 }
 0x12e   : > { %4445 = vmatprep.mubr.msk.f32.mxu0 %vm4999_vm0, %v5000_v47  ;;  %4746 = vmatpush3.bf16.msra.mxu0 %v4745_v14  ;;  %v2571_v43 = vadd.f32 %v6778_v42, %v2558_v53 }
 0x12f   : > { %v6741_v61 = vpop.permute.xlu1 %2633  ;;  %v1358_v7 = vpop.permute.xlu0 %1357  ;;  %4747 = vmatprep.subr.bf16.mxu0 %v4998_v9  ;;  %v2570_v26 = vadd.f32 %v6778_v42, %v2557_v24 }
 0x130   : > { %4156 = vmatmul.mubr.msk.f32.vlgmr.msra.gmra.mrb[0].mxu1 %vm1392_vm3, %v1012_v58  ;;  %vm1393_vm6 = vcmp.eq.s32.totalorder %v1358_v7, 1  ;;  %v3625_v58 = vld [vmem:[%s7111_s1 + $0x440] sm:$0xff]  ;;  %vm2660_vm3 = vcmp.eq.s32.totalorder %v6718_v59, 1 }
 0x131   : > { %4446 = vmatmul.mubr.msk.f32.gmra.mrb[4].mxu0 %vm2658_vm10, %v2593_v35  ;;  %4158 = vmatprep.mubr.msk.f32.mxu1 %vm4999_vm0, %v5000_v47  ;;  %v4754_v48 = vpack.c.bf16 %v3626_v23, %v3625_v58  ;;  %v3627_v35 = vld [vmem:[%s7111_s1 + $0x450] sm:$0xff]  ;;  %v2534_v59 = vld [vmem:[%s5444_s24 + $0x5e] sm:$0xff] }
 0x132   : > { %4448 = vmatprep.mubr.msk.f32.mxu0 %vm4999_vm0, %v5000_v47  ;;  %4749 = vmatpush3.bf16.msra.mxu0 %v4748_v22  ;;  %v4757_v40 = vpack.c.bf16 %v3628_v29, %v3627_v35  ;;  %v2538_v29 = vld [vmem:[%s5444_s24 + $0x7e] sm:$0xff] }
 0x133   : > { %v6760_v3 = vpop.permute.xlu1 %2636  ;;  %v1361_v30 = vpop.permute.xlu0 %1360  ;;  %4773 = vmatpush3.bf16.msra.mxu1 %v4742_v54  ;;  %4750 = vmatprep.subr.bf16.mxu0 %v4998_v9  ;;  %v2595_v54 = vmax.f32 %v2569_v1, 0.0  ;;  %v2560_v1 = vmul.f32 %v6735_v45, %v2534_v59 }
 0x134   : > { %4159 = vmatmul.mubr.msk.f32.gmra.mrb[2].mxu1 %vm1393_vm6, %v1013_v8  ;;  %4766 = vmatprep.subr.bf16.mxu1 %v4998_v9  ;;  %vm1394_vm1 = vcmp.eq.s32.totalorder %v1361_v30, 1  ;;  %v2533_v8 = vld [vmem:[%s5444_s24 + $0x56] sm:$0xff]  ;;  %vm2661_vm6 = vcmp.eq.s32.totalorder %v6741_v61, 1  ;;  %v2535_v61 = vld [vmem:[%s5444_s24 + $0x66] sm:$0xff] }
 0x135   : > { %4449 = vmatmul.mubr.msk.f32.gmra.mrb[6].mxu0 %vm2659_vm11, %v2594_v20  ;;  %4161 = vmatprep.mubr.msk.f32.mxu1 %vm4999_vm0, %v5000_v47  ;;  %v2559_v60 = vmul.f32 %v6735_v45, %v2533_v8  ;;  %v3632_v30 = vld [vmem:[%s7111_s1 + $0x478] sm:$0xff]  ;;  %v2573_v58 = vadd.f32 %v6778_v42, %v2560_v1  ;;  %v2561_v23 = vmul.f32 %v6735_v45, %v2535_v61 }
 0x136   : > { %4451 = vmatprep.mubr.msk.f32.mxu0 %vm4999_vm0, %v5000_v47  ;;  %4752 = vmatpush3.bf16.msra.mxu0 %v4751_v50  ;;  %v4763_v27 = vpack.c.bf16 %v3632_v30, %v3631_v36  ;;  %v2537_v8 = vld [vmem:[%s5444_s24 + $0x76] sm:$0xff]  ;;  %v2869_v1 = vmul.f32 %v6735_v45, %v2843_v46 }
 0x137   : > { %v6785_v52 = vpop.permute.xlu1 %2639  ;;  %v1364_v38 = vpop.permute.xlu0 %1363  ;;  %4774 = vmatpush3.bf16.msra.mxu1 %v4745_v14  ;;  %4753 = vmatprep.subr.bf16.mxu0 %v4998_v9  ;;  %v2596_v14 = vmax.f32 %v2570_v26, 0.0  ;;  %v2572_v20 = vadd.f32 %v6778_v42, %v2559_v60  ;;  %v2599_v26 = vmax.f32 %v2573_v58, 0.0  ;;  %v2574_v53 = vadd.f32 %v6778_v42, %v2561_v23  ;;  %v2849_v61 = vld [vmem:[%s5444_s24 + $0x57] sm:$0xff]  ;;  %v2850_v58 = vld [vmem:[%s5444_s24 + $0x5f] sm:$0xff] }
 0x138   : > { %4162 = vmatmul.mubr.msk.f32.gmra.mrb[4].mxu1 %vm1394_vm1, %v1014_v6  ;;  %4767 = vmatprep.subr.bf16.mxu1 %v4998_v9  ;;  %vm1395_vm10 = vcmp.eq.s32.totalorder %v1364_v38, 1  ;;  %vm2662_vm1 = vcmp.eq.s32.totalorder %v6760_v3, 1  ;;  %v2536_v3 = vld [vmem:[%s5444_s24 + $0x6e] sm:$0xff]  ;;  %v2563_v35 = vmul.f32 %v6735_v45, %v2537_v8  ;;  %v2564_v60 = vmul.f32 %v6735_v45, %v2538_v29 }
 0x139   : > { %4452 = vmatmul.mubr.msk.f32.gmra.mrb[8].mxu0 %vm2660_vm3, %v2595_v54  ;;  %4164 = vmatprep.mubr.msk.f32.mxu1 %vm4999_vm0, %v5000_v47  ;;  %v2882_v30 = vadd.f32 %v6778_v42, %v2869_v1  ;;  %v2872_v29 = vmul.f32 %v6735_v45, %v2846_v12 }
 0x13a   : > { %4454 = vmatprep.mubr.msk.f32.mxu0 %vm4999_vm0, %v5000_v47  ;;  %4755 = vmatpush3.bf16.msra.mxu0 %v4754_v48 }
 0x13b   : > { %v2643_v7 = vpop.permute.xlu1 %2642  ;;  %v1367_v6 = vpop.permute.xlu0 %1366  ;;  %4775 = vmatpush3.bf16.msra.mxu1 %v4748_v22  ;;  %4756 = vmatprep.subr.bf16.mxu0 %v4998_v9  ;;  %v2597_v22 = vmax.f32 %v2571_v43, 0.0  ;;  %v2576_v43 = vadd.f32 %v6778_v42, %v2563_v35 }
 0x13c   : > { %4165 = vmatmul.mubr.msk.f32.gmra.mrb[6].mxu1 %vm1395_vm10, %v1015_v44  ;;  %4768 = vmatprep.subr.bf16.mxu1 %v4998_v9  ;;  %vm1396_vm11 = vcmp.eq.s32.totalorder %v1367_v6, 1  ;;  %vm2663_vm10 = vcmp.eq.s32.totalorder %v6785_v52, 1  ;;  %v2600_v52 = vmax.f32 %v2574_v53, 0.0  ;;  %v1274_v6 = vld [vmem:[%s5444_s24 + $0x73] sm:$0xff]  ;;  %v2871_v53 = vmul.f32 %v6735_v45, %v2845_v62 }
 0x13d   : > { %4455 = vmatmul.mubr.msk.f32.gmra.mrb[10].mxu0 %vm2661_vm6, %v2596_v14  ;;  %4167 = vmatprep.mubr.msk.f32.mxu1 %vm4999_vm0, %v5000_v47  ;;  %v2602_v59 = vmax.f32 %v2576_v43, 0.0  ;;  %v1300_v33 = vmul.f32 %v6735_v45, %v1274_v6  ;;  %v2848_v6 = vld [vmem:[%s5444_s24 + $0x4f] sm:$0xff] }
 0x13e   : > { %4457 = vmatprep.mubr.msk.f32.mxu0 %vm4999_vm0, %v5000_v47  ;;  %4758 = vmatpush3.bf16.msra.mxu0 %v4757_v40  ;;  %v2884_v35 = vadd.f32 %v6778_v42, %v2871_v53 }
 0x13f   : > { %v2646_v24 = vpop.permute.xlu1 %2645  ;;  %v1370_v44 = vpop.permute.xlu0 %1369  ;;  %4776 = vmatpush3.bf16.msra.mxu1 %v4751_v50  ;;  %4759 = vmatprep.subr.bf16.mxu0 %v4998_v9  ;;  %v2598_v50 = vmax.f32 %v2572_v20, 0.0 }
 0x140   : > { %4168 = vmatmul.mubr.msk.f32.gmra.mrb[8].mxu1 %vm1396_vm11, %v1016_v41  ;;  %4769 = vmatprep.subr.bf16.mxu1 %v4998_v9  ;;  %vm1397_vm3 = vcmp.eq.s32.totalorder %v1370_v44, 1  ;;  %vm2664_vm11 = vcmp.eq.s32.totalorder %v2643_v7, 1  ;;  %v2868_v7 = vmul.f32 %v6735_v45, %v2842_v11  ;;  %v2875_v44 = vmul.f32 %v6735_v45, %v2849_v61 }
 0x141   : > { %4458 = vmatmul.mubr.msk.f32.gmra.mrb[12].mxu0 %vm2662_vm1, %v2597_v22  ;;  %4170 = vmatprep.mubr.msk.f32.mxu1 %vm4999_vm0, %v5000_v47  ;;  %v2874_v61 = vmul.f32 %v6735_v45, %v2848_v6 }
 0x142   : > { %4460 = vmatprep.mubr.msk.f32.mxu0 %vm4999_vm0, %v5000_v47  ;;  %4761 = vmatpush3.bf16.msra.mxu0 %v4760_v13  ;;  %v2881_v20 = vadd.f32 %v6778_v42, %v2868_v7  ;;  %v2853_v7 = vld [vmem:[%s5444_s24 + $0x77] sm:$0xff] }
 0x143   : > { %v2649_v41 = vpop.permute.xlu1 %2648  ;;  %4777 = vmatpush3.bf16.msra.mxu1 %v4754_v48  ;;  %4762 = vmatprep.subr.bf16.mxu0 %v4998_v9  ;;  %v2562_v48 = vmul.f32 %v6735_v45, %v2536_v3 }
 0x144   : > { %4171 = vmatmul.mubr.msk.f32.gmra.mrb[10].mxu1 %vm1397_vm3, %v1017_v5  ;;  %v1373_v54 = vpop.permute.xlu0 %1372  ;;  %4770 = vmatprep.subr.bf16.mxu1 %v4998_v9  ;;  %vm2665_vm3 = vcmp.eq.s32.totalorder %v2646_v24, 1  ;;  %v1313_v24 = vadd.f32 %v6778_v42, %v1300_v33  ;;  %v2907_v36 = vmax.f32 %v2881_v20, 0.0  ;;  %v2879_v33 = vmul.f32 %v6735_v45, %v2853_v7 }
 0x145   : > { %4461 = vmatmul.mubr.msk.f32.gmra.mrb[14].mxu0 %vm2663_vm10, %v2598_v50  ;;  %vm1398_vm6 = vcmp.eq.s32.totalorder %v1373_v54, 1  ;;  %4173 = vmatprep.mubr.msk.f32.mxu1 %vm4999_vm0, %v5000_v47  ;;  %v2575_v38 = vadd.f32 %v6778_v42, %v2562_v48  ;;  %v2870_v50 = vmul.f32 %v6735_v45, %v2844_v37  ;;  %v2908_v54 = vmax.f32 %v2882_v30, 0.0  ;;  %v2851_v48 = vld [vmem:[%s5444_s24 + $0x67] sm:$0xff]  ;;  %v2854_v37 = vld [vmem:[%s5444_s24 + $0x7f] sm:$0xff] }
 0x146   : > { %4463 = vmatprep.mubr.msk.f32.mxu0 %vm4999_vm0, %v5000_v47  ;;  %4764 = vmatpush3.bf16.msra.mxu0 %v4763_v27  ;;  %v1339_v3 = vmax.f32 %v1313_v24, 0.0  ;;  %v2880_v24 = vmul.f32 %v6735_v45, %v2854_v37  ;;  %v2887_v30 = vadd.f32 %v6778_v42, %v2874_v61 }
 0x147   : > { %v2652_v18 = vpop.permute.xlu1 %2651  ;;  %4778 = vmatpush3.bf16.msra.mxu1 %v4757_v40  ;;  %v2601_v14 = vmax.f32 %v2575_v38, 0.0  ;;  %v2577_v40 = vadd.f32 %v6778_v42, %v2564_v60 }
 0x148   : > { %4174 = vmatmul.mubr.msk.f32.gmra.mrb[12].mxu1 %vm1398_vm6, %v1018_v21  ;;  %v1376_v5 = vpop.permute.xlu0 %1375  ;;  %4771 = vmatprep.subr.bf16.mxu1 %v4998_v9  ;;  %vm2666_vm6 = vcmp.eq.s32.totalorder %v2649_v41, 1  ;;  %v2876_v41 = vmul.f32 %v6735_v45, %v2850_v58  ;;  %v2893_v62 = vadd.f32 %v6778_v42, %v2880_v24  ;;  %v6998_v24 = vld [vmem:[%s7112_s2] ss:$0 sm:$0xff] }
 0x149   : > { %4464 = vmatmul.mubr.msk.f32.gmra.mrb[16].mxu0 %vm2664_vm11, %v2599_v26  ;;  %vm1399_vm1 = vcmp.eq.s32.totalorder %v1376_v5, 1  ;;  %4176 = vmatprep.mubr.msk.f32.mxu1 %vm4999_vm0, %v5000_v47  ;;  %v2603_v22 = vmax.f32 %v2577_v40, 0.0  ;;  %v2883_v26 = vadd.f32 %v6778_v42, %v2870_v50  ;;  %v2877_v5 = vmul.f32 %v6735_v45, %v2851_v48 }
 0x14a   : > { %4466 = vmatprep.mubr.msk.f32.mxu0 %vm4999_vm0, %v5000_v47 }
 0x14b   : > { %v2655_v55 = vpop.permute.xlu1 %2654  ;;  %4779 = vmatpush3.bf16.msra.mxu1 %v4760_v13  ;;  %v2909_v38 = vmax.f32 %v2883_v26, 0.0  ;;  %v2890_v60 = vadd.f32 %v6778_v42, %v2877_v5 }
 0x14c   : > { %4177 = vmatmul.mubr.msk.f32.gmra.mrb[14].mxu1 %vm1399_vm1, %v1019_v16  ;;  %v1379_v21 = vpop.permute.xlu0 %1378  ;;  %4772 = vmatprep.subr.bf16.mxu1 %v4998_v9  ;;  %vm2667_vm1 = vcmp.eq.s32.totalorder %v2652_v18, 1  ;;  %v2889_v18 = vadd.f32 %v6778_v42, %v2876_v41 }
 0x14d   : > { %4467 = vmatmul.mubr.msk.f32.gmra.mrb[18].mxu0 %vm2665_vm3, %v2600_v52  ;;  %vm1400_vm10 = vcmp.eq.s32.totalorder %v1379_v21, 1  ;;  %4179 = vmatprep.mubr.msk.f32.mxu1 %vm4999_vm0, %v5000_v47  ;;  %v2847_v21 = vld [vmem:[%s5444_s24 + $0x47] sm:$0xff] }
 0x14e   : > { %4469 = vmatprep.mubr.msk.f32.mxu0 %vm4999_vm0, %v5000_v47  ;;  %v2915_v43 = vmax.f32 %v2889_v18, 0.0  ;;  %v2873_v40 = vmul.f32 %v6735_v45, %v2847_v21 }
 0x14f   : > { %v2935_v16 = vpop.permute.xlu1 %2934  ;;  %4780 = vmatpush3.bf16.msra.mxu1 %v4763_v27  ;;  %v2888_v27 = vadd.f32 %v6778_v42, %v2875_v44 }
 0x150   : > { %4180 = vmatmul.mubr.msk.f32.gmra.mrb[16].mxu1 %vm1400_vm10, %v1020_v57  ;;  %v1382_v9 = vpop.permute.xlu0 %1381  ;;  %vm2668_vm10 = vcmp.eq.s32.totalorder %v2655_v55, 1  ;;  %v2852_v55 = vld [vmem:[%s5444_s24 + $0x6f] sm:$0xff]  ;;  %v2886_v1 = vadd.f32 %v6778_v42, %v2873_v40 }
 0x151   : > { %4470 = vmatmul.mubr.msk.f32.gmra.mrb[20].mxu0 %vm2666_vm6, %v2601_v14  ;;  %vm1401_vm11 = vcmp.eq.s32.totalorder %v1382_v9, 1  ;;  %4182 = vmatprep.mubr.msk.f32.mxu1 %vm4999_vm0, %v5000_v47  ;;  %v2914_v8 = vmax.f32 %v2888_v27, 0.0  ;;  %v2878_v11 = vmul.f32 %v6735_v45, %v2852_v55  ;;  %v2910_v9 = vmax.f32 %v2884_v35, 0.0 }
 0x152   : > { %4472 = vmatprep.mubr.msk.f32.mxu0 %vm4999_vm0, %v5000_v47  ;;  %v2913_v45 = vmax.f32 %v2887_v30, 0.0 }
 0x153   : > { %v2938_v49 = vpop.permute.xlu1 %2937 }
 0x154   : > { %4183 = vmatmul.mubr.msk.f32.gmra.mrb[18].mxu1 %vm1401_vm11, %v1021_v31  ;;  %v1385_v57 = vpop.permute.xlu0 %1384  ;;  %vm2972_vm11 = vcmp.eq.s32.totalorder %v2935_v16, 1 }
 0x155   : > { %4473 = vmatmul.mubr.msk.f32.gmra.mrb[22].mxu0 %vm2667_vm1, %v2602_v59  ;;  %vm1402_vm3 = vcmp.eq.s32.totalorder %v1385_v57, 1  ;;  %4185 = vmatprep.mubr.msk.f32.mxu1 %vm4999_vm0, %v5000_v47  ;;  %v2885_v59 = vadd.f32 %v6778_v42, %v2872_v29  ;;  %v2891_v57 = vadd.f32 %v6778_v42, %v2878_v11 }
 0x156   : > { %4475 = vmatprep.mubr.msk.f32.mxu0 %vm4999_vm0, %v5000_v47 }
 0x157   : > { %v2941_v31 = vpop.permute.xlu1 %2940  ;;  %v2911_v20 = vmax.f32 %v2885_v59, 0.0 }
 0x158   : > { %4186 = vmatmul.mubr.msk.f32.gmra.mrb[20].mxu1 %vm1402_vm3, %v1022_v28  ;;  %v1388_v13 = vpop.permute.xlu0 %1387  ;;  %vm2973_vm3 = vcmp.eq.s32.totalorder %v2938_v49, 1  ;;  %v2916_v49 = vmax.f32 %v2890_v60, 0.0 }
 0x159   : > { %4476 = vmatmul.mubr.msk.f32.gmra.mrb[24].mxu0 %vm2668_vm10, %v2603_v22  ;;  %vm1403_vm6 = vcmp.eq.s32.totalorder %v1388_v13, 1  ;;  %4188 = vmatprep.mubr.msk.f32.mxu1 %vm4999_vm0, %v5000_v47  ;;  %v2892_v13 = vadd.f32 %v6778_v42, %v2879_v33 }
 0x15a   : > { %4510 = vmatprep.mubr.msk.f32.mxu0 %vm4999_vm0, %v5000_v47 }
 0x15b   : > { %v2918_v58 = vmax.f32 %v2892_v13, 0.0 }
 0x15c   : > { %4189 = vmatmul.mubr.msk.f32.gmra.mrb[22].mxu1 %vm1403_vm6, %v1023_v4  ;;  %v2944_v28 = vpop.permute.xlu1 %2943  ;;  %v1391_v23 = vpop.permute.xlu0 %1390  ;;  %vm2974_vm6 = vcmp.eq.s32.totalorder %v2941_v31, 1  ;;  %v2917_v31 = vmax.f32 %v2891_v57, 0.0 }
 0x15d   : > { %4511 = vmatmul.mubr.msk.f32.vlgmr.msra.gmra.mrb[0].mxu0 %vm2972_vm11, %v2907_v36  ;;  %vm1404_vm1 = vcmp.eq.s32.totalorder %v1391_v23, 1  ;;  %4191 = vmatprep.mubr.msk.f32.mxu1 %vm4999_vm0, %v5000_v47  ;;  %v2912_v36 = vmax.f32 %v2886_v1, 0.0  ;;  %v2919_v23 = vmax.f32 %v2893_v62, 0.0 }
 0x15e   : > { %4513 = vmatprep.mubr.msk.f32.mxu0 %vm4999_vm0, %v5000_v47 }
 0x160   : > { %4192 = vmatmul.mubr.msk.f32.gmra.mrb[24].mxu1 %vm1404_vm1, %v1339_v3  ;;  %v2956_v4 = vpop.permute.xlu1 %2955  ;;  %vm2975_vm1 = vcmp.eq.s32.totalorder %v2944_v28, 1 }
 0x161   : > { %4514 = vmatmul.mubr.msk.f32.gmra.mrb[2].mxu0 %vm2973_vm3, %v2908_v54  ;;  %vm2979_vm10 = vcmp.eq.s32.totalorder %v2956_v4, 1  ;;  %v2947_v52 = vpop.permute.xlu0 %2946  ;;  %4531 = vmatprep.mubr.msk.f32.mxu1 %vm4999_vm0, %v5000_v47 }
 0x162   : > { %4516 = vmatprep.mubr.msk.f32.mxu0 %vm4999_vm0, %v5000_v47 }
 0x164   : > { %4532 = vmatmul.mubr.msk.f32.vlgmr.msra.gmra.mrb[26].mxu1 %vm2979_vm10, %v2914_v8  ;;  %v2959_v14 = vpop.permute.xlu1 %2958  ;;  %vm2976_vm10 = vcmp.eq.s32.totalorder %v2947_v52, 1 }
 0x165   : > { %4517 = vmatmul.mubr.msk.f32.gmra.mrb[4].mxu0 %vm2974_vm6, %v2909_v38  ;;  %vm2980_vm11 = vcmp.eq.s32.totalorder %v2959_v14, 1  ;;  %v2950_v16 = vpop.permute.xlu0 %2949  ;;  %4534 = vmatprep.mubr.msk.f32.mxu1 %vm4999_vm0, %v5000_v47 }
 0x166   : > { %4519 = vmatprep.mubr.msk.f32.mxu0 %vm4999_vm0, %v5000_v47 }
 0x168   : > { %4535 = vmatmul.mubr.msk.f32.gmra.mrb[28].mxu1 %vm2980_vm11, %v2915_v43  ;;  %v2962_v46 = vpop.permute.xlu1 %2961  ;;  %vm2977_vm11 = vcmp.eq.s32.totalorder %v2950_v16, 1 }
 0x169   : > { %4520 = vmatmul.mubr.msk.f32.gmra.mrb[6].mxu0 %vm2975_vm1, %v2910_v9  ;;  %vm2981_vm3 = vcmp.eq.s32.totalorder %v2962_v46, 1  ;;  %v2953_v22 = vpop.permute.xlu0 %2952  ;;  %4537 = vmatprep.mubr.msk.f32.mxu1 %vm4999_vm0, %v5000_v47 }
 0x16a   : > { %4522 = vmatprep.mubr.msk.f32.mxu0 %vm4999_vm0, %v5000_v47 }
 0x16c   : > { %4538 = vmatmul.mubr.msk.f32.gmra.mrb[30].mxu1 %vm2981_vm3, %v2916_v49  ;;  %v2968_v50 = vpop.permute.xlu1 %2967  ;;  %vm2978_vm3 = vcmp.eq.s32.totalorder %v2953_v22, 1 }
 0x16d   : > { %4523 = vmatmul.mubr.msk.f32.gmra.mrb[8].mxu0 %vm2976_vm10, %v2911_v20  ;;  %v2965_v44 = vpop.permute.xlu0 %2964  ;;  %4540 = vmatprep.mubr.msk.f32.mxu1 %vm4999_vm0, %v5000_v47  ;;  %vm2983_vm1 = vcmp.eq.s32.totalorder %v2968_v50, 1 }
 0x16e   : > { %vm2982_vm6 = vcmp.eq.s32.totalorder %v2965_v44, 1  ;;  %4525 = vmatprep.mubr.msk.f32.mxu0 %vm4999_vm0, %v5000_v47 }
 0x170   : > { %4541 = vmatmul.mubr.msk.f32.gmra.mrb[32].mxu1 %vm2982_vm6, %v2917_v31 }
 0x171   : > { %4526 = vmatmul.mubr.msk.f32.gmra.mrb[10].mxu0 %vm2977_vm11, %v2912_v36  ;;  %4543 = vmatprep.mubr.msk.f32.mxu1 %vm4999_vm0, %v5000_v47  ;;  %v2971_v28 = vpop.permute.xlu0 %2970 }
 0x172   : > { %4528 = vmatprep.mubr.msk.f32.mxu0 %vm4999_vm0, %v5000_v47  ;;  %vm2984_vm10 = vcmp.eq.s32.totalorder %v2971_v28, 1 }
 0x174   : > { %4544 = vmatmul.mubr.msk.f32.gmra.mrb[34].mxu1 %vm2983_vm1, %v2918_v58 }
 0x175   : > { %4529 = vmatmul.mubr.msk.f32.gmra.mrb[12].mxu0 %vm2978_vm3, %v2913_v45  ;;  %4546 = vmatprep.mubr.msk.f32.mxu1 %vm4999_vm0, %v5000_v47  ;;  %vm7122_vm0 = vcmp.eq.s32.totalorder %v5778_v51, 1 }
 0x178   : > { %4547 = vmatmul.mubr.msk.f32.gmra.mrb[36].mxu1 %vm2984_vm10, %v2919_v23 }
 0x203   : > { %v1501_v42 = vpop.f32.mrb[0].mxu1 }
 0x204   : > { %v4157_v3 = vpop.f32.mrb[1].mxu1 }
 0x207   : > { %v1506_v27 = vpop.f32.mrb[2].mxu1 }
 0x208   : > { %v4160_v41 = vpop.f32.mrb[3].mxu1 }
 0x20b   : > { %v1511_v54 = vpop.f32.mrb[4].mxu1 }
 0x20c   : > { %v4163_v26 = vpop.f32.mrb[5].mxu1 }
 0x20f   : > { %v6981_v53 = vpop.f32.mrb[6].mxu1 }
 0x210   : > { %v4166_v48 = vpop.f32.mrb[7].mxu1 }
 0x213   : > { %v6983_v12 = vpop.f32.mrb[8].mxu1 }
 0x214   : > { %v4169_v4 = vpop.f32.mrb[9].mxu1 }
 0x217   : > { %v6985_v8 = vpop.f32.mrb[10].mxu1 }
 0x218   : > { %v2800_v18 = vpop.f32.mrb[14].mxu0  ;;  %v4172_v5 = vpop.f32.mrb[11].mxu1 }
 0x219   : > { %v4462_v52 = vpop.f32.mrb[15].mxu0 }
 0x21b   : > { %v6987_v38 = vpop.f32.mrb[12].mxu1 }
 0x21c   : > { %v2805_v47 = vpop.f32.mrb[16].mxu0  ;;  %v4175_v35 = vpop.f32.mrb[13].mxu1 }
 0x21d   : > { %v4465_v29 = vpop.f32.mrb[17].mxu0 }
 0x21f   : > { %v1536_v55 = vpop.f32.mrb[14].mxu1 }
 0x220   : > { %v4788_v21 = vadd.f32 %v2800_v18, %v1536_v55  ;;  %v2810_v14 = vpop.f32.mrb[18].mxu0  ;;  %v4178_v43 = vpop.f32.mrb[15].mxu1 }
 0x221   : > { %v4468_v60 = vpop.f32.mrb[19].mxu0 }
 0x223   : > { %v1541_v11 = vpop.f32.mrb[16].mxu1 }
 0x224   : > { %v4790_v16 = vadd.f32 %v2805_v47, %v1541_v11  ;;  %v2815_v9 = vpop.f32.mrb[20].mxu0  ;;  %v4181_v59 = vpop.f32.mrb[17].mxu1 }
 0x225   : > { %v4471_v40 = vpop.f32.mrb[21].mxu0 }
 0x227   : > { %v1546_v7 = vpop.f32.mrb[18].mxu1 }
 0x228   : > { %v6989_v6 = vadd.f32 %v2810_v14, %v1546_v7  ;;  %v2820_v46 = vpop.f32.mrb[22].mxu0  ;;  %v4184_v49 = vpop.f32.mrb[19].mxu1 }
 0x229   : > { %v4474_v57 = vpop.f32.mrb[23].mxu0 }
 0x22b   : > { %v1551_v33 = vpop.f32.mrb[20].mxu1 }
 0x22c   : > { %v6991_v22 = vadd.f32 %v2815_v9, %v1551_v33  ;;  %v2825_v20 = vpop.f32.mrb[24].mxu0  ;;  %v4187_v1 = vpop.f32.mrb[21].mxu1 }
 0x22d   : > { %v4477_v61 = vpop.f32.mrb[25].mxu0 }
 0x22f   : > { %v1556_v37 = vpop.f32.mrb[22].mxu1 }
 0x230   : > { %v6993_v31 = vadd.f32 %v2820_v46, %v1556_v37  ;;  %v3081_v13 = vpop.f32.mrb[0].mxu0  ;;  %v4190_v44 = vpop.f32.mrb[23].mxu1 }
 0x231   : > { %v4781_v36 = vadd.f32 %v3081_v13, %v1501_v42  ;;  %v4512_v30 = vpop.f32.mrb[1].mxu0 }
 0x233   : > { %v3242_v50 = vadd.f32 %v4781_v36, %v6998_v24  ;;  %v1561_v58 = vpop.f32.mrb[24].mxu1  ;;  %v3189_v23 = vmul.f32 %v4781_v36, %v4781_v36  ;;  %v3158_v26 = vsel %vm1708_vm13, %v4781_v36, 0.0 }
 0x234   : > { %v7001_v62 = vadd.f32 %v2825_v20, %v1561_v58  ;;  %v3086_v45 = vpop.f32.mrb[2].mxu0  ;;  %v4193_v28 = vpop.f32.mrb[25].mxu1 }
 0x235   : > { %3258 = vst [vmem:[%s6969_s12 + $0x14] sm:$0xff] %v3242_v50  ;;  %v4782_v3 = vadd.f32 %v3086_v45, %v1506_v27  ;;  %v4515_v41 = vpop.f32.mrb[3].mxu0  ;;  %v3202_v27 = vsel %vm1708_vm13, %v3189_v23, 0.0  ;;  %vm7123_vm13 = vmmov %vm7122_vm0 }
 0x237   : > { %v3159_v48 = vsel %vm1709_vm15, %v4782_v3, 0.0  ;;  %v3190_v42 = vmul.f32 %v4782_v3, %v4782_v3  ;;  %v3243_v4 = vadd.f32 %v4782_v3, %v6998_v24  ;;  %v3116_v18 = vpop.f32.mrb[26].mxu1 }
 0x238   : > { %v3171_v5 = vadd.f32 %v3159_v48, %v3158_v26  ;;  %v3091_v52 = vpop.f32.mrb[4].mxu0  ;;  %v7009_v47 = vadd.f32 %v4788_v21, %v3116_v18  ;;  %v4533_v35 = vpop.f32.mrb[27].mxu1 }
 0x239   : > { %v3203_v29 = vsel %vm1709_vm15, %v3190_v42, 0.0  ;;  %3259 = vst [vmem:[%s6969_s12 + $0x1c] sm:$0xff] %v3243_v4  ;;  %v4783_v55 = vadd.f32 %v3091_v52, %v1511_v54  ;;  %v4518_v14 = vpop.f32.mrb[5].mxu0  ;;  %vm7124_vm15 = vcmp.eq.s32.totalorder %v5804_v10, 1 }
 0x23a   : > { %v3215_v43 = vadd.f32 %v3203_v29, %v3202_v27  ;;  %v3249_v60 = vadd.f32 %v7009_v47, %v6998_v24 }
 0x23b   : > { %v3160_v11 = vsel %vm1710_vm2, %v4783_v55, 0.0  ;;  %v3191_v21 = vmul.f32 %v4783_v55, %v4783_v55  ;;  %v3244_v9 = vadd.f32 %v4783_v55, %v6998_v24  ;;  %v3121_v59 = vpop.f32.mrb[28].mxu1 }
 0x23c   : > { %v3172_v0 = vadd.f32 %v3171_v5, %v3160_v11  ;;  %3265 = vst [vmem:[%s6969_s12 + $0x4c] sm:$0xff] %v3249_v60  ;;  %v3096_v17 = vpop.f32.mrb[6].mxu0  ;;  %v7022_v40 = vadd.f32 %v4790_v16, %v3121_v59  ;;  %v4536_v7 = vpop.f32.mrb[29].mxu1 }
 0x23d   : > { %v3204_v54 = vsel %vm1710_vm2, %v3191_v21, 0.0  ;;  %3260 = vst [vmem:[%s6969_s12 + $0x24] sm:$0xff] %v3244_v9  ;;  %v4784_v46 = vadd.f32 %v3096_v17, %v6981_v53  ;;  %v4521_v49 = vpop.f32.mrb[7].mxu0  ;;  %v3196_v21 = vmul.f32 %v7009_v47, %v7009_v47  ;;  %v3165_v7 = vsel %vm1715_vm14, %v7009_v47, 0.0  ;;  %vm7125_vm2 = vmmov %vm7124_vm15 }
 0x23e   : > { %v3216_v57 = vadd.f32 %v3215_v43, %v3204_v54  ;;  %v3250_v33 = vadd.f32 %v7022_v40, %v6998_v24  ;;  %v3197_v54 = vmul.f32 %v7022_v40, %v7022_v40 }
 0x23f   : > { %v3161_v20 = vsel %vm1711_vm8, %v4784_v46, 0.0  ;;  %v3192_v1 = vmul.f32 %v4784_v46, %v4784_v46  ;;  %v3245_v16 = vadd.f32 %v4784_v46, %v6998_v24  ;;  %v3126_v61 = vpop.f32.mrb[30].mxu1 }
 0x240   : > { %v3173_v37 = vadd.f32 %v3172_v0, %v3161_v20  ;;  %3266 = vst [vmem:[%s6969_s12 + $0x54] sm:$0xff] %v3250_v33  ;;  %v3101_v63 = vpop.f32.mrb[8].mxu0  ;;  %v4793_v13 = vadd.f32 %v6989_v6, %v3126_v61  ;;  %v4539_v44 = vpop.f32.mrb[31].mxu1  ;;  %v3209_v33 = vsel %vm1715_vm14, %v3196_v21, 0.0  ;;  %v3210_v61 = vsel %vm1716_vm5, %v3197_v54, 0.0 }
 0x241   : > { %v3205_v53 = vsel %vm1711_vm8, %v3192_v1, 0.0  ;;  %3261 = vst [vmem:[%s6969_s12 + $0x2c] sm:$0xff] %v3245_v16  ;;  %v4785_v36 = vadd.f32 %v3101_v63, %v6983_v12  ;;  %v4524_v30 = vpop.f32.mrb[9].mxu0  ;;  %vm7126_vm8 = vcmp.eq.s32.totalorder %v5829_v32, 1 }
 0x242   : > { %v3217_v50 = vadd.f32 %v3216_v57, %v3205_v53  ;;  %v3251_v58 = vadd.f32 %v4793_v13, %v6998_v24  ;;  %v3198_v20 = vmul.f32 %v4793_v13, %v4793_v13  ;;  %v3167_v19 = vsel %vm1717_vm7, %v4793_v13, 0.0 }
 0x243   : > { %v3162_v45 = vsel %vm1712_vm12, %v4785_v36, 0.0  ;;  %v3193_v28 = vmul.f32 %v4785_v36, %v4785_v36  ;;  %v3246_v23 = vadd.f32 %v4785_v36, %v6998_v24  ;;  %v3131_v3 = vpop.f32.mrb[32].mxu1 }
 0x244   : > { %v3174_v6 = vadd.f32 %v3173_v37, %v3162_v45  ;;  %3267 = vst [vmem:[%s6969_s12 + $0x5c] sm:$0xff] %v3251_v58  ;;  %v3106_v15 = vpop.f32.mrb[10].mxu0  ;;  %v4795_v41 = vadd.f32 %v6991_v22, %v3131_v3  ;;  %v4542_v26 = vpop.f32.mrb[33].mxu1  ;;  %v3211_v44 = vsel %vm1717_vm7, %v3198_v20, 0.0 }
 0x245   : > { %v3206_v12 = vsel %vm1712_vm12, %v3193_v28, 0.0  ;;  %3262 = vst [vmem:[%s6969_s12 + $0x34] sm:$0xff] %v3246_v23  ;;  %v4786_v48 = vadd.f32 %v3106_v15, %v6985_v8  ;;  %v4527_v42 = vpop.f32.mrb[11].mxu0  ;;  %vm7127_vm12 = vmmov %vm7126_vm8 }
 0x246   : > { %v3218_v4 = vadd.f32 %v3217_v50, %v3206_v12  ;;  %v3252_v18 = vadd.f32 %v4795_v41, %v6998_v24  ;;  %v3199_v37 = vmul.f32 %v4795_v41, %v4795_v41 }
 0x247   : > { %v3163_v5 = vsel %vm1713_vm4, %v4786_v48, 0.0  ;;  %v3194_v52 = vmul.f32 %v4786_v48, %v4786_v48  ;;  %v3247_v35 = vadd.f32 %v4786_v48, %v6998_v24  ;;  %v3136_v27 = vpop.f32.mrb[34].mxu1 }
 0x248   : > { %v3175_v22 = vadd.f32 %v3174_v6, %v3163_v5  ;;  %3268 = vst [vmem:[%s6969_s12 + $0x64] sm:$0xff] %v3252_v18  ;;  %v3111_v34 = vpop.f32.mrb[12].mxu0  ;;  %v4797_v29 = vadd.f32 %v6993_v31, %v3136_v27  ;;  %v4545_v55 = vpop.f32.mrb[35].mxu1  ;;  %v3212_v2 = vsel %vm7123_vm13, %v3199_v37, 0.0 }
 0x249   : > { %v3207_v8 = vsel %vm1713_vm4, %v3194_v52, 0.0  ;;  %3263 = vst [vmem:[%s6969_s12 + $0x3c] sm:$0xff] %v3247_v35  ;;  %v4787_v14 = vadd.f32 %v3111_v34, %v6987_v38  ;;  %v4530_v43 = vpop.f32.mrb[13].mxu0 }
 0x24a   : > { %v3219_v60 = vadd.f32 %v3218_v4, %v3207_v8  ;;  %v3253_v11 = vadd.f32 %v4797_v29, %v6998_v24  ;;  %v3200_v53 = vmul.f32 %v4797_v29, %v4797_v29  ;;  %v3169_v13 = vsel %vm7124_vm15, %v4797_v29, 0.0 }
 0x24b   : > { %v3164_v9 = vsel %vm1714_vm9, %v4787_v14, 0.0  ;;  %v3195_v59 = vmul.f32 %v4787_v14, %v4787_v14  ;;  %v3248_v31 = vadd.f32 %v4787_v14, %v6998_v24  ;;  %v3141_v0 = vpop.f32.mrb[36].mxu1 }
 0x24c   : > { %v3176_v56 = vadd.f32 %v3175_v22, %v3164_v9  ;;  %3269 = vst [vmem:[%s6969_s12 + $0x6c] sm:$0xff] %v3253_v11  ;;  %v4799_v17 = vadd.f32 %v7001_v62, %v3141_v0  ;;  %v4548_v38 = vpop.f32.mrb[37].mxu1  ;;  %v3166_v62 = vsel %vm1716_vm5, %v7022_v40, 0.0  ;;  %v3168_v40 = vsel %vm7122_vm0, %v4795_v41, 0.0 }
 0x24d   : > { %v3208_v46 = vsel %vm1714_vm9, %v3195_v59, 0.0  ;;  %3264 = vst [vmem:[%s6969_s12 + $0x44] sm:$0xff] %v3248_v31  ;;  %v3213_v25 = vsel %vm7125_vm2, %v3200_v53, 0.0 }
 0x24e   : > { %v3177_v49 = vadd.f32 %v3176_v56, %v3165_v7  ;;  %v3220_v57 = vadd.f32 %v3219_v60, %v3208_v46  ;;  %v3254_v1 = vadd.f32 %v4799_v17, %v6998_v24  ;;  %v3201_v30 = vmul.f32 %v4799_v17, %v4799_v17 }
 0x24f   : > { %v3170_v45 = vsel %vm7126_vm8, %v4799_v17, 0.0 }
 0x250   : > { %v3178_v47 = vadd.f32 %v3177_v49, %v3166_v62  ;;  %v3221_v16 = vadd.f32 %v3220_v57, %v3209_v33  ;;  %3270 = vst [vmem:[%s6969_s12 + $0x74] sm:$0xff] %v3254_v1  ;;  %v3214_v3 = vsel %vm7127_vm12, %v3201_v30, 0.0 }
 0x252   : > { %v3222_v63 = vadd.f32 %v3221_v16, %v3210_v61  ;;  %v3179_v39 = vadd.f32 %v3178_v47, %v3167_v19 }
 0x254   : > { %v3180_v24 = vadd.f32 %v3179_v39, %v3168_v40  ;;  %v3223_v36 = vadd.f32 %v3222_v63, %v3211_v44 }
 0x256   : > { %v3181_v50 = vadd.f32 %v3180_v24, %v3169_v13  ;;  %v3224_v58 = vadd.f32 %v3223_v36, %v3212_v2 }
 0x258   : > { %v3225_v28 = vadd.f32 %v3224_v58, %v3213_v25  ;;  %v3182_v23 = vadd.f32 %v3181_v50, %v3170_v45 }
 0x25a   : > { %v3183_v51 = vrot.slane %v3182_v23, 4  ;;  %v3226_v6 = vadd.f32 %v3225_v28, %v3214_v3 }
 0x25c   : > { %v3184_v15 = vadd.f32 %v3183_v51, %v3182_v23  ;;  %v3227_v41 = vrot.slane %v3226_v6, 4 }
 0x25e   : > { %v3185_v26 = vrot.slane %v3184_v15, 2  ;;  %v3228_v12 = vadd.f32 %v3227_v41, %v3226_v6 }
 0x260   : > { %v3186_v48 = vadd.f32 %v3185_v26, %v3184_v15  ;;  %v3229_v42 = vrot.slane %v3228_v12, 2 }
 0x262   : > { %v3187_v4 = vrot.slane %v3186_v48, 1  ;;  %v3230_v10 = vadd.f32 %v3229_v42, %v3228_v12 }
 0x264   : > { %v3188_v18 = vadd.f32 %v3187_v4, %v3186_v48  ;;  %v3231_v5 = vrot.slane %v3230_v10, 1 }
 0x266   : > { %v3232_v32 = vadd.f32 %v3231_v5, %v3230_v10  ;;  %3233 = vst [vmem:[%s322_s17] sm:$0xff] %v3188_v18 }
 0x268   : > { %3234 = vst [vmem:[%s326_s21] sm:$0xff] %v3232_v32 }
 0x269 PF: > { %s19_s27 = sadd.s32 1, %s4995_s27  }
 0x26a   : > { %p16_p4 = scmp.ge.s32.totalorder %s19_s27, 4  }
 0x26c   :  { %18 = sbr.rel (!%p16_p4) target bundleno = 1 (0x1), region = 106 }

</bundles_post_ra>
